<compile_context>
chip_gen: v5e
topology: v5e:2x2
jax: 0.10.0
libtpu: 0.0.40
codegen_flags: <defaults>
</compile_context>

<pallas_src>
import functools
import math

import jax
import jax.numpy as jnp
from jax import lax
from jax.experimental import pallas as pl
from jax.experimental.pallas import tpu as pltpu


def _layernorm(x, gamma, beta, eps=1e-5):
    x = x.astype(jnp.float32)
    mu = jnp.mean(x, axis=-1, keepdims=True)
    var = jnp.mean((x - mu) ** 2, axis=-1, keepdims=True)
    return (x - mu) * lax.rsqrt(var + eps) * gamma + beta


# ---------------------------------------------------------------------------
# Stage 1: LayerNorm#1 + fused (all-heads) Q/K/V projections, once per token.
# ---------------------------------------------------------------------------
def _ln_qkv_kernel(x_ref, g1_ref, b1_ref, wq_ref, bq_ref, wk_ref, bk_ref,
                   wv_ref, bv_ref, q_ref, k_ref, v_ref):
    f32, bf16 = jnp.float32, jnp.bfloat16
    xn = _layernorm(x_ref[0], g1_ref[...], b1_ref[...]).astype(bf16)
    q = jnp.dot(xn, wq_ref[...], preferred_element_type=f32) + bq_ref[...]
    k = jnp.dot(xn, wk_ref[...], preferred_element_type=f32) + bk_ref[...]
    v = jnp.dot(xn, wv_ref[...], preferred_element_type=f32) + bv_ref[...]
    q_ref[0] = q.astype(bf16)
    k_ref[0] = k.astype(bf16)
    v_ref[0] = v.astype(bf16)


# ---------------------------------------------------------------------------
# Stage 2: retention (causal, decayed) + output proj + residual + LN2 + FFN.
# ---------------------------------------------------------------------------
def _retention_ffn_kernel(xres_ref, q_ref, k_ref, v_ref,
                          wo_ref, bo_ref, g2_ref, b2_ref,
                          w1_ref, fb1_ref, w2_ref, fb2_ref,
                          out_ref, attn_ref, acc_ref,
                          *, n_heads, tile_q, tile_k):
    f32, bf16 = jnp.float32, jnp.bfloat16
    qi = pl.program_id(1)
    ki = pl.program_id(2)
    nk = pl.num_programs(2)
    row0 = qi * tile_q           # first query row of this tile
    col0 = ki * tile_k           # first key column of this tile

    @pl.when(ki == 0)
    def _init():
        acc_ref[...] = jnp.zeros_like(acc_ref)

    # Does this K tile overlap the causal (lower-triangular) region at all?
    needed = col0 <= row0 + (tile_q - 1)

    @pl.when(needed)
    def _compute():
        i = lax.broadcasted_iota(jnp.int32, (tile_q, 1), 0)
        j = lax.broadcasted_iota(jnp.int32, (1, tile_k), 1)
        causal = (row0 + i) >= (col0 + j)                    # (TQ, TK)
        di = (row0 - col0 + i).astype(f32)                   # (TQ, 1)
        jf = j.astype(f32)                                    # (1, TK)
        ctx_parts = []
        # Per-head loop kept only for QK^T / P.V (projections are fused).
        for h in range(n_heads):
            # gamma_h = 1 - 2^-(5+h); rank-1 decay decomposition per tile:
            #   gamma^(n-m) = gamma^(row0-col0+i) * gamma^(-j)
            log_g = math.log(1.0 - 2.0 ** (-5.0 - h))
            dec = jnp.where(causal,
                            jnp.exp(di * log_g) * jnp.exp(jf * (-log_g)),
                            0.0)
            sc = jnp.einsum("qd,kd->qk", q_ref[0, h], k_ref[0, h],
                            preferred_element_type=f32) * dec
            attn_ref[0, h] = sc.astype(attn_ref.dtype)       # lane-dense
            ctx_parts.append(jnp.dot(sc.astype(bf16), v_ref[0, h],
                                     preferred_element_type=f32))
        # (TQ, H*d_v) context slab -> single fused output projection later.
        acc_ref[...] += jnp.concatenate(ctx_parts, axis=-1)

    @pl.when(jnp.logical_not(needed))
    def _skip():
        attn_ref[...] = jnp.zeros_like(attn_ref)             # fully masked

    @pl.when(ki == nk - 1)
    def _epilogue():
        # Output projection with contraction H*d_v (single MXU matmul).
        ret = jnp.dot(acc_ref[...].astype(bf16), wo_ref[...],
                      preferred_element_type=f32) + bo_ref[...]
        res = ret + xres_ref[0]                    # residual with dec_inputs
        rn = _layernorm(res, g2_ref[...], b2_ref[...]).astype(bf16)
        h1 = jnp.dot(rn, w1_ref[...], preferred_element_type=f32) + fb1_ref[...]
        h1 = jnp.maximum(h1, 0.0).astype(bf16)
        ff = jnp.dot(h1, w2_ref[...], preferred_element_type=f32) + fb2_ref[...]
        # TODO(synk): if the original FeedForwardNet has an internal residual
        # + LayerNorm, add it here once the source is known.
        out_ref[0] = ff.astype(out_ref.dtype)


def decoder_layer_pallas(x, params, *, n_heads, d_k, d_v,
                         tile_q=None, tile_k=None,
                         attn_dtype=jnp.float32,
                         vmem_limit_bytes=32 * 1024 * 1024):
    B, L, D = x.shape
    f32, bf16 = jnp.float32, jnp.bfloat16

    def _pick(t):
        if t is not None:
            return t
        for cand in (256, 128):
            if L % cand == 0:
                return cand
        return L

    tile_q, tile_k = _pick(tile_q), _pick(tile_k)
    assert L % tile_q == 0 and (tile_q % 8 == 0 or tile_q == L)
    assert L % tile_k == 0 and (tile_k % 128 == 0 or tile_k == L)
    nq, nk = L // tile_q, L // tile_k
    hdk, hdv = n_heads * d_k, n_heads * d_v

    # Host-side weight prep: bf16 MXU operands, 1/sqrt(d_k) folded into Wq/bq.
    scale = 1.0 / math.sqrt(d_k)
    wq = (params["wq"] * scale).astype(bf16)
    bq = (params["bq"] * scale).astype(f32)
    wk = params["wk"].astype(bf16)
    bk = params["bk"].astype(f32)
    wv = params["wv"].astype(bf16)
    bv = params["bv"].astype(f32)
    wo = params["wo"].astype(bf16)
    w1 = params["w1"].astype(bf16)
    w2 = params["w2"].astype(bf16)

    def const_spec(a):
        return pl.BlockSpec(a.shape, lambda *_, _nd=a.ndim: (0,) * _nd)

    # ---- Stage 1: LN1 + fused Q/K/V projections (computed once per token) ----
    s1_weights = [params["g1"], params["b1"], wq, bq, wk, bk, wv, bv]
    q, k, v = pl.pallas_call(
        _ln_qkv_kernel,
        grid=(B, nq),
        in_specs=[pl.BlockSpec((1, tile_q, D), lambda b, i: (b, i, 0))]
                 + [const_spec(w) for w in s1_weights],
        out_specs=[pl.BlockSpec((1, tile_q, hdk), lambda b, i: (b, i, 0)),
                   pl.BlockSpec((1, tile_q, hdk), lambda b, i: (b, i, 0)),
                   pl.BlockSpec((1, tile_q, hdv), lambda b, i: (b, i, 0))],
        out_shape=[jax.ShapeDtypeStruct((B, L, hdk), bf16),
                   jax.ShapeDtypeStruct((B, L, hdk), bf16),
                   jax.ShapeDtypeStruct((B, L, hdv), bf16)],
        compiler_params=pltpu.CompilerParams(
            dimension_semantics=("parallel", "parallel"),
            vmem_limit_bytes=vmem_limit_bytes),
    )(x, *s1_weights)

    # Head-major relayout in the wrapper (cheap one-time bf16 XLA transpose).
    q = q.reshape(B, L, n_heads, d_k).transpose(0, 2, 1, 3)
    k = k.reshape(B, L, n_heads, d_k).transpose(0, 2, 1, 3)
    v = v.reshape(B, L, n_heads, d_v).transpose(0, 2, 1, 3)

    # ---- Stage 2: retention + output proj + residual + LN2 + FFN ----
    s2_weights = [wo, params["bo"], params["g2"], params["b2"],
                  w1, params["fb1"], w2, params["fb2"]]
    kernel = functools.partial(_retention_ffn_kernel, n_heads=n_heads,
                               tile_q=tile_q, tile_k=tile_k)
    out, attn = pl.pallas_call(
        kernel,
        grid=(B, nq, nk),
        in_specs=[pl.BlockSpec((1, tile_q, D), lambda b, qi, ki: (b, qi, 0)),
                  pl.BlockSpec((1, n_heads, tile_q, d_k),
                               lambda b, qi, ki: (b, 0, qi, 0)),
                  pl.BlockSpec((1, n_heads, tile_k, d_k),
                               lambda b, qi, ki: (b, 0, ki, 0)),
                  pl.BlockSpec((1, n_heads, tile_k, d_v),
                               lambda b, qi, ki: (b, 0, ki, 0))]
                 + [const_spec(w) for w in s2_weights],
        out_specs=(pl.BlockSpec((1, tile_q, D), lambda b, qi, ki: (b, qi, 0)),
                   pl.BlockSpec((1, n_heads, tile_q, tile_k),
                                lambda b, qi, ki: (b, 0, qi, ki))),
        out_shape=(jax.ShapeDtypeStruct((B, L, D), jnp.float32),
                   jax.ShapeDtypeStruct((B, n_heads, L, L), attn_dtype)),
        scratch_shapes=[pltpu.VMEM((tile_q, hdv), jnp.float32)],
        compiler_params=pltpu.CompilerParams(
            dimension_semantics=("parallel", "parallel", "arbitrary"),
            vmem_limit_bytes=vmem_limit_bytes),
    )(x, q, k, v, *s2_weights)
    return out, attn


def make_params(key, *, n_heads, d_model, d_k, d_v, d_ff):
    """Deterministic synthetic parameter init (matches module shapes)."""
    ks = jax.random.split(key, 6)
    s = 0.05
    return {
        "g1":  jnp.ones((1, d_model), jnp.float32),
        "b1":  jnp.zeros((1, d_model), jnp.float32),
        "wq":  s * jax.random.normal(ks[0], (d_model, n_heads * d_k), jnp.float32),
        "bq":  jnp.zeros((1, n_heads * d_k), jnp.float32),
        "wk":  s * jax.random.normal(ks[1], (d_model, n_heads * d_k), jnp.float32),
        "bk":  jnp.zeros((1, n_heads * d_k), jnp.float32),
        "wv":  s * jax.random.normal(ks[2], (d_model, n_heads * d_v), jnp.float32),
        "bv":  jnp.zeros((1, n_heads * d_v), jnp.float32),
        "wo":  s * jax.random.normal(ks[3], (n_heads * d_v, d_model), jnp.float32),
        "bo":  jnp.zeros((1, d_model), jnp.float32),
        "g2":  jnp.ones((1, d_model), jnp.float32),
        "b2":  jnp.zeros((1, d_model), jnp.float32),
        "w1":  s * jax.random.normal(ks[4], (d_model, d_ff), jnp.float32),
        "fb1": jnp.zeros((1, d_ff), jnp.float32),
        "w2":  s * jax.random.normal(ks[5], (d_ff, d_model), jnp.float32),
        "fb2": jnp.zeros((1, d_model), jnp.float32),
    }


def decoder_layer_ref(x, params, *, n_heads, d_k, d_v):
    """Pure-JAX reference with the same bf16-input / f32-accum matmuls."""
    f32, bf16 = jnp.float32, jnp.bfloat16
    B, L, D = x.shape

    def mm(a, w):
        return jnp.einsum("...ij,jk->...ik", a.astype(bf16), w.astype(bf16),
                          preferred_element_type=f32)

    xn = _layernorm(x, params["g1"], params["b1"])
    q = mm(xn, params["wq"]) + params["bq"]
    k = mm(xn, params["wk"]) + params["bk"]
    v = mm(xn, params["wv"]) + params["bv"]
    q = q.reshape(B, L, n_heads, d_k).transpose(0, 2, 1, 3)
    k = k.reshape(B, L, n_heads, d_k).transpose(0, 2, 1, 3)
    v = v.reshape(B, L, n_heads, d_v).transpose(0, 2, 1, 3)
    sc = jnp.einsum("bhld,bhmd->bhlm", q.astype(bf16), k.astype(bf16),
                    preferred_element_type=f32)
    n = jnp.arange(L, dtype=f32)
    diff = n[:, None] - n[None, :]
    gammas = 1.0 - 2.0 ** (-5.0 - jnp.arange(n_heads, dtype=f32))
    dmask = jnp.where(diff >= 0, gammas[:, None, None] ** diff[None], 0.0)
    dmask = dmask / (d_k ** 0.5)                 # scale folded into the mask
    sc = sc * dmask[None]
    ctx = jnp.einsum("bhlm,bhmd->bhld", sc.astype(bf16), v.astype(bf16),
                     preferred_element_type=f32)
    ctx = ctx.transpose(0, 2, 1, 3).reshape(B, L, n_heads * d_v)
    ret = mm(ctx, params["wo"]) + params["bo"]
    res = ret + x
    rn = _layernorm(res, params["g2"], params["b2"])
    h1 = jnp.maximum(mm(rn, params["w1"]) + params["fb1"], 0.0)
    out = mm(h1, params["w2"]) + params["fb2"]
    return out, sc


if __name__ == "__main__":
    n_heads, d_model, d_k, d_v, d_ff = 4, 64, 16, 16, 128
    B, L = 2, 256
    tile_q = tile_k = 128        # grid (B, 2, 2); the (qi=0, ki=1) K tile is
                                 # fully above the diagonal and is skipped.

    key = jax.random.PRNGKey(0)
    kx, kp = jax.random.split(key)
    x = jax.random.normal(kx, (B, L, d_model), jnp.float32)
    params = make_params(kp, n_heads=n_heads, d_model=d_model,
                         d_k=d_k, d_v=d_v, d_ff=d_ff)

    fwd = jax.jit(functools.partial(decoder_layer_pallas, n_heads=n_heads,
                                    d_k=d_k, d_v=d_v,
                                    tile_q=tile_q, tile_k=tile_k))
    out, attn = fwd(x, params)
    jax.block_until_ready((out, attn))

    out_ref, attn_ref = decoder_layer_ref(x, params, n_heads=n_heads,
                                          d_k=d_k, d_v=d_v)
    assert out.shape == (B, L, d_model) and attn.shape == (B, n_heads, L, L)
    assert jnp.allclose(out, out_ref, atol=2e-2, rtol=2e-2), \
        float(jnp.max(jnp.abs(out - out_ref)))
    assert jnp.allclose(attn, attn_ref, atol=2e-2, rtol=2e-2), \
        float(jnp.max(jnp.abs(attn - attn_ref)))

    print("KERNEL_OK")
</pallas_src>

<mosaic_0001>
module attributes {stable_mosaic.version = 11 : i64} {
  func.func @_retention_ffn_kernel(%arg0: i32, %arg1: i32, %arg2: i32, %arg3: memref<1x128x64xf32, #tpu.memory_space<vmem>>, %arg4: memref<1x4x128x16xbf16, #tpu.memory_space<vmem>>, %arg5: memref<1x4x128x16xbf16, #tpu.memory_space<vmem>>, %arg6: memref<1x4x128x16xbf16, #tpu.memory_space<vmem>>, %arg7: memref<64x64xbf16, #tpu.memory_space<vmem>>, %arg8: memref<1x64xf32, #tpu.memory_space<vmem>>, %arg9: memref<1x64xf32, #tpu.memory_space<vmem>>, %arg10: memref<1x64xf32, #tpu.memory_space<vmem>>, %arg11: memref<64x128xbf16, #tpu.memory_space<vmem>>, %arg12: memref<1x128xf32, #tpu.memory_space<vmem>>, %arg13: memref<128x64xbf16, #tpu.memory_space<vmem>>, %arg14: memref<1x64xf32, #tpu.memory_space<vmem>>, %arg15: memref<1x128x64xf32, #tpu.memory_space<vmem>>, %arg16: memref<1x4x128x128xf32, #tpu.memory_space<vmem>>, %arg17: memref<128x64xf32, #tpu.memory_space<vmem>>) attributes {dimension_semantics = [#tpu.dimension_semantics<parallel>, #tpu.dimension_semantics<parallel>, #tpu.dimension_semantics<arbitrary>], iteration_bounds = array<i64: 2, 2, 2>, scalar_prefetch = 0 : i64, scratch_operands = 1 : i64, tpu.core_type = #tpu.core_type<tc>, window_params = [{transform_indices = @transform_0, window_bounds = array<i64: 1, 128, 64>}, {transform_indices = @transform_1, window_bounds = array<i64: 1, 4, 128, 16>}, {transform_indices = @transform_2, window_bounds = array<i64: 1, 4, 128, 16>}, {transform_indices = @transform_3, window_bounds = array<i64: 1, 4, 128, 16>}, {pipeline_mode = #tpu.pipeline_mode<synchronous>, transform_indices = @transform_4, window_bounds = array<i64: 64, 64>}, {pipeline_mode = #tpu.pipeline_mode<synchronous>, transform_indices = @transform_5, window_bounds = array<i64: 1, 64>}, {pipeline_mode = #tpu.pipeline_mode<synchronous>, transform_indices = @transform_6, window_bounds = array<i64: 1, 64>}, {pipeline_mode = #tpu.pipeline_mode<synchronous>, transform_indices = @transform_7, window_bounds = array<i64: 1, 64>}, {pipeline_mode = #tpu.pipeline_mode<synchronous>, transform_indices = @transform_8, window_bounds = array<i64: 64, 128>}, {pipeline_mode = #tpu.pipeline_mode<synchronous>, transform_indices = @transform_9, window_bounds = array<i64: 1, 128>}, {pipeline_mode = #tpu.pipeline_mode<synchronous>, transform_indices = @transform_10, window_bounds = array<i64: 128, 64>}, {pipeline_mode = #tpu.pipeline_mode<synchronous>, transform_indices = @transform_11, window_bounds = array<i64: 1, 64>}, {transform_indices = @transform_12, window_bounds = array<i64: 1, 128, 64>}, {transform_indices = @transform_13, window_bounds = array<i64: 1, 4, 128, 128>}]} {
    %c128_i32 = arith.constant 128 : i32
    %0 = arith.muli %arg1, %c128_i32 : i32
    %c128_i32_0 = arith.constant 128 : i32
    %1 = arith.muli %arg2, %c128_i32_0 : i32
    %c0_i32 = arith.constant 0 : i32
    %2 = arith.cmpi eq, %arg2, %c0_i32 : i32
    %3 = arith.extui %2 : i1 to i32
    %c0_i32_1 = arith.constant 0 : i32
    %4 = arith.cmpi ne, %3, %c0_i32_1 : i32
    scf.if %4 {
      %cst = arith.constant 0.000000e+00 : f32
      %15 = vector.broadcast %cst : f32 to vector<128x64xf32>
      %c0 = arith.constant 0 : index
      %c0_5 = arith.constant 0 : index
      %16 = vector.load %arg17[%c0, %c0_5] : memref<128x64xf32, #tpu.memory_space<vmem>>, vector<128x64xf32>
      tpu.vector_store %arg17[%c0, %c0_5], %15 {strides = array<i32>} : memref<128x64xf32, #tpu.memory_space<vmem>>, vector<128x64xf32>,
    } else {
    }
    %c127_i32 = arith.constant 127 : i32
    %5 = arith.addi %0, %c127_i32 : i32
    %6 = arith.cmpi sle, %1, %5 : i32
    %7 = arith.extui %6 : i1 to i32
    %c0_i32_2 = arith.constant 0 : i32
    %8 = arith.cmpi ne, %7, %c0_i32_2 : i32
    scf.if %8 {
      %15 = tpu.iota {dimensions = array<i32: 0>} : vector<128x1xi32>
      %16 = tpu.iota {dimensions = array<i32: 1>} : vector<1x128xi32>
      %17 = vector.broadcast %0 : i32 to vector<128x1xi32>
      %18 = arith.addi %17, %15 : vector<128x1xi32>
      %19 = vector.broadcast %1 : i32 to vector<1x128xi32>
      %20 = arith.addi %19, %16 : vector<1x128xi32>
      %21 = vector.broadcast %18 : vector<128x1xi32> to vector<128x128xi32>
      %22 = vector.broadcast %20 : vector<1x128xi32> to vector<128x128xi32>
      %23 = arith.cmpi sge, %21, %22 : vector<128x128xi32>
      %24 = arith.subi %0, %1 : i32
      %25 = vector.broadcast %24 : i32 to vector<128x1xi32>
      %26 = arith.addi %25, %15 : vector<128x1xi32>
      %27 = arith.sitofp %26 : vector<128x1xi32> to vector<128x1xf32>
      %28 = arith.sitofp %16 : vector<1x128xi32> to vector<1x128xf32>
      %cst = arith.constant -0.0317486972 : f32
      %29 = vector.broadcast %cst : f32 to vector<128x1xf32>
      %30 = arith.mulf %27, %29 : vector<128x1xf32>
      %31 = math.exp %30 : vector<128x1xf32>
      %cst_5 = arith.constant 0.0317486972 : f32
      %32 = vector.broadcast %cst_5 : f32 to vector<1x128xf32>
      %33 = arith.mulf %28, %32 : vector<1x128xf32>
      %34 = math.exp %33 : vector<1x128xf32>
      %35 = vector.broadcast %31 : vector<128x1xf32> to vector<128x128xf32>
      %36 = vector.broadcast %34 : vector<1x128xf32> to vector<128x128xf32>
      %37 = arith.mulf %35, %36 : vector<128x128xf32>
      %cst_6 = arith.constant 0.000000e+00 : f32
      %38 = vector.broadcast %cst_6 : f32 to vector<128x128xf32>
      %39 = arith.select %23, %37, %38 : vector<128x128xi1>, vector<128x128xf32>
      %c0 = arith.constant 0 : index
      %c0_7 = arith.constant 0 : index
      %c0_8 = arith.constant 0 : index
      %c0_9 = arith.constant 0 : index
      %40 = vector.load %arg4[%c0, %c0_7, %c0_8, %c0_9] : memref<1x4x128x16xbf16, #tpu.memory_space<vmem>>, vector<1x1x128x16xbf16>
      %41 = vector.shape_cast %40 : vector<1x1x128x16xbf16> to vector<128x16xbf16>
      %c0_10 = arith.constant 0 : index
      %c0_11 = arith.constant 0 : index
      %c0_12 = arith.constant 0 : index
      %c0_13 = arith.constant 0 : index
      %42 = vector.load %arg5[%c0_10, %c0_11, %c0_12, %c0_13] : memref<1x4x128x16xbf16, #tpu.memory_space<vmem>>, vector<1x1x128x16xbf16>
      %43 = vector.shape_cast %42 : vector<1x1x128x16xbf16> to vector<128x16xbf16>
      "tpu.trace_start"() <{level = 10 : i32, message = "qd,kd->qk"}> : () -> ()
      %cst_14 = arith.constant dense<0.000000e+00> : vector<128x128xf32>
      %44 = tpu.matmul %41, %43, %cst_14 {dimension_numbers = #tpu.dot_dimension_numbers<[1], [1], [0], [0], [0, 0, 1, 0], [], []>} : vector<128x16xbf16>, vector<128x16xbf16>, vector<128x128xf32> -> vector<128x128xf32>
      "tpu.trace_stop"() : () -> ()
      %45 = arith.mulf %44, %39 : vector<128x128xf32>
      %c0_15 = arith.constant 0 : index
      %c0_16 = arith.constant 0 : index
      %c0_17 = arith.constant 0 : index
      %c0_18 = arith.constant 0 : index
      %46 = vector.load %arg16[%c0_15, %c0_16, %c0_17, %c0_18] : memref<1x4x128x128xf32, #tpu.memory_space<vmem>>, vector<1x1x128x128xf32>
      %47 = vector.shape_cast %46 : vector<1x1x128x128xf32> to vector<128x128xf32>
      %48 = vector.shape_cast %45 : vector<128x128xf32> to vector<1x1x128x128xf32>
      tpu.vector_store %arg16[%c0_15, %c0_16, %c0_17, %c0_18], %48 {strides = array<i32>} : memref<1x4x128x128xf32, #tpu.memory_space<vmem>>, vector<1x1x128x128xf32>,
      %49 = arith.truncf %45 : vector<128x128xf32> to vector<128x128xbf16>
      %c0_19 = arith.constant 0 : index
      %c0_20 = arith.constant 0 : index
      %c0_21 = arith.constant 0 : index
      %c0_22 = arith.constant 0 : index
      %50 = vector.load %arg6[%c0_19, %c0_20, %c0_21, %c0_22] : memref<1x4x128x16xbf16, #tpu.memory_space<vmem>>, vector<1x1x128x16xbf16>
      %51 = vector.shape_cast %50 : vector<1x1x128x16xbf16> to vector<128x16xbf16>
      %cst_23 = arith.constant dense<0.000000e+00> : vector<128x16xf32>
      %52 = tpu.matmul %49, %51, %cst_23 {dimension_numbers = #tpu.dot_dimension_numbers<[1], [0], [0], [1], [0, 0, 1, 1], [], []>} : vector<128x128xbf16>, vector<128x16xbf16>, vector<128x16xf32> -> vector<128x16xf32>
      %cst_24 = arith.constant -0.0157483574 : f32
      %53 = vector.broadcast %cst_24 : f32 to vector<128x1xf32>
      %54 = arith.mulf %27, %53 : vector<128x1xf32>
      %55 = math.exp %54 : vector<128x1xf32>
      %cst_25 = arith.constant 0.0157483574 : f32
      %56 = vector.broadcast %cst_25 : f32 to vector<1x128xf32>
      %57 = arith.mulf %28, %56 : vector<1x128xf32>
      %58 = math.exp %57 : vector<1x128xf32>
      %59 = vector.broadcast %55 : vector<128x1xf32> to vector<128x128xf32>
      %60 = vector.broadcast %58 : vector<1x128xf32> to vector<128x128xf32>
      %61 = arith.mulf %59, %60 : vector<128x128xf32>
      %cst_26 = arith.constant 0.000000e+00 : f32
      %62 = vector.broadcast %cst_26 : f32 to vector<128x128xf32>
      %63 = arith.select %23, %61, %62 : vector<128x128xi1>, vector<128x128xf32>
      %c0_27 = arith.constant 0 : index
      %c1 = arith.constant 1 : index
      %c0_28 = arith.constant 0 : index
      %c0_29 = arith.constant 0 : index
      %64 = vector.load %arg4[%c0_27, %c1, %c0_28, %c0_29] : memref<1x4x128x16xbf16, #tpu.memory_space<vmem>>, vector<1x1x128x16xbf16>
      %65 = vector.shape_cast %64 : vector<1x1x128x16xbf16> to vector<128x16xbf16>
      %c0_30 = arith.constant 0 : index
      %c1_31 = arith.constant 1 : index
      %c0_32 = arith.constant 0 : index
      %c0_33 = arith.constant 0 : index
      %66 = vector.load %arg5[%c0_30, %c1_31, %c0_32, %c0_33] : memref<1x4x128x16xbf16, #tpu.memory_space<vmem>>, vector<1x1x128x16xbf16>
      %67 = vector.shape_cast %66 : vector<1x1x128x16xbf16> to vector<128x16xbf16>
      "tpu.trace_start"() <{level = 10 : i32, message = "qd,kd->qk"}> : () -> ()
      %cst_34 = arith.constant dense<0.000000e+00> : vector<128x128xf32>
      %68 = tpu.matmul %65, %67, %cst_34 {dimension_numbers = #tpu.dot_dimension_numbers<[1], [1], [0], [0], [0, 0, 1, 0], [], []>} : vector<128x16xbf16>, vector<128x16xbf16>, vector<128x128xf32> -> vector<128x128xf32>
      "tpu.trace_stop"() : () -> ()
      %69 = arith.mulf %68, %63 : vector<128x128xf32>
      %c0_35 = arith.constant 0 : index
      %c1_36 = arith.constant 1 : index
      %c0_37 = arith.constant 0 : index
      %c0_38 = arith.constant 0 : index
      %70 = vector.load %arg16[%c0_35, %c1_36, %c0_37, %c0_38] : memref<1x4x128x128xf32, #tpu.memory_space<vmem>>, vector<1x1x128x128xf32>
      %71 = vector.shape_cast %70 : vector<1x1x128x128xf32> to vector<128x128xf32>
      %72 = vector.shape_cast %69 : vector<128x128xf32> to vector<1x1x128x128xf32>
      tpu.vector_store %arg16[%c0_35, %c1_36, %c0_37, %c0_38], %72 {strides = array<i32>} : memref<1x4x128x128xf32, #tpu.memory_space<vmem>>, vector<1x1x128x128xf32>,
      %73 = arith.truncf %69 : vector<128x128xf32> to vector<128x128xbf16>
      %c0_39 = arith.constant 0 : index
      %c1_40 = arith.constant 1 : index
      %c0_41 = arith.constant 0 : index
      %c0_42 = arith.constant 0 : index
      %74 = vector.load %arg6[%c0_39, %c1_40, %c0_41, %c0_42] : memref<1x4x128x16xbf16, #tpu.memory_space<vmem>>, vector<1x1x128x16xbf16>
      %75 = vector.shape_cast %74 : vector<1x1x128x16xbf16> to vector<128x16xbf16>
      %cst_43 = arith.constant dense<0.000000e+00> : vector<128x16xf32>
      %76 = tpu.matmul %73, %75, %cst_43 {dimension_numbers = #tpu.dot_dimension_numbers<[1], [0], [0], [1], [0, 0, 1, 1], [], []>} : vector<128x128xbf16>, vector<128x16xbf16>, vector<128x16xf32> -> vector<128x16xf32>
      %cst_44 = arith.constant -0.00784317776 : f32
      %77 = vector.broadcast %cst_44 : f32 to vector<128x1xf32>
      %78 = arith.mulf %27, %77 : vector<128x1xf32>
      %79 = math.exp %78 : vector<128x1xf32>
      %cst_45 = arith.constant 0.00784317776 : f32
      %80 = vector.broadcast %cst_45 : f32 to vector<1x128xf32>
      %81 = arith.mulf %28, %80 : vector<1x128xf32>
      %82 = math.exp %81 : vector<1x128xf32>
      %83 = vector.broadcast %79 : vector<128x1xf32> to vector<128x128xf32>
      %84 = vector.broadcast %82 : vector<1x128xf32> to vector<128x128xf32>
      %85 = arith.mulf %83, %84 : vector<128x128xf32>
      %cst_46 = arith.constant 0.000000e+00 : f32
      %86 = vector.broadcast %cst_46 : f32 to vector<128x128xf32>
      %87 = arith.select %23, %85, %86 : vector<128x128xi1>, vector<128x128xf32>
      %c0_47 = arith.constant 0 : index
      %c2 = arith.constant 2 : index
      %c0_48 = arith.constant 0 : index
      %c0_49 = arith.constant 0 : index
      %88 = vector.load %arg4[%c0_47, %c2, %c0_48, %c0_49] : memref<1x4x128x16xbf16, #tpu.memory_space<vmem>>, vector<1x1x128x16xbf16>
      %89 = vector.shape_cast %88 : vector<1x1x128x16xbf16> to vector<128x16xbf16>
      %c0_50 = arith.constant 0 : index
      %c2_51 = arith.constant 2 : index
      %c0_52 = arith.constant 0 : index
      %c0_53 = arith.constant 0 : index
      %90 = vector.load %arg5[%c0_50, %c2_51, %c0_52, %c0_53] : memref<1x4x128x16xbf16, #tpu.memory_space<vmem>>, vector<1x1x128x16xbf16>
      %91 = vector.shape_cast %90 : vector<1x1x128x16xbf16> to vector<128x16xbf16>
      "tpu.trace_start"() <{level = 10 : i32, message = "qd,kd->qk"}> : () -> ()
      %cst_54 = arith.constant dense<0.000000e+00> : vector<128x128xf32>
      %92 = tpu.matmul %89, %91, %cst_54 {dimension_numbers = #tpu.dot_dimension_numbers<[1], [1], [0], [0], [0, 0, 1, 0], [], []>} : vector<128x16xbf16>, vector<128x16xbf16>, vector<128x128xf32> -> vector<128x128xf32>
      "tpu.trace_stop"() : () -> ()
      %93 = arith.mulf %92, %87 : vector<128x128xf32>
      %c0_55 = arith.constant 0 : index
      %c2_56 = arith.constant 2 : index
      %c0_57 = arith.constant 0 : index
      %c0_58 = arith.constant 0 : index
      %94 = vector.load %arg16[%c0_55, %c2_56, %c0_57, %c0_58] : memref<1x4x128x128xf32, #tpu.memory_space<vmem>>, vector<1x1x128x128xf32>
      %95 = vector.shape_cast %94 : vector<1x1x128x128xf32> to vector<128x128xf32>
      %96 = vector.shape_cast %93 : vector<128x128xf32> to vector<1x1x128x128xf32>
      tpu.vector_store %arg16[%c0_55, %c2_56, %c0_57, %c0_58], %96 {strides = array<i32>} : memref<1x4x128x128xf32, #tpu.memory_space<vmem>>, vector<1x1x128x128xf32>,
      %97 = arith.truncf %93 : vector<128x128xf32> to vector<128x128xbf16>
      %c0_59 = arith.constant 0 : index
      %c2_60 = arith.constant 2 : index
      %c0_61 = arith.constant 0 : index
      %c0_62 = arith.constant 0 : index
      %98 = vector.load %arg6[%c0_59, %c2_60, %c0_61, %c0_62] : memref<1x4x128x16xbf16, #tpu.memory_space<vmem>>, vector<1x1x128x16xbf16>
      %99 = vector.shape_cast %98 : vector<1x1x128x16xbf16> to vector<128x16xbf16>
      %cst_63 = arith.constant dense<0.000000e+00> : vector<128x16xf32>
      %100 = tpu.matmul %97, %99, %cst_63 {dimension_numbers = #tpu.dot_dimension_numbers<[1], [0], [0], [1], [0, 0, 1, 1], [], []>} : vector<128x128xbf16>, vector<128x16xbf16>, vector<128x16xf32> -> vector<128x16xf32>
      %cst_64 = arith.constant -0.00391389942 : f32
      %101 = vector.broadcast %cst_64 : f32 to vector<128x1xf32>
      %102 = arith.mulf %27, %101 : vector<128x1xf32>
      %103 = math.exp %102 : vector<128x1xf32>
      %cst_65 = arith.constant 0.00391389942 : f32
      %104 = vector.broadcast %cst_65 : f32 to vector<1x128xf32>
      %105 = arith.mulf %28, %104 : vector<1x128xf32>
      %106 = math.exp %105 : vector<1x128xf32>
      %107 = vector.broadcast %103 : vector<128x1xf32> to vector<128x128xf32>
      %108 = vector.broadcast %106 : vector<1x128xf32> to vector<128x128xf32>
      %109 = arith.mulf %107, %108 : vector<128x128xf32>
      %cst_66 = arith.constant 0.000000e+00 : f32
      %110 = vector.broadcast %cst_66 : f32 to vector<128x128xf32>
      %111 = arith.select %23, %109, %110 : vector<128x128xi1>, vector<128x128xf32>
      %c0_67 = arith.constant 0 : index
      %c3 = arith.constant 3 : index
      %c0_68 = arith.constant 0 : index
      %c0_69 = arith.constant 0 : index
      %112 = vector.load %arg4[%c0_67, %c3, %c0_68, %c0_69] : memref<1x4x128x16xbf16, #tpu.memory_space<vmem>>, vector<1x1x128x16xbf16>
      %113 = vector.shape_cast %112 : vector<1x1x128x16xbf16> to vector<128x16xbf16>
      %c0_70 = arith.constant 0 : index
      %c3_71 = arith.constant 3 : index
      %c0_72 = arith.constant 0 : index
      %c0_73 = arith.constant 0 : index
      %114 = vector.load %arg5[%c0_70, %c3_71, %c0_72, %c0_73] : memref<1x4x128x16xbf16, #tpu.memory_space<vmem>>, vector<1x1x128x16xbf16>
      %115 = vector.shape_cast %114 : vector<1x1x128x16xbf16> to vector<128x16xbf16>
      "tpu.trace_start"() <{level = 10 : i32, message = "qd,kd->qk"}> : () -> ()
      %cst_74 = arith.constant dense<0.000000e+00> : vector<128x128xf32>
      %116 = tpu.matmul %113, %115, %cst_74 {dimension_numbers = #tpu.dot_dimension_numbers<[1], [1], [0], [0], [0, 0, 1, 0], [], []>} : vector<128x16xbf16>, vector<128x16xbf16>, vector<128x128xf32> -> vector<128x128xf32>
      "tpu.trace_stop"() : () -> ()
      %117 = arith.mulf %116, %111 : vector<128x128xf32>
      %c0_75 = arith.constant 0 : index
      %c3_76 = arith.constant 3 : index
      %c0_77 = arith.constant 0 : index
      %c0_78 = arith.constant 0 : index
      %118 = vector.load %arg16[%c0_75, %c3_76, %c0_77, %c0_78] : memref<1x4x128x128xf32, #tpu.memory_space<vmem>>, vector<1x1x128x128xf32>
      %119 = vector.shape_cast %118 : vector<1x1x128x128xf32> to vector<128x128xf32>
      %120 = vector.shape_cast %117 : vector<128x128xf32> to vector<1x1x128x128xf32>
      tpu.vector_store %arg16[%c0_75, %c3_76, %c0_77, %c0_78], %120 {strides = array<i32>} : memref<1x4x128x128xf32, #tpu.memory_space<vmem>>, vector<1x1x128x128xf32>,
      %121 = arith.truncf %117 : vector<128x128xf32> to vector<128x128xbf16>
      %c0_79 = arith.constant 0 : index
      %c3_80 = arith.constant 3 : index
      %c0_81 = arith.constant 0 : index
      %c0_82 = arith.constant 0 : index
      %122 = vector.load %arg6[%c0_79, %c3_80, %c0_81, %c0_82] : memref<1x4x128x16xbf16, #tpu.memory_space<vmem>>, vector<1x1x128x16xbf16>
      %123 = vector.shape_cast %122 : vector<1x1x128x16xbf16> to vector<128x16xbf16>
      %cst_83 = arith.constant dense<0.000000e+00> : vector<128x16xf32>
      %124 = tpu.matmul %121, %123, %cst_83 {dimension_numbers = #tpu.dot_dimension_numbers<[1], [0], [0], [1], [0, 0, 1, 1], [], []>} : vector<128x128xbf16>, vector<128x16xbf16>, vector<128x16xf32> -> vector<128x16xf32>
      %c0_84 = arith.constant 0 : index
      %c0_85 = arith.constant 0 : index
      %125 = vector.load %arg17[%c0_84, %c0_85] : memref<128x64xf32, #tpu.memory_space<vmem>>, vector<128x64xf32>
      %126 = tpu.concatenate %52, %76, %100, %124 in 1 : vector<128x16xf32>, vector<128x16xf32>, vector<128x16xf32>, vector<128x16xf32> -> vector<128x64xf32>
      %127 = arith.addf %125, %126 : vector<128x64xf32>
      %c0_86 = arith.constant 0 : index
      %c0_87 = arith.constant 0 : index
      %128 = vector.load %arg17[%c0_86, %c0_87] : memref<128x64xf32, #tpu.memory_space<vmem>>, vector<128x64xf32>
      tpu.vector_store %arg17[%c0_86, %c0_87], %127 {strides = array<i32>} : memref<128x64xf32, #tpu.memory_space<vmem>>, vector<128x64xf32>,
    } else {
    }
    %true = arith.constant true
    %9 = arith.xori %6, %true : i1
    %10 = arith.extui %9 : i1 to i32
    %c0_i32_3 = arith.constant 0 : i32
    %11 = arith.cmpi ne, %10, %c0_i32_3 : i32
    scf.if %11 {
      %cst = arith.constant 0.000000e+00 : f32
      %15 = vector.broadcast %cst : f32 to vector<1x4x128x128xf32>
      %c0 = arith.constant 0 : index
      %c0_5 = arith.constant 0 : index
      %c0_6 = arith.constant 0 : index
      %c0_7 = arith.constant 0 : index
      %16 = vector.load %arg16[%c0, %c0_5, %c0_6, %c0_7] : memref<1x4x128x128xf32, #tpu.memory_space<vmem>>, vector<1x4x128x128xf32>
      tpu.vector_store %arg16[%c0, %c0_5, %c0_6, %c0_7], %15 {strides = array<i32>} : memref<1x4x128x128xf32, #tpu.memory_space<vmem>>, vector<1x4x128x128xf32>,
    } else {
    }
    %c1_i32 = arith.constant 1 : i32
    %12 = arith.cmpi eq, %arg2, %c1_i32 : i32
    %13 = arith.extui %12 : i1 to i32
    %c0_i32_4 = arith.constant 0 : i32
    %14 = arith.cmpi ne, %13, %c0_i32_4 : i32
    scf.if %14 {
      %c0 = arith.constant 0 : index
      %c0_5 = arith.constant 0 : index
      %15 = vector.load %arg17[%c0, %c0_5] : memref<128x64xf32, #tpu.memory_space<vmem>>, vector<128x64xf32>
      %16 = arith.truncf %15 : vector<128x64xf32> to vector<128x64xbf16>
      %c0_6 = arith.constant 0 : index
      %c0_7 = arith.constant 0 : index
      %17 = vector.load %arg7[%c0_6, %c0_7] : memref<64x64xbf16, #tpu.memory_space<vmem>>, vector<64x64xbf16>
      %cst = arith.constant dense<0.000000e+00> : vector<128x64xf32>
      %18 = tpu.matmul %16, %17, %cst {dimension_numbers = #tpu.dot_dimension_numbers<[1], [0], [0], [1], [0, 0, 1, 1], [], []>} : vector<128x64xbf16>, vector<64x64xbf16>, vector<128x64xf32> -> vector<128x64xf32>
      %c0_8 = arith.constant 0 : index
      %c0_9 = arith.constant 0 : index
      %19 = vector.load %arg8[%c0_8, %c0_9] : memref<1x64xf32, #tpu.memory_space<vmem>>, vector<1x64xf32>
      %20 = vector.broadcast %19 : vector<1x64xf32> to vector<128x64xf32>
      %21 = arith.addf %18, %20 : vector<128x64xf32>
      %c0_10 = arith.constant 0 : index
      %c0_11 = arith.constant 0 : index
      %c0_12 = arith.constant 0 : index
      %22 = vector.load %arg3[%c0_10, %c0_11, %c0_12] : memref<1x128x64xf32, #tpu.memory_space<vmem>>, vector<1x128x64xf32>
      %23 = vector.shape_cast %22 : vector<1x128x64xf32> to vector<128x64xf32>
      %24 = arith.addf %21, %23 : vector<128x64xf32>
      %c0_13 = arith.constant 0 : index
      %c0_14 = arith.constant 0 : index
      %25 = vector.load %arg9[%c0_13, %c0_14] : memref<1x64xf32, #tpu.memory_space<vmem>>, vector<1x64xf32>
      %c0_15 = arith.constant 0 : index
      %c0_16 = arith.constant 0 : index
      %26 = vector.load %arg10[%c0_15, %c0_16] : memref<1x64xf32, #tpu.memory_space<vmem>>, vector<1x64xf32>
      %cst_17 = arith.constant dense<0.000000e+00> : vector<128xf32>
      %27 = vector.multi_reduction <add>, %24, %cst_17 [1] : vector<128x64xf32> to vector<128xf32>
      %28 = vector.shape_cast %27 : vector<128xf32> to vector<128x1xf32>
      %cst_18 = arith.constant 6.400000e+01 : f32
      %29 = vector.broadcast %cst_18 : f32 to vector<128x1xf32>
      %30 = arith.divf %28, %29 : vector<128x1xf32>
      %31 = vector.broadcast %30 : vector<128x1xf32> to vector<128x64xf32>
      %32 = arith.subf %24, %31 : vector<128x64xf32>
      %33 = arith.mulf %32, %32 : vector<128x64xf32>
      %cst_19 = arith.constant dense<0.000000e+00> : vector<128xf32>
      %34 = vector.multi_reduction <add>, %33, %cst_19 [1] : vector<128x64xf32> to vector<128xf32>
      %35 = vector.shape_cast %34 : vector<128xf32> to vector<128x1xf32>
      %cst_20 = arith.constant 6.400000e+01 : f32
      %36 = vector.broadcast %cst_20 : f32 to vector<128x1xf32>
      %37 = arith.divf %35, %36 : vector<128x1xf32>
      %38 = vector.broadcast %30 : vector<128x1xf32> to vector<128x64xf32>
      %39 = arith.subf %24, %38 : vector<128x64xf32>
      %cst_21 = arith.constant 9.99999974E-6 : f32
      %40 = vector.broadcast %cst_21 : f32 to vector<128x1xf32>
      %41 = arith.addf %37, %40 : vector<128x1xf32>
      %42 = math.rsqrt %41 : vector<128x1xf32>
      %43 = vector.broadcast %42 : vector<128x1xf32> to vector<128x64xf32>
      %44 = arith.mulf %39, %43 : vector<128x64xf32>
      %45 = vector.broadcast %25 : vector<1x64xf32> to vector<128x64xf32>
      %46 = arith.mulf %44, %45 : vector<128x64xf32>
      %47 = vector.broadcast %26 : vector<1x64xf32> to vector<128x64xf32>
      %48 = arith.addf %46, %47 : vector<128x64xf32>
      %49 = arith.truncf %48 : vector<128x64xf32> to vector<128x64xbf16>
      %c0_22 = arith.constant 0 : index
      %c0_23 = arith.constant 0 : index
      %50 = vector.load %arg11[%c0_22, %c0_23] : memref<64x128xbf16, #tpu.memory_space<vmem>>, vector<64x128xbf16>
      %cst_24 = arith.constant dense<0.000000e+00> : vector<128x128xf32>
      %51 = tpu.matmul %49, %50, %cst_24 {dimension_numbers = #tpu.dot_dimension_numbers<[1], [0], [0], [1], [0, 0, 1, 1], [], []>} : vector<128x64xbf16>, vector<64x128xbf16>, vector<128x128xf32> -> vector<128x128xf32>
      %c0_25 = arith.constant 0 : index
      %c0_26 = arith.constant 0 : index
      %52 = vector.load %arg12[%c0_25, %c0_26] : memref<1x128xf32, #tpu.memory_space<vmem>>, vector<1x128xf32>
      %53 = vector.broadcast %52 : vector<1x128xf32> to vector<128x128xf32>
      %54 = arith.addf %51, %53 : vector<128x128xf32>
      %cst_27 = arith.constant 0.000000e+00 : f32
      %55 = vector.broadcast %cst_27 : f32 to vector<128x128xf32>
      %56 = arith.maximumf %54, %55 : vector<128x128xf32>
      %57 = arith.truncf %56 : vector<128x128xf32> to vector<128x128xbf16>
      %c0_28 = arith.constant 0 : index
      %c0_29 = arith.constant 0 : index
      %58 = vector.load %arg13[%c0_28, %c0_29] : memref<128x64xbf16, #tpu.memory_space<vmem>>, vector<128x64xbf16>
      %cst_30 = arith.constant dense<0.000000e+00> : vector<128x64xf32>
      %59 = tpu.matmul %57, %58, %cst_30 {dimension_numbers = #tpu.dot_dimension_numbers<[1], [0], [0], [1], [0, 0, 1, 1], [], []>} : vector<128x128xbf16>, vector<128x64xbf16>, vector<128x64xf32> -> vector<128x64xf32>
      %c0_31 = arith.constant 0 : index
      %c0_32 = arith.constant 0 : index
      %60 = vector.load %arg14[%c0_31, %c0_32] : memref<1x64xf32, #tpu.memory_space<vmem>>, vector<1x64xf32>
      %61 = vector.broadcast %60 : vector<1x64xf32> to vector<128x64xf32>
      %62 = arith.addf %59, %61 : vector<128x64xf32>
      %c0_33 = arith.constant 0 : index
      %c0_34 = arith.constant 0 : index
      %c0_35 = arith.constant 0 : index
      %63 = vector.load %arg15[%c0_33, %c0_34, %c0_35] : memref<1x128x64xf32, #tpu.memory_space<vmem>>, vector<1x128x64xf32>
      %64 = vector.shape_cast %63 : vector<1x128x64xf32> to vector<128x64xf32>
      %65 = vector.shape_cast %62 : vector<128x64xf32> to vector<1x128x64xf32>
      tpu.vector_store %arg15[%c0_33, %c0_34, %c0_35], %65 {strides = array<i32>} : memref<1x128x64xf32, #tpu.memory_space<vmem>>, vector<1x128x64xf32>,
    } else {
    }
    return
  }
  func.func @transform_0(%arg0: i32, %arg1: i32, %arg2: i32) -> (i32, i32, i32) {
    %c0_i32 = arith.constant 0 : i32
    %c0_i32_0 = arith.constant 0 : i32
    return %arg0, %arg1, %c0_i32 : i32, i32, i32
  }
  func.func @transform_1(%arg0: i32, %arg1: i32, %arg2: i32) -> (i32, i32, i32, i32) {
    %c0_i32 = arith.constant 0 : i32
    %c0_i32_0 = arith.constant 0 : i32
    %c0_i32_1 = arith.constant 0 : i32
    return %arg0, %c0_i32, %arg1, %c0_i32_0 : i32, i32, i32, i32
  }
  func.func @transform_2(%arg0: i32, %arg1: i32, %arg2: i32) -> (i32, i32, i32, i32) {
    %c0_i32 = arith.constant 0 : i32
    %c0_i32_0 = arith.constant 0 : i32
    %c0_i32_1 = arith.constant 0 : i32
    return %arg0, %c0_i32, %arg2, %c0_i32_0 : i32, i32, i32, i32
  }
  func.func @transform_3(%arg0: i32, %arg1: i32, %arg2: i32) -> (i32, i32, i32, i32) {
    %c0_i32 = arith.constant 0 : i32
    %c0_i32_0 = arith.constant 0 : i32
    %c0_i32_1 = arith.constant 0 : i32
    return %arg0, %c0_i32, %arg2, %c0_i32_0 : i32, i32, i32, i32
  }
  func.func @transform_4(%arg0: i32, %arg1: i32, %arg2: i32) -> (i32, i32) {
    %c0_i32 = arith.constant 0 : i32
    %c0_i32_0 = arith.constant 0 : i32
    %c0_i32_1 = arith.constant 0 : i32
    return %c0_i32, %c0_i32_0 : i32, i32
  }
  func.func @transform_5(%arg0: i32, %arg1: i32, %arg2: i32) -> (i32, i32) {
    %c0_i32 = arith.constant 0 : i32
    %c0_i32_0 = arith.constant 0 : i32
    %c0_i32_1 = arith.constant 0 : i32
    return %c0_i32, %c0_i32_0 : i32, i32
  }
  func.func @transform_6(%arg0: i32, %arg1: i32, %arg2: i32) -> (i32, i32) {
    %c0_i32 = arith.constant 0 : i32
    %c0_i32_0 = arith.constant 0 : i32
    %c0_i32_1 = arith.constant 0 : i32
    return %c0_i32, %c0_i32_0 : i32, i32
  }
  func.func @transform_7(%arg0: i32, %arg1: i32, %arg2: i32) -> (i32, i32) {
    %c0_i32 = arith.constant 0 : i32
    %c0_i32_0 = arith.constant 0 : i32
    %c0_i32_1 = arith.constant 0 : i32
    return %c0_i32, %c0_i32_0 : i32, i32
  }
  func.func @transform_8(%arg0: i32, %arg1: i32, %arg2: i32) -> (i32, i32) {
    %c0_i32 = arith.constant 0 : i32
    %c0_i32_0 = arith.constant 0 : i32
    %c0_i32_1 = arith.constant 0 : i32
    return %c0_i32, %c0_i32_0 : i32, i32
  }
  func.func @transform_9(%arg0: i32, %arg1: i32, %arg2: i32) -> (i32, i32) {
    %c0_i32 = arith.constant 0 : i32
    %c0_i32_0 = arith.constant 0 : i32
    %c0_i32_1 = arith.constant 0 : i32
    return %c0_i32, %c0_i32_0 : i32, i32
  }
  func.func @transform_10(%arg0: i32, %arg1: i32, %arg2: i32) -> (i32, i32) {
    %c0_i32 = arith.constant 0 : i32
    %c0_i32_0 = arith.constant 0 : i32
    %c0_i32_1 = arith.constant 0 : i32
    return %c0_i32, %c0_i32_0 : i32, i32
  }
  func.func @transform_11(%arg0: i32, %arg1: i32, %arg2: i32) -> (i32, i32) {
    %c0_i32 = arith.constant 0 : i32
    %c0_i32_0 = arith.constant 0 : i32
    %c0_i32_1 = arith.constant 0 : i32
    return %c0_i32, %c0_i32_0 : i32, i32
  }
  func.func @transform_12(%arg0: i32, %arg1: i32, %arg2: i32) -> (i32, i32, i32) {
    %c0_i32 = arith.constant 0 : i32
    %c0_i32_0 = arith.constant 0 : i32
    return %arg0, %arg1, %c0_i32 : i32, i32, i32
  }
  func.func @transform_13(%arg0: i32, %arg1: i32, %arg2: i32) -> (i32, i32, i32, i32) {
    %c0_i32 = arith.constant 0 : i32
    %c0_i32_0 = arith.constant 0 : i32
    return %arg0, %c0_i32, %arg1, %arg2 : i32, i32, i32, i32
  }
}

module attributes {stable_mosaic.version = 11 : i64} {
  func.func @_ln_qkv_kernel(%arg0: i32, %arg1: i32, %arg2: memref<1x128x64xf32, #tpu.memory_space<vmem>>, %arg3: memref<1x64xf32, #tpu.memory_space<vmem>>, %arg4: memref<1x64xf32, #tpu.memory_space<vmem>>, %arg5: memref<64x64xbf16, #tpu.memory_space<vmem>>, %arg6: memref<1x64xf32, #tpu.memory_space<vmem>>, %arg7: memref<64x64xbf16, #tpu.memory_space<vmem>>, %arg8: memref<1x64xf32, #tpu.memory_space<vmem>>, %arg9: memref<64x64xbf16, #tpu.memory_space<vmem>>, %arg10: memref<1x64xf32, #tpu.memory_space<vmem>>, %arg11: memref<1x128x64xbf16, #tpu.memory_space<vmem>>, %arg12: memref<1x128x64xbf16, #tpu.memory_space<vmem>>, %arg13: memref<1x128x64xbf16, #tpu.memory_space<vmem>>) attributes {dimension_semantics = [#tpu.dimension_semantics<parallel>, #tpu.dimension_semantics<parallel>], iteration_bounds = array<i64: 2, 2>, scalar_prefetch = 0 : i64, scratch_operands = 0 : i64, tpu.core_type = #tpu.core_type<tc>, window_params = [{transform_indices = @transform_0, window_bounds = array<i64: 1, 128, 64>}, {pipeline_mode = #tpu.pipeline_mode<synchronous>, transform_indices = @transform_1, window_bounds = array<i64: 1, 64>}, {pipeline_mode = #tpu.pipeline_mode<synchronous>, transform_indices = @transform_2, window_bounds = array<i64: 1, 64>}, {pipeline_mode = #tpu.pipeline_mode<synchronous>, transform_indices = @transform_3, window_bounds = array<i64: 64, 64>}, {pipeline_mode = #tpu.pipeline_mode<synchronous>, transform_indices = @transform_4, window_bounds = array<i64: 1, 64>}, {pipeline_mode = #tpu.pipeline_mode<synchronous>, transform_indices = @transform_5, window_bounds = array<i64: 64, 64>}, {pipeline_mode = #tpu.pipeline_mode<synchronous>, transform_indices = @transform_6, window_bounds = array<i64: 1, 64>}, {pipeline_mode = #tpu.pipeline_mode<synchronous>, transform_indices = @transform_7, window_bounds = array<i64: 64, 64>}, {pipeline_mode = #tpu.pipeline_mode<synchronous>, transform_indices = @transform_8, window_bounds = array<i64: 1, 64>}, {transform_indices = @transform_9, window_bounds = array<i64: 1, 128, 64>}, {transform_indices = @transform_10, window_bounds = array<i64: 1, 128, 64>}, {transform_indices = @transform_11, window_bounds = array<i64: 1, 128, 64>}]} {
    %c0 = arith.constant 0 : index
    %c0_0 = arith.constant 0 : index
    %c0_1 = arith.constant 0 : index
    %0 = vector.load %arg2[%c0, %c0_0, %c0_1] : memref<1x128x64xf32, #tpu.memory_space<vmem>>, vector<1x128x64xf32>
    %1 = vector.shape_cast %0 : vector<1x128x64xf32> to vector<128x64xf32>
    %c0_2 = arith.constant 0 : index
    %c0_3 = arith.constant 0 : index
    %2 = vector.load %arg3[%c0_2, %c0_3] : memref<1x64xf32, #tpu.memory_space<vmem>>, vector<1x64xf32>
    %c0_4 = arith.constant 0 : index
    %c0_5 = arith.constant 0 : index
    %3 = vector.load %arg4[%c0_4, %c0_5] : memref<1x64xf32, #tpu.memory_space<vmem>>, vector<1x64xf32>
    %cst = arith.constant dense<0.000000e+00> : vector<128xf32>
    %4 = vector.multi_reduction <add>, %1, %cst [1] : vector<128x64xf32> to vector<128xf32>
    %5 = vector.shape_cast %4 : vector<128xf32> to vector<128x1xf32>
    %cst_6 = arith.constant 6.400000e+01 : f32
    %6 = vector.broadcast %cst_6 : f32 to vector<128x1xf32>
    %7 = arith.divf %5, %6 : vector<128x1xf32>
    %8 = vector.broadcast %7 : vector<128x1xf32> to vector<128x64xf32>
    %9 = arith.subf %1, %8 : vector<128x64xf32>
    %10 = arith.mulf %9, %9 : vector<128x64xf32>
    %cst_7 = arith.constant dense<0.000000e+00> : vector<128xf32>
    %11 = vector.multi_reduction <add>, %10, %cst_7 [1] : vector<128x64xf32> to vector<128xf32>
    %12 = vector.shape_cast %11 : vector<128xf32> to vector<128x1xf32>
    %cst_8 = arith.constant 6.400000e+01 : f32
    %13 = vector.broadcast %cst_8 : f32 to vector<128x1xf32>
    %14 = arith.divf %12, %13 : vector<128x1xf32>
    %15 = vector.broadcast %7 : vector<128x1xf32> to vector<128x64xf32>
    %16 = arith.subf %1, %15 : vector<128x64xf32>
    %cst_9 = arith.constant 9.99999974E-6 : f32
    %17 = vector.broadcast %cst_9 : f32 to vector<128x1xf32>
    %18 = arith.addf %14, %17 : vector<128x1xf32>
    %19 = math.rsqrt %18 : vector<128x1xf32>
    %20 = vector.broadcast %19 : vector<128x1xf32> to vector<128x64xf32>
    %21 = arith.mulf %16, %20 : vector<128x64xf32>
    %22 = vector.broadcast %2 : vector<1x64xf32> to vector<128x64xf32>
    %23 = arith.mulf %21, %22 : vector<128x64xf32>
    %24 = vector.broadcast %3 : vector<1x64xf32> to vector<128x64xf32>
    %25 = arith.addf %23, %24 : vector<128x64xf32>
    %26 = arith.truncf %25 : vector<128x64xf32> to vector<128x64xbf16>
    %c0_10 = arith.constant 0 : index
    %c0_11 = arith.constant 0 : index
    %27 = vector.load %arg5[%c0_10, %c0_11] : memref<64x64xbf16, #tpu.memory_space<vmem>>, vector<64x64xbf16>
    %cst_12 = arith.constant dense<0.000000e+00> : vector<128x64xf32>
    %28 = tpu.matmul %26, %27, %cst_12 {dimension_numbers = #tpu.dot_dimension_numbers<[1], [0], [0], [1], [0, 0, 1, 1], [], []>} : vector<128x64xbf16>, vector<64x64xbf16>, vector<128x64xf32> -> vector<128x64xf32>
    %c0_13 = arith.constant 0 : index
    %c0_14 = arith.constant 0 : index
    %29 = vector.load %arg6[%c0_13, %c0_14] : memref<1x64xf32, #tpu.memory_space<vmem>>, vector<1x64xf32>
    %30 = vector.broadcast %29 : vector<1x64xf32> to vector<128x64xf32>
    %31 = arith.addf %28, %30 : vector<128x64xf32>
    %c0_15 = arith.constant 0 : index
    %c0_16 = arith.constant 0 : index
    %32 = vector.load %arg7[%c0_15, %c0_16] : memref<64x64xbf16, #tpu.memory_space<vmem>>, vector<64x64xbf16>
    %cst_17 = arith.constant dense<0.000000e+00> : vector<128x64xf32>
    %33 = tpu.matmul %26, %32, %cst_17 {dimension_numbers = #tpu.dot_dimension_numbers<[1], [0], [0], [1], [0, 0, 1, 1], [], []>} : vector<128x64xbf16>, vector<64x64xbf16>, vector<128x64xf32> -> vector<128x64xf32>
    %c0_18 = arith.constant 0 : index
    %c0_19 = arith.constant 0 : index
    %34 = vector.load %arg8[%c0_18, %c0_19] : memref<1x64xf32, #tpu.memory_space<vmem>>, vector<1x64xf32>
    %35 = vector.broadcast %34 : vector<1x64xf32> to vector<128x64xf32>
    %36 = arith.addf %33, %35 : vector<128x64xf32>
    %c0_20 = arith.constant 0 : index
    %c0_21 = arith.constant 0 : index
    %37 = vector.load %arg9[%c0_20, %c0_21] : memref<64x64xbf16, #tpu.memory_space<vmem>>, vector<64x64xbf16>
    %cst_22 = arith.constant dense<0.000000e+00> : vector<128x64xf32>
    %38 = tpu.matmul %26, %37, %cst_22 {dimension_numbers = #tpu.dot_dimension_numbers<[1], [0], [0], [1], [0, 0, 1, 1], [], []>} : vector<128x64xbf16>, vector<64x64xbf16>, vector<128x64xf32> -> vector<128x64xf32>
    %c0_23 = arith.constant 0 : index
    %c0_24 = arith.constant 0 : index
    %39 = vector.load %arg10[%c0_23, %c0_24] : memref<1x64xf32, #tpu.memory_space<vmem>>, vector<1x64xf32>
    %40 = vector.broadcast %39 : vector<1x64xf32> to vector<128x64xf32>
    %41 = arith.addf %38, %40 : vector<128x64xf32>
    %42 = arith.truncf %31 : vector<128x64xf32> to vector<128x64xbf16>
    %c0_25 = arith.constant 0 : index
    %c0_26 = arith.constant 0 : index
    %c0_27 = arith.constant 0 : index
    %43 = vector.load %arg11[%c0_25, %c0_26, %c0_27] : memref<1x128x64xbf16, #tpu.memory_space<vmem>>, vector<1x128x64xbf16>
    %44 = vector.shape_cast %43 : vector<1x128x64xbf16> to vector<128x64xbf16>
    %45 = vector.shape_cast %42 : vector<128x64xbf16> to vector<1x128x64xbf16>
    tpu.vector_store %arg11[%c0_25, %c0_26, %c0_27], %45 {strides = array<i32>} : memref<1x128x64xbf16, #tpu.memory_space<vmem>>, vector<1x128x64xbf16>,
    %46 = arith.truncf %36 : vector<128x64xf32> to vector<128x64xbf16>
    %c0_28 = arith.constant 0 : index
    %c0_29 = arith.constant 0 : index
    %c0_30 = arith.constant 0 : index
    %47 = vector.load %arg12[%c0_28, %c0_29, %c0_30] : memref<1x128x64xbf16, #tpu.memory_space<vmem>>, vector<1x128x64xbf16>
    %48 = vector.shape_cast %47 : vector<1x128x64xbf16> to vector<128x64xbf16>
    %49 = vector.shape_cast %46 : vector<128x64xbf16> to vector<1x128x64xbf16>
    tpu.vector_store %arg12[%c0_28, %c0_29, %c0_30], %49 {strides = array<i32>} : memref<1x128x64xbf16, #tpu.memory_space<vmem>>, vector<1x128x64xbf16>,
    %50 = arith.truncf %41 : vector<128x64xf32> to vector<128x64xbf16>
    %c0_31 = arith.constant 0 : index
    %c0_32 = arith.constant 0 : index
    %c0_33 = arith.constant 0 : index
    %51 = vector.load %arg13[%c0_31, %c0_32, %c0_33] : memref<1x128x64xbf16, #tpu.memory_space<vmem>>, vector<1x128x64xbf16>
    %52 = vector.shape_cast %51 : vector<1x128x64xbf16> to vector<128x64xbf16>
    %53 = vector.shape_cast %50 : vector<128x64xbf16> to vector<1x128x64xbf16>
    tpu.vector_store %arg13[%c0_31, %c0_32, %c0_33], %53 {strides = array<i32>} : memref<1x128x64xbf16, #tpu.memory_space<vmem>>, vector<1x128x64xbf16>,
    return
  }
  func.func @transform_0(%arg0: i32, %arg1: i32) -> (i32, i32, i32) {
    %c0_i32 = arith.constant 0 : i32
    %c0_i32_0 = arith.constant 0 : i32
    return %arg0, %arg1, %c0_i32 : i32, i32, i32
  }
  func.func @transform_1(%arg0: i32, %arg1: i32) -> (i32, i32) {
    %c0_i32 = arith.constant 0 : i32
    %c0_i32_0 = arith.constant 0 : i32
    %c0_i32_1 = arith.constant 0 : i32
    return %c0_i32, %c0_i32_0 : i32, i32
  }
  func.func @transform_2(%arg0: i32, %arg1: i32) -> (i32, i32) {
    %c0_i32 = arith.constant 0 : i32
    %c0_i32_0 = arith.constant 0 : i32
    %c0_i32_1 = arith.constant 0 : i32
    return %c0_i32, %c0_i32_0 : i32, i32
  }
  func.func @transform_3(%arg0: i32, %arg1: i32) -> (i32, i32) {
    %c0_i32 = arith.constant 0 : i32
    %c0_i32_0 = arith.constant 0 : i32
    %c0_i32_1 = arith.constant 0 : i32
    return %c0_i32, %c0_i32_0 : i32, i32
  }
  func.func @transform_4(%arg0: i32, %arg1: i32) -> (i32, i32) {
    %c0_i32 = arith.constant 0 : i32
    %c0_i32_0 = arith.constant 0 : i32
    %c0_i32_1 = arith.constant 0 : i32
    return %c0_i32, %c0_i32_0 : i32, i32
  }
  func.func @transform_5(%arg0: i32, %arg1: i32) -> (i32, i32) {
    %c0_i32 = arith.constant 0 : i32
    %c0_i32_0 = arith.constant 0 : i32
    %c0_i32_1 = arith.constant 0 : i32
    return %c0_i32, %c0_i32_0 : i32, i32
  }
  func.func @transform_6(%arg0: i32, %arg1: i32) -> (i32, i32) {
    %c0_i32 = arith.constant 0 : i32
    %c0_i32_0 = arith.constant 0 : i32
    %c0_i32_1 = arith.constant 0 : i32
    return %c0_i32, %c0_i32_0 : i32, i32
  }
  func.func @transform_7(%arg0: i32, %arg1: i32) -> (i32, i32) {
    %c0_i32 = arith.constant 0 : i32
    %c0_i32_0 = arith.constant 0 : i32
    %c0_i32_1 = arith.constant 0 : i32
    return %c0_i32, %c0_i32_0 : i32, i32
  }
  func.func @transform_8(%arg0: i32, %arg1: i32) -> (i32, i32) {
    %c0_i32 = arith.constant 0 : i32
    %c0_i32_0 = arith.constant 0 : i32
    %c0_i32_1 = arith.constant 0 : i32
    return %c0_i32, %c0_i32_0 : i32, i32
  }
  func.func @transform_9(%arg0: i32, %arg1: i32) -> (i32, i32, i32) {
    %c0_i32 = arith.constant 0 : i32
    %c0_i32_0 = arith.constant 0 : i32
    return %arg0, %arg1, %c0_i32 : i32, i32, i32
  }
  func.func @transform_10(%arg0: i32, %arg1: i32) -> (i32, i32, i32) {
    %c0_i32 = arith.constant 0 : i32
    %c0_i32_0 = arith.constant 0 : i32
    return %arg0, %arg1, %c0_i32 : i32, i32, i32
  }
  func.func @transform_11(%arg0: i32, %arg1: i32) -> (i32, i32, i32) {
    %c0_i32 = arith.constant 0 : i32
    %c0_i32_0 = arith.constant 0 : i32
    return %arg0, %arg1, %c0_i32 : i32, i32, i32
  }
}

</mosaic_0001>

<bundles_post_ra>
// kernel: decoder_layer_pallas.2
= control target key start
LH: loop header
LB: loop body
LE: loop exit
PB: predicated region body
PF: predicated region fallthrough
CT: control target
= control target key end

     0   :  { %s2814_s0 = inlined_call_operand.vmem [shape: f32[2,256,64], index: 0, kind: input, shape index: {}]   ;;  %s2815_s1 = inlined_call_operand.hbm [shape: f32[1,64], index: 1, kind: input, shape index: {}]   ;;  %s2816_s2 = inlined_call_operand.hbm [shape: f32[1,64], index: 2, kind: input, shape index: {}]   ;;  %s2817_s3 = inlined_call_operand.vmem [shape: bf16[64,64], index: 3, kind: input, shape index: {}]   ;;  %s2818_s4 = inlined_call_operand.vmem [shape: f32[1,64], index: 4, kind: input, shape index: {}]   ;;  %s2819_s5 = inlined_call_operand.vmem [shape: bf16[64,64], index: 5, kind: input, shape index: {}]   ;;  %s2820_s6 = inlined_call_operand.hbm [shape: f32[1,64], index: 6, kind: input, shape index: {}]   ;;  %s2821_s7 = inlined_call_operand.vmem [shape: bf16[64,64], index: 7, kind: input, shape index: {}]   ;;  %s2822_s8 = inlined_call_operand.hbm [shape: f32[1,64], index: 8, kind: input, shape index: {}]   ;;  %s2823_s9 = inlined_call_operand.vmem [shape: bf16[2,256,64], index: 9, kind: output, shape index: {0}]   ;;  %s2824_s10 = inlined_call_operand.vmem [shape: bf16[2,256,64], index: 10, kind: output, shape index: {1}]   ;;  %s2825_s11 = inlined_call_operand.vmem [shape: bf16[2,256,64], index: 11, kind: output, shape index: {2}]  }
   0x1   :  { %2826 = sst [smem:[#allocation12_spill]] %s2815_s1 }
   0x2   :  { %2827 = sst [smem:[#allocation13_spill]] %s2816_s2 }
   0x3   :  { %17 = vsyncpa [#allocation3], 0 }
   0x4   :  { %18 = vsyncpa [#allocation5], 0 }
   0x5   :  { %19 = vsyncpa [#allocation8], 0  ;;  %s2045_s17 = smov 0   ;;  %s2047_s18 = smov 0  }
   0x6   :  { %s2049_s19 = smov 0   ;;  %s2051_s20 = smov 0  }
   0x7   :  { %s2053_s21 = smov 0  }
   0x8 LB: > { %s2828_s2 = sld [smem:[#allocation13_spill]]  ;;  %s1564_s25 = sadd.s32 4294967295, %s1978_s21   ;;  %s1978_s21 = sphi %s2053_s21, %s25_s21   ;;  %s1974_s20 = sphi %s2051_s20, %s2848_s20   ;;  %s1970_s19 = sphi %s2049_s19, %s2847_s19   ;;  %s1966_s18 = sphi %s2047_s18, %s2846_s18   ;;  %s1962_s17 = sphi %s2045_s17, %s2845_s17  }
   0x9   : > { %p1566_p0 = scmp.ge.s32.totalorder %s1978_s21, 1  ;;  %p322_p1 = scmp.lt.s32.totalorder %s1978_s21, 5 }
   0xa   : > { %p2076_p2 = scmp.eq.s32.totalorder %s1564_s25, 0  ;;  %s1980_s28 = smov [#allocation4]  }
   0xb   : > { %p2080_p3 = pnand %p1566_p0, %p322_p1  ;;  %s348_s29 = sshll.u32 %s1980_s28, 4  ;;  %s349_s29 = int_to_ptr.vmem [resolvable:$true] %s348_s29 }
   0xc   : > { %s34_s12 = sadd.s32 1, %s1970_s19  ;;  %s37_s13 = sadd.s32 1, %s1974_s20 }
   0xd   : > { %p1703_p4 = pneg %p2080_p3  ;;  %p35_p6 = scmp.ge.s32.totalorder %s34_s12, 2 }
   0xe   : > { %s346_s24 = sshll.u32 %s2828_s2, 4  ;;  %s2832_s1 = sld [smem:[#allocation12_spill]]  ;;  %s347_s24 = int_to_ptr.hbm [resolvable:$true] %s346_s24 }
   0xf   : > { %p2088_p5 = pnand %p2076_p2, %p1703_p4  ;;  %s2850_s12 = smov (%p35_p6, %s34_s12), 0 }
  0x10   : > { %s2852_s13 = smov (!%p35_p6, %s37_s13), %s1974_s20  ;;  %s1981_s22 = smov [#allocation2]  }
  0x11   : > { %1709 = dma.hbm_to_vmem [thread:$0]  (!%p2088_p5), %s347_s24, 16, %s349_s29, [#allocation5]  }
  0x12   : > { %s336_s23 = sshll.u32 %s1981_s22, 4  ;;  %s367_s2 = sshll.u32 %s2820_s6, 4  ;;  %s337_s23 = int_to_ptr.vmem [resolvable:$true] %s336_s23  ;;  %s368_s2 = int_to_ptr.hbm [resolvable:$true] %s367_s2 }
  0x13   : > { %p39_p7 = scmp.ge.s32.totalorder %s2852_s13, 2  ;;  %s1982_s24 = smov [#allocation6]  }
  0x14   : > { %s334_s16 = sshll.u32 %s2832_s1, 4  ;;  %s369_s29 = sshll.u32 %s1982_s24, 4  ;;  %s335_s16 = int_to_ptr.hbm [resolvable:$true] %s334_s16  ;;  %s370_s29 = int_to_ptr.vmem [resolvable:$true] %s369_s29 }
  0x15   : > { %1706 = dma.hbm_to_vmem [thread:$0]  (!%p2088_p5), %s335_s16, 16, %s337_s23, [#allocation3]  }
  0x16   : > { %s2854_s13 = smov (%p39_p7, %s2852_s13), 0  ;;  %s382_s1 = sshll.u32 %s2822_s8, 4  ;;  %s383_s1 = int_to_ptr.hbm [resolvable:$true] %s382_s1 }
  0x17   : > { %1712 = dma.hbm_to_vmem [thread:$0]  (!%p2088_p5), %s368_s2, 16, %s370_s29, [#allocation5]  }
  0x18   : > { %s1983_s22 = smov [#allocation7]   ;;  %410 = sbr.rel (%p2080_p3) target bundleno = 632 (0x278), region = 56 }
  0x19   : > { %s384_s25 = sshll.u32 %s1983_s22, 4  ;;  %s385_s25 = int_to_ptr.vmem [resolvable:$true] %s384_s25 }
  0x1a   : > { %1715 = dma.hbm_to_vmem [thread:$0]  (!%p2088_p5), %s383_s1, 16, %s385_s25, [#allocation8]  }
  0x1d   : > { %1949 = dma.done.wait (%p2076_p2), [#allocation3], 16  }
  0x1e   : > { %1951 = vsyncadd (%p2076_p2), [#allocation3], 4294967280 }
  0x1f   : > { %1953 = dma.done.wait (%p2076_p2), [#allocation5], 32  }
  0x20   : > { %1955 = vsyncadd (%p2076_p2), [#allocation5], 4294967264 }
  0x21   : > { %1957 = dma.done.wait (%p2076_p2), [#allocation8], 16  }
  0x22   : > { %1959 = vsyncadd (%p2076_p2), [#allocation8], 4294967280  ;;  %s1577_s1 = sshll.u32 %s1962_s17, 4  ;;  %p493_p8 = scmp.lt.s32.totalorder %s1966_s18, 1  ;;  %vm551_vm0 = vcmask 523264   ;;  %v1984_v20 = vmov 64.0  }
  0x23   : > { %p495_p9 = scmp.lt.s32.totalorder %s1577_s1, 31  ;;  %1774 = vrcp.f32 %v1984_v20 }
  0x24   : > { %s2856_s18 = smov (!%p493_p8, %s1966_s18), 1 }
  0x25   : > { %s2858_s1 = smov (!%p495_p9, %s1577_s1), 31  ;;  %s1578_s2 = sshll.u32 %s2856_s18, 5 }
  0x26   : > { %s2133_s27 = sadd.s32 %s1578_s2, %s2858_s1 }
  0x27   : > { %s1579_s30 = sshll.u32 %s2133_s27, 3 }
  0x28   : > { %s2139_s28 = scalar_lea.vmem %s2814_s0, %s1579_s30  ;;  %s2568_s30 = sshll.u32 %s2133_s27, 2 }
  0x29   : > { %v545_v0 = vld [vmem:[%s2139_s28 + $0x60] sm:$0xff]  ;;  %v535_v4 = vld [vmem:[%s2139_s28 + $0x10] sm:$0xff]  ;;  %v546_v6 = vld [vmem:[%s2139_s28 + $0x68] sm:$0xff]  ;;  %v1775_v21 = vpop.eup %1774  ;;  %s2578_s23 = scalar_lea.vmem %s2823_s9, %s2568_s30  ;;  %s2594_s18 = scalar_lea.vmem %s2824_s10, %s2568_s30 }
  0x2a   : > { %v533_v1 = vld [vmem:[%s2139_s28] sm:$0xff]  ;;  %v588_v2 = vsel %vm551_vm0, %v545_v0, 0.0  ;;  %v558_v5 = vsel %vm551_vm0, %v535_v4, 0.0  ;;  %v534_v7 = vld [vmem:[%s2139_s28 + $0x8] sm:$0xff]  ;;  %v2150_v8 = vld [vmem:[%s2139_s28 + $0x18] sm:$0xff]  ;;  %v591_v9 = vsel %vm551_vm0, %v546_v6, 0.0  ;;  %vm605_vm1 = vweird.f32 %v1775_v21  ;;  %s2624_s29 = scalar_lea.vmem %s2825_s11, %s2568_s30 }
  0x2b   : > { %v552_v3 = vsel %vm551_vm0, %v533_v1, 0.0  ;;  %589 = vadd.xlane.f32.xlu1 %v588_v2  ;;  %559 = vadd.xlane.f32.xlu2 %v558_v5  ;;  %v555_v10 = vsel %vm551_vm0, %v534_v7, 0.0  ;;  %v561_v11 = vsel %vm551_vm0, %v2150_v8, 0.0  ;;  %v547_v12 = vld [vmem:[%s2139_s28 + $0x70] sm:$0xff]  ;;  %v548_v13 = vld [vmem:[%s2139_s28 + $0x78] sm:$0xff]  ;;  %v2159_v14 = vld [vmem:[%s2139_s28 + $0x20] sm:$0xff] }
  0x2c   : > { %553 = vadd.xlane.f32.xlu0 %v552_v3  ;;  %v594_v15 = vsel %vm551_vm0, %v547_v12, 0.0  ;;  %v597_v16 = vsel %vm551_vm0, %v548_v13, 0.0  ;;  %v564_v17 = vsel %vm551_vm0, %v2159_v14, 0.0  ;;  %v2166_v18 = vld [vmem:[%s2139_s28 + $0x28] sm:$0xff]  ;;  %v601_v22 = vmul.f32 64.0, %v1775_v21  ;;  %v2188_v43 = vld [vmem:[%s2139_s28 + $0x38] sm:$0xff] }
  0x2d   : > { %v567_v19 = vsel %vm551_vm0, %v2166_v18, 0.0  ;;  %v573_v48 = vsel %vm551_vm0, %v2188_v43, 0.0  ;;  %v2212_v60 = vld [vmem:[%s2139_s28 + $0x30] sm:$0xff] }
  0x2e   : > { %v602_v23 = vsub.f32 1.0, %v601_v22  ;;  %v2258_v22 = vld [vmem:[%s2139_s28 + $0x58] sm:$0xff] }
  0x30   : > { %v603_v24 = vmul.f32 %v1775_v21, %v602_v23 }
  0x32   : > { %v604_v25 = vadd.f32 %v1775_v21, %v603_v24  ;;  %v585_v24 = vsel %vm551_vm0, %v2258_v22, 0.0 }
  0x33   : > { %592 = vadd.xlane.f32.xlu1 %v591_v9  ;;  %562 = vadd.xlane.f32.xlu2 %v561_v11 }
  0x34   : > { %556 = vadd.xlane.f32.xlu0 %v555_v10  ;;  %v2170_v26 = vsel %vm605_vm1, %v1775_v21, %v604_v25 }
  0x3b   : > { %598 = vadd.xlane.f32.xlu1 %v597_v16  ;;  %565 = vadd.xlane.f32.xlu2 %v564_v17  ;;  %v2247_v16 = vld [vmem:[%s2139_s28 + $0x40] sm:$0xff] }
  0x3c   : > { %595 = vadd.xlane.f32.xlu0 %v594_v15  ;;  %v2243_v15 = vld [vmem:[%s2139_s28 + $0x50] sm:$0xff]  ;;  %v576_v20 = vsel %vm551_vm0, %v2247_v16, 0.0 }
  0x44   : > { %568 = vadd.xlane.f32.xlu0 %v567_v19  ;;  %v582_v19 = vsel %vm551_vm0, %v2243_v15, 0.0 }
  0x9e   : > { %v590_v27 = vpop.xlane.xlu1 %589  ;;  %v560_v31 = vpop.xlane.xlu2 %559 }
  0x9f   : > { %v554_v28 = vpop.xlane.xlu0 %553  ;;  %v619_v29 = vmul.f32 %v2170_v26, %v590_v27  ;;  %v609_v42 = vmul.f32 %v2170_v26, %v560_v31  ;;  %v1670_v27 = vld [vmem:[%s2819_s5 + $0x18] sm:$0xff]  ;;  %v2286_v31 = vld [vmem:[%s2821_s7 + $0x10] sm:$0xff] }
  0xa0   : > { %v607_v30 = vmul.f32 %v2170_v26, %v554_v28  ;;  %v2274_v28 = vld [vmem:[%s2821_s7 + $0x18] sm:$0xff]  ;;  %1106 = vmatpush.bf16.msra.mxu1 %v1670_v27 }
  0xa1   : > { %v2174_v32 = vsub.f32 %v545_v0, %v619_v29  ;;  %v2194_v47 = vsub.f32 %v535_v4, %v609_v42  ;;  %1191 = vmatpush.bf16.msra.mxu2 %v2274_v28  ;;  %v1665_v29 = vld [vmem:[%s2817_s3 + $0x10] sm:$0xff] }
  0xa2   : > { %v2176_v33 = vsub.f32 %v533_v1, %v607_v30  ;;  %v570_v1 = vsel %vm551_vm0, %v2212_v60, 0.0  ;;  %v1669_v30 = vld [vmem:[%s2819_s5 + $0x10] sm:$0xff] }
  0xa3   : > { %v651_v34 = vmul.f32 %v2174_v32, %v2174_v32  ;;  %v641_v57 = vmul.f32 %v2194_v47, %v2194_v47 }
  0xa4   : > { %v639_v35 = vmul.f32 %v2176_v33, %v2176_v33  ;;  %1107 = vmatpush.bf16.msra.mxu1 %v1669_v30 }
  0xa5   : > { %v691_v36 = vsel %vm551_vm0, %v651_v34, 0.0  ;;  %v661_v62 = vsel %vm551_vm0, %v641_v57, 0.0  ;;  %1192 = vmatpush.bf16.msra.mxu2 %v2286_v31 }
  0xa6   : > { %v655_v37 = vsel %vm551_vm0, %v639_v35, 0.0  ;;  %v593_v38 = vpop.xlane.xlu1 %592  ;;  %692 = vadd.xlane.f32.xlu0 %v691_v36  ;;  %v563_v46 = vpop.xlane.xlu2 %562 }
  0xa7   : > { %656 = vadd.xlane.f32.xlu1 %v655_v37  ;;  %v557_v39 = vpop.xlane.xlu0 %556  ;;  %v620_v40 = vmul.f32 %v2170_v26, %v593_v38  ;;  %v610_v58 = vmul.f32 %v2170_v26, %v563_v46  ;;  %v1664_v38 = vld [vmem:[%s2817_s3 + $0x8] sm:$0xff]  ;;  %v1663_v46 = vld [vmem:[%s2817_s3] sm:$0xff] }
  0xa8   : > { %v608_v41 = vmul.f32 %v2170_v26, %v557_v39  ;;  %v1668_v39 = vld [vmem:[%s2819_s5 + $0x8] sm:$0xff] }
  0xa9   : > { %v2190_v44 = vsub.f32 %v546_v6, %v620_v40  ;;  %v2220_v0 = vsub.f32 %v2150_v8, %v610_v58  ;;  %v2300_v40 = vld [vmem:[%s2821_s7 + $0x8] sm:$0xff]  ;;  %1108 = vmatpush.bf16.msra.mxu1 %v1668_v39 }
  0xaa   : > { %v2192_v45 = vsub.f32 %v534_v7, %v608_v41  ;;  %v2231_v7 = vld [vmem:[%s2139_s28 + $0x48] sm:$0xff]  ;;  %1193 = vmatpush.bf16.msra.mxu2 %v2300_v40 }
  0xab   : > { %v652_v49 = vmul.f32 %v2190_v44, %v2190_v44  ;;  %v642_v6 = vmul.f32 %v2220_v0, %v2220_v0  ;;  %v579_v10 = vsel %vm551_vm0, %v2231_v7, 0.0 }
  0xac   : > { %v640_v50 = vmul.f32 %v2192_v45, %v2192_v45 }
  0xad   : > { %v694_v51 = vsel %vm551_vm0, %v652_v49, 0.0  ;;  %v664_v11 = vsel %vm551_vm0, %v642_v6, 0.0  ;;  %v2317_v49 = vld [vmem:[%s2821_s7] sm:$0xff] }
  0xae   : > { %v658_v52 = vsel %vm551_vm0, %v640_v50, 0.0  ;;  %574 = vadd.xlane.f32.xlu0 %v573_v48  ;;  %v599_v54 = vpop.xlane.xlu1 %598  ;;  %v566_v2 = vpop.xlane.xlu2 %565  ;;  %v1667_v48 = vld [vmem:[%s2819_s5] sm:$0xff]  ;;  %1194 = vmatpush.bf16.msra.mxu2 %v2317_v49 }
  0xaf   : > { %695 = vadd.xlane.f32.xlu1 %v694_v51  ;;  %v596_v53 = vpop.xlane.xlu0 %595  ;;  %659 = vadd.xlane.f32.xlu2 %v658_v52  ;;  %v622_v56 = vmul.f32 %v2170_v26, %v599_v54  ;;  %v611_v4 = vmul.f32 %v2170_v26, %v566_v2 }
  0xb0   : > { %v621_v55 = vmul.f32 %v2170_v26, %v596_v53  ;;  %1109 = vmatpush.bf16.msra.mxu1 %v1667_v48 }
  0xb1   : > { %v2214_v61 = vsub.f32 %v548_v13, %v622_v56  ;;  %v2234_v8 = vsub.f32 %v2159_v14, %v611_v4 }
  0xb2   : > { %v2209_v59 = vsub.f32 %v547_v12, %v621_v55 }
  0xb3   : > { %v654_v5 = vmul.f32 %v2214_v61, %v2214_v61  ;;  %v643_v13 = vmul.f32 %v2234_v8, %v2234_v8 }
  0xb4   : > { %v653_v63 = vmul.f32 %v2209_v59, %v2209_v59 }
  0xb5   : > { %v700_v9 = vsel %vm551_vm0, %v654_v5, 0.0  ;;  %v667_v17 = vsel %vm551_vm0, %v643_v13, 0.0 }
  0xb6   : > { %v697_v3 = vsel %vm551_vm0, %v653_v63, 0.0 }
  0xb7   : > { %662 = vadd.xlane.f32.xlu1 %v661_v62  ;;  %698 = vadd.xlane.f32.xlu0 %v697_v3  ;;  %v569_v12 = vpop.xlane.xlu0 %568 }
  0xb8   : > { %571 = vadd.xlane.f32.xlu2 %v570_v1  ;;  %v612_v14 = vmul.f32 %v2170_v26, %v569_v12 }
  0xba   : > { %v2255_v21 = vsub.f32 %v2166_v18, %v612_v14  ;;  %v1666_v18 = vld [vmem:[%s2817_s3 + $0x18] sm:$0xff] }
  0xbb   : > { %1021 = vmatpush.bf16.msra.mxu0 %v1666_v18  ;;  %1675 = vmatpush.bf16.msra.mxu3 %v1666_v18 }
  0xbc   : > { %v644_v23 = vmul.f32 %v2255_v21, %v2255_v21 }
  0xbe   : > { %v670_v25 = vsel %vm551_vm0, %v644_v23, 0.0 }
  0xbf   : > { %701 = vadd.xlane.f32.xlu1 %v700_v9  ;;  %580 = vadd.xlane.f32.xlu0 %v579_v10 }
  0xc0   : > { %665 = vadd.xlane.f32.xlu2 %v664_v11  ;;  %1022 = vmatpush.bf16.msra.mxu0 %v1665_v29 }
  0xc1   : > { %1676 = vmatpush.bf16.msra.mxu3 %v1665_v29 }
  0xc4   : > { %1023 = vmatpush.bf16.msra.mxu0 %v1664_v38 }
  0xc5   : > { %1677 = vmatpush.bf16.msra.mxu3 %v1664_v38 }
  0xc7   : > { %668 = vadd.xlane.f32.xlu1 %v667_v17  ;;  %583 = vadd.xlane.f32.xlu0 %v582_v19 }
  0xc8   : > { %577 = vadd.xlane.f32.xlu2 %v576_v20  ;;  %1024 = vmatpush.bf16.msra.mxu0 %v1663_v46 }
  0xc9   : > { %1678 = vmatpush.bf16.msra.mxu3 %v1663_v46 }
  0xcd   : > { %1679 = vmatpush.bf16.msrb.mxu3 %v1670_v27 }
  0xcf   : > { %586 = vadd.xlane.f32.xlu1 %v585_v24 }
  0xd0   : > { %671 = vadd.xlane.f32.xlu2 %v670_v25 }
  0xd1   : > { %1680 = vmatpush.bf16.msrb.mxu3 %v1669_v30 }
  0xd5   : > { %1681 = vmatpush.bf16.msrb.mxu3 %v1668_v39 }
  0xd9   : > { %1682 = vmatpush.bf16.msrb.mxu3 %v1667_v48 }
 0x119   : > { %v693_v35 = vpop.xlane.xlu0 %692 }
 0x11a   : > { %v657_v34 = vpop.xlane.xlu1 %656  ;;  %v715_v37 = vmul.f32 %v693_v35, %v2170_v26 }
 0x11b   : > { %v703_v36 = vmul.f32 %v657_v34, %v2170_v26 }
 0x11c   : > { %v2304_v42 = vadd.f32 1e-05, %v715_v37 }
 0x11d   : > { %v2302_v41 = vadd.f32 1e-05, %v703_v36 }
 0x11e   : > { %vm861_vm2 = vweird.f32 %v2304_v42 }
 0x11f   : > { %1776 = vrsqrt.f32 %v2302_v41  ;;  %vm741_vm5 = vweird.f32 %v2302_v41 }
 0x120   : > { %1778 = vrsqrt.f32 %v2304_v42 }
 0x121   : > { %v575_v51 = vpop.xlane.xlu0 %574 }
 0x122   : > { %v696_v50 = vpop.xlane.xlu1 %695  ;;  %v660_v53 = vpop.xlane.xlu2 %659  ;;  %v614_v54 = vmul.f32 %v2170_v26, %v575_v51 }
 0x123   : > { %v716_v52 = vmul.f32 %v696_v50, %v2170_v26  ;;  %v704_v55 = vmul.f32 %v660_v53, %v2170_v26 }
 0x124   : > { %v2327_v58 = vsub.f32 %v2188_v43, %v614_v54 }
 0x125   : > { %v1777_v56 = vpop.eup %1776  ;;  %v2324_v57 = vadd.f32 1e-05, %v716_v52  ;;  %v2332_v1 = vadd.f32 1e-05, %v704_v55 }
 0x126   : > { %v2329_v62 = vpop.eup %1778  ;;  %v736_v63 = vmul.f32 %v1777_v56, %v2302_v41  ;;  %v646_v4 = vmul.f32 %v2327_v58, %v2327_v58  ;;  %vm742_vm3 = vweird.f32 %v1777_v56 }
 0x127   : > { %v856_v2 = vmul.f32 %v2329_v62, %v2304_v42  ;;  %1780 = vrsqrt.f32 %v2324_v57  ;;  %vm862_vm4 = vweird.f32 %v2329_v62  ;;  %vm2359_vm6 = vmor %vm741_vm5, %vm742_vm3  ;;  %vm871_vm8 = vweird.f32 %v2324_v57 }
 0x128   : > { %v737_v3 = vmul.f32 %v1777_v56, %v736_v63  ;;  %1782 = vrsqrt.f32 %v2332_v1  ;;  %v676_v9 = vsel %vm551_vm0, %v646_v4, 0.0  ;;  %vm2368_vm7 = vmor %vm861_vm2, %vm862_vm4  ;;  %vm751_vm9 = vweird.f32 %v2332_v1 }
 0x129   : > { %v857_v43 = vmul.f32 %v2329_v62, %v856_v2  ;;  %677 = vadd.xlane.f32.xlu0 %v676_v9  ;;  %v2384_v2 = vld [vmem:[#allocation2] ss:$0 sm:$0xff] }
 0x12a   : > { %v738_v5 = vmul.f32 0.5, %v737_v3  ;;  %v663_v6 = vpop.xlane.xlu1 %662  ;;  %v699_v10 = vpop.xlane.xlu0 %698 }
 0x12b   : > { %v858_v11 = vmul.f32 0.5, %v857_v43  ;;  %v705_v12 = vmul.f32 %v663_v6, %v2170_v26  ;;  %v572_v13 = vpop.xlane.xlu2 %571  ;;  %v717_v14 = vmul.f32 %v699_v10, %v2170_v26 }
 0x12c   : > { %v739_v17 = vsub.f32 1.5, %v738_v5  ;;  %v613_v19 = vmul.f32 %v2170_v26, %v572_v13 }
 0x12d   : > { %v1781_v20 = vpop.eup %1780  ;;  %v859_v23 = vsub.f32 1.5, %v858_v11  ;;  %v2346_v24 = vadd.f32 1e-05, %v705_v12  ;;  %v2348_v25 = vadd.f32 1e-05, %v717_v14 }
 0x12e   : > { %v1783_v18 = vpop.eup %1782  ;;  %v740_v27 = vmul.f32 %v1777_v56, %v739_v17  ;;  %v866_v29 = vmul.f32 %v1781_v20, %v2324_v57  ;;  %v2353_v30 = vsub.f32 %v2212_v60, %v613_v19  ;;  %vm872_vm10 = vweird.f32 %v1781_v20 }
 0x12f   : > { %v860_v34 = vmul.f32 %v2329_v62, %v859_v23  ;;  %v746_v35 = vmul.f32 %v1783_v18, %v2332_v1  ;;  %1784 = vrsqrt.f32 %v2346_v24  ;;  %vm752_vm11 = vweird.f32 %v1783_v18  ;;  %vm873_vm12 = vmor %vm871_vm8, %vm872_vm10 }
 0x130   : > { %v867_v37 = vmul.f32 %v1781_v20, %v866_v29  ;;  %1786 = vrsqrt.f32 %v2348_v25  ;;  %v744_v60 = vsel %vm2359_vm6, %v1777_v56, %v740_v27  ;;  %v645_v50 = vmul.f32 %v2353_v30, %v2353_v30  ;;  %vm753_vm14 = vmor %vm751_vm9, %vm752_vm11 }
 0x131   : > { %v747_v39 = vmul.f32 %v1783_v18, %v746_v35  ;;  %v864_v41 = vsel %vm2368_vm7, %v2329_v62, %v860_v34  ;;  %v895_v55 = vmul.f32 %v744_v60, %v2176_v33  ;;  %vm881_vm13 = vweird.f32 %v2348_v25  ;;  %v2419_v35 = vld [vmem:[#allocation4] ss:$0 sm:$0xff] }
 0x132   : > { %v868_v46 = vmul.f32 0.5, %v867_v37  ;;  %v702_v48 = vpop.xlane.xlu1 %701  ;;  %v581_v51 = vpop.xlane.xlu0 %580  ;;  %v673_v63 = vsel %vm551_vm0, %v645_v50, 0.0  ;;  %v907_v4 = vmul.f32 %v864_v41, %v2174_v32  ;;  %vm761_vm2 = vweird.f32 %v2346_v24 }
 0x133   : > { %v748_v42 = vmul.f32 0.5, %v747_v39  ;;  %v718_v52 = vmul.f32 %v702_v48, %v2170_v26  ;;  %v666_v53 = vpop.xlane.xlu2 %665  ;;  %v616_v54 = vmul.f32 %v2170_v26, %v581_v51  ;;  %674 = vadd.xlane.f32.xlu2 %v673_v63 }
 0x134   : > { %v869_v56 = vsub.f32 1.5, %v868_v46  ;;  %v706_v62 = vmul.f32 %v666_v53, %v2170_v26  ;;  %v926_v23 = vmul.f32 %v2384_v2, %v907_v4 }
 0x135   : > { %v2386_v3 = vpop.eup %1784  ;;  %v749_v43 = vsub.f32 1.5, %v748_v42  ;;  %v2389_v5 = vadd.f32 1e-05, %v718_v52  ;;  %v2398_v11 = vsub.f32 %v2231_v7, %v616_v54  ;;  %v914_v7 = vmul.f32 %v2384_v2, %v895_v55 }
 0x136   : > { %v2391_v6 = vpop.eup %1786  ;;  %v870_v9 = vmul.f32 %v1781_v20, %v869_v56  ;;  %v756_v33 = vmul.f32 %v2386_v3, %v2346_v24  ;;  %v2395_v10 = vadd.f32 1e-05, %v706_v62  ;;  %vm762_vm15 = vweird.f32 %v2386_v3 }
 0x137   : > { %v750_v32 = vmul.f32 %v1783_v18, %v749_v43  ;;  %v876_v12 = vmul.f32 %v2391_v6, %v2348_v25  ;;  %1788 = vrsqrt.f32 %v2389_v5  ;;  %vm882_vm1 = vweird.f32 %v2391_v6  ;;  %vm2464_vm6 = vmor %vm761_vm2, %vm762_vm15 }
 0x138   : > { %v874_v13 = vsel %vm873_vm12, %v1781_v20, %v870_v9  ;;  %v757_v14 = vmul.f32 %v2386_v3, %v756_v33  ;;  %1790 = vrsqrt.f32 %v2395_v10  ;;  %v648_v20 = vmul.f32 %v2398_v11, %v2398_v11  ;;  %vm2454_vm3 = vmor %vm881_vm13, %vm882_vm1 }
 0x139   : > { %v908_v57 = vmul.f32 %v874_v13, %v2190_v44  ;;  %v754_v17 = vsel %vm753_vm14, %v1783_v18, %v750_v32  ;;  %v877_v19 = vmul.f32 %v2391_v6, %v876_v12  ;;  %v945_v55 = vadd.f32 %v2419_v35, %v926_v23 }
 0x13a   : > { %v896_v27 = vmul.f32 %v754_v17, %v2192_v45  ;;  %v758_v29 = vmul.f32 0.5, %v757_v14  ;;  %v669_v1 = vpop.xlane.xlu1 %668  ;;  %v584_v34 = vpop.xlane.xlu0 %583  ;;  %v682_v39 = vsel %vm551_vm0, %v648_v20, 0.0  ;;  %vm891_vm4 = vweird.f32 %v2389_v5 }
 0x13b   : > { %v878_v36 = vmul.f32 0.5, %v877_v19  ;;  %v707_v44 = vmul.f32 %v669_v1, %v2170_v26  ;;  %v578_v18 = vpop.xlane.xlu2 %577  ;;  %v617_v37 = vmul.f32 %v2170_v26, %v584_v34  ;;  %v927_v60 = vmul.f32 %v2384_v2, %v908_v57  ;;  %683 = vadd.xlane.f32.xlu2 %v682_v39 }
 0x13c   : > { %v759_v38 = vsub.f32 1.5, %v758_v29  ;;  %v615_v45 = vmul.f32 %v2170_v26, %v578_v18  ;;  %v915_v41 = vmul.f32 %v2384_v2, %v896_v27  ;;  %vm771_vm9 = vweird.f32 %v2395_v10 }
 0x13d   : > { %v2427_v46 = vpop.eup %1788  ;;  %v879_v48 = vsub.f32 1.5, %v878_v36  ;;  %v2430_v50 = vadd.f32 1e-05, %v707_v44  ;;  %v946_v51 = vadd.f32 %v2419_v35, %v927_v60  ;;  %v2439_v54 = vsub.f32 %v2243_v15, %v617_v37 }
 0x13e   : > { %v1791_v42 = vpop.eup %1790  ;;  %v886_v52 = vmul.f32 %v2427_v46, %v2389_v5  ;;  %v2436_v53 = vsub.f32 %v2247_v16, %v615_v45  ;;  %v760_v56 = vmul.f32 %v2386_v3, %v759_v38  ;;  %v933_v16 = vadd.f32 %v2419_v35, %v914_v7 }
 0x13f   : > { %v880_v62 = vmul.f32 %v2391_v6, %v879_v48  ;;  %v766_v63 = vmul.f32 %v1791_v42, %v2395_v10  ;;  %1792 = vrsqrt.f32 %v2430_v50  ;;  %v934_v43 = vadd.f32 %v2419_v35, %v915_v41 }
 0x140   : > { %v887_v4 = vmul.f32 %v2427_v46, %v886_v52  ;;  %vm892_vm5 = vweird.f32 %v2427_v46  ;;  %v2460_v24 = vpack.c.bf16 %v946_v51, %v945_v55  ;;  %v647_v14 = vmul.f32 %v2436_v53, %v2436_v53 }
 0x141   : > { %v767_v9 = vmul.f32 %v1791_v42, %v766_v63  ;;  %v884_v25 = vsel %vm2454_vm3, %v2391_v6, %v880_v62  ;;  %v949_v12 = vpack.c.bf16 %v934_v43, %v933_v16  ;;  %v764_v7 = vsel %vm2464_vm6, %v2386_v3, %v760_v56  ;;  %vm893_vm8 = vmor %vm891_vm4, %vm892_vm5 }
 0x142   : > { %v888_v32 = vmul.f32 0.5, %v887_v4  ;;  %v587_v13 = vpop.xlane.xlu1 %586  ;;  %1611 = vmatmul.msk.bf16.vlgmr.msra.gmra.mxu3 %vm551_vm0, %v2460_v24  ;;  %v649_v6 = vmul.f32 %v2439_v54, %v2439_v54  ;;  %vm772_vm7 = vweird.f32 %v1791_v42  ;;  %v679_v27 = vsel %vm551_vm0, %v647_v14, 0.0 }
 0x143   : > { %v768_v57 = vmul.f32 0.5, %v767_v9  ;;  %v618_v17 = vmul.f32 %v2170_v26, %v587_v13  ;;  %v672_v19 = vpop.xlane.xlu2 %671  ;;  %1605 = vmatmul.msk.bf16.vlgmr.msra.gmra.mxu0 %vm551_vm0, %v949_v12  ;;  %1629 = vmatmul.msk.bf16.vlgmr.msra.gmra.mxu1 %vm551_vm0, %v949_v12  ;;  %v909_v1 = vmul.f32 %v884_v25, %v2209_v59  ;;  %v897_v44 = vmul.f32 %v764_v7, %v2194_v47  ;;  %vm773_vm10 = vmor %vm771_vm9, %vm772_vm7 }
 0x144   : > { %v889_v23 = vsub.f32 1.5, %v888_v32  ;;  %v708_v3 = vmul.f32 %v672_v19, %v2170_v26  ;;  %1653 = vmatmul.msk.bf16.vlgmr.msra.gmra.mxu2 %vm551_vm0, %v949_v12  ;;  %680 = vadd.xlane.f32.xlu1 %v679_v27  ;;  %v685_v36 = vsel %vm551_vm0, %v649_v6, 0.0  ;;  %vm781_vm11 = vweird.f32 %v2430_v50 }
 0x145   : > { %v1793_v29 = vpop.eup %1792  ;;  %v769_v20 = vsub.f32 1.5, %v768_v57  ;;  %v2488_v34 = vsub.f32 %v2258_v22, %v618_v17  ;;  %686 = vadd.xlane.f32.xlu0 %v685_v36  ;;  %1683 = vmatpush.bf16.msra.mxu3 %v2274_v28  ;;  %v928_v39 = vmul.f32 %v2384_v2, %v909_v1  ;;  %v916_v10 = vmul.f32 %v2384_v2, %v897_v44 }
 0x146   : > { %v890_v18 = vmul.f32 %v2427_v46, %v889_v23  ;;  %v776_v37 = vmul.f32 %v1793_v29, %v2430_v50  ;;  %v724_v60 = vadd.f32 1e-05, %v708_v3  ;;  %vm782_vm12 = vweird.f32 %v1793_v29 }
 0x147   : > { %v770_v59 = vmul.f32 %v1791_v42, %v769_v20  ;;  %v650_v22 = vmul.f32 %v2488_v34, %v2488_v34  ;;  %vm783_vm13 = vmor %vm781_vm11, %vm782_vm12 }
 0x148   : > { %v894_v47 = vsel %vm893_vm8, %v2427_v46, %v890_v18  ;;  %v777_v38 = vmul.f32 %v1793_v29, %v776_v37  ;;  %1794 = vrsqrt.f32 %v724_v60  ;;  %vm791_vm14 = vweird.f32 %v724_v60 }
 0x149   : > { %v910_v45 = vmul.f32 %v894_v47, %v2214_v61  ;;  %v774_v28 = vsel %vm773_vm10, %v1791_v42, %v770_v59  ;;  %v688_v48 = vsel %vm551_vm0, %v650_v22, 0.0  ;;  %1684 = vmatpush.bf16.msra.mxu3 %v2286_v31  ;;  %v947_v61 = vadd.f32 %v2419_v35, %v928_v39 }
 0x14a   : > { %v898_v5 = vmul.f32 %v774_v28, %v2220_v0  ;;  %v778_v41 = vmul.f32 0.5, %v777_v38  ;;  %v935_v0 = vadd.f32 %v2419_v35, %v916_v10  ;;  %vm1252_vm8 = vcmask 519168  }
 0x14b   : > { %v929_v46 = vmul.f32 %v2384_v2, %v910_v45 }
 0x14c   : > { %v779_v51 = vsub.f32 1.5, %v778_v41  ;;  %v917_v52 = vmul.f32 %v2384_v2, %v898_v5  ;;  %689 = vadd.xlane.f32.xlu1 %v688_v48 }
 0x14d   : > { %v948_v42 = vadd.f32 %v2419_v35, %v929_v46  ;;  %1685 = vmatpush.bf16.msra.mxu3 %v2300_v40 }
 0x14e   : > { %v1795_v55 = vpop.eup %1794  ;;  %v936_v56 = vadd.f32 %v2419_v35, %v917_v52  ;;  %v780_v31 = vmul.f32 %v1793_v29, %v779_v51 }
 0x14f   : > { %v786_v62 = vmul.f32 %v1795_v55, %v724_v60  ;;  %v956_v63 = vpack.c.bf16 %v948_v42, %v947_v61  ;;  %vm792_vm15 = vweird.f32 %v1795_v55  ;;  %v2563_v61 = vld [vmem:[#allocation6] ss:$0 sm:$0xff] }
 0x150   : > { %v950_v4 = vpack.c.bf16 %v936_v56, %v935_v0  ;;  %v784_v43 = vsel %vm783_vm13, %v1793_v29, %v780_v31  ;;  %vm793_vm1 = vmor %vm791_vm14, %vm792_vm15 }
 0x151   : > { %v787_v16 = vmul.f32 %v1795_v55, %v786_v62  ;;  %1686 = vmatpush.bf16.msra.mxu3 %v2317_v49  ;;  %v899_v50 = vmul.f32 %v784_v43, %v2234_v8 }
 0x152   : > { %1612 = vmatmul.msk.bf16.gmra.mxu3 %vm551_vm0, %v956_v63 }
 0x153   : > { %v788_v15 = vmul.f32 0.5, %v787_v16  ;;  %1606 = vmatmul.msk.bf16.gmra.mxu0 %vm551_vm0, %v950_v4  ;;  %1630 = vmatmul.msk.bf16.gmra.mxu1 %vm551_vm0, %v950_v4  ;;  %v918_v25 = vmul.f32 %v2384_v2, %v899_v50 }
 0x154   : > { %1654 = vmatmul.msk.bf16.gmra.mxu2 %vm551_vm0, %v950_v4 }
 0x155   : > { %v789_v40 = vsub.f32 1.5, %v788_v15  ;;  %v937_v12 = vadd.f32 %v2419_v35, %v918_v25 }
 0x157   : > { %v790_v9 = vmul.f32 %v1795_v55, %v789_v40 }
 0x159   : > { %v794_v33 = vsel %vm793_vm1, %v1795_v55, %v790_v9 }
 0x15a   : > { %v900_v49 = vmul.f32 %v794_v33, %v2255_v21 }
 0x15c   : > { %v919_v32 = vmul.f32 %v2384_v2, %v900_v49 }
 0x15e   : > { %v938_v13 = vadd.f32 %v2419_v35, %v919_v32 }
 0x160   : > { %v951_v14 = vpack.c.bf16 %v938_v13, %v937_v12  ;;  %v2599_v12 = vld [vmem:[#allocation7] ss:$0 sm:$0xff] }
 0x162   : > { %1635 = vmatmul.msk.bf16.vlgmr.msrb.gmra.mxu3 %vm551_vm0, %v2460_v24 }
 0x163   : > { %1607 = vmatmul.msk.bf16.gmra.mxu0 %vm551_vm0, %v951_v14  ;;  %1631 = vmatmul.msk.bf16.gmra.mxu1 %vm551_vm0, %v951_v14 }
 0x164   : > { %1655 = vmatmul.msk.bf16.gmra.mxu2 %vm551_vm0, %v951_v14 }
 0x172   : > { %1636 = vmatmul.msk.bf16.gmra.mxu3 %vm551_vm0, %v956_v63 }
 0x182   : > { %1659 = vmatmul.msk.bf16.vlgmr.msra.gmra.mxu3 %vm551_vm0, %v2460_v24 }
 0x192   : > { %1660 = vmatmul.msk.bf16.gmra.mxu3 %vm551_vm0, %v956_v63 }
 0x19c   : > { %v678_v8 = vpop.xlane.xlu0 %677 }
 0x19d   : > { %v710_v21 = vmul.f32 %v678_v8, %v2170_v26 }
 0x19f   : > { %v726_v7 = vadd.f32 1e-05, %v710_v21 }
 0x1a1   : > { %1796 = vrsqrt.f32 %v726_v7  ;;  %vm811_vm2 = vweird.f32 %v726_v7 }
 0x1a6   : > { %v675_v57 = vpop.xlane.xlu2 %674 }
 0x1a7   : > { %v1797_v17 = vpop.eup %1796  ;;  %v709_v19 = vmul.f32 %v675_v57, %v2170_v26 }
 0x1a8   : > { %v806_v6 = vmul.f32 %v1797_v17, %v726_v7  ;;  %vm812_vm3 = vweird.f32 %v1797_v17 }
 0x1a9   : > { %v725_v23 = vadd.f32 1e-05, %v709_v19  ;;  %vm813_vm4 = vmor %vm811_vm2, %vm812_vm3 }
 0x1aa   : > { %v807_v27 = vmul.f32 %v1797_v17, %v806_v6 }
 0x1ab   : > { %1798 = vrsqrt.f32 %v725_v23  ;;  %vm801_vm6 = vweird.f32 %v725_v23 }
 0x1ac   : > { %v808_v3 = vmul.f32 0.5, %v807_v27 }
 0x1ae   : > { %v809_v29 = vsub.f32 1.5, %v808_v3  ;;  %v684_v1 = vpop.xlane.xlu2 %683 }
 0x1af   : > { %v712_v24 = vmul.f32 %v684_v1, %v2170_v26 }
 0x1b0   : > { %v810_v44 = vmul.f32 %v1797_v17, %v809_v29 }
 0x1b1   : > { %v1799_v20 = vpop.eup %1798  ;;  %v2541_v36 = vadd.f32 1e-05, %v712_v24 }
 0x1b2   : > { %v796_v18 = vmul.f32 %v1799_v20, %v725_v23  ;;  %v814_v60 = vsel %vm813_vm4, %v1797_v17, %v810_v44  ;;  %vm802_vm5 = vweird.f32 %v1799_v20 }
 0x1b3   : > { %1800 = vrsqrt.f32 %v2541_v36  ;;  %v902_v5 = vmul.f32 %v814_v60, %v2327_v58  ;;  %vm803_vm7 = vmor %vm801_vm6, %vm802_vm5  ;;  %v2561_v58 = vld [vmem:[%s2818_s4] ss:$0 sm:$0xff]  ;;  %vm831_vm9 = vweird.f32 %v2541_v36 }
 0x1b4   : > { %v797_v37 = vmul.f32 %v1799_v20, %v796_v18 }
 0x1b5   : > { %v921_v55 = vmul.f32 %v2384_v2, %v902_v5 }
 0x1b6   : > { %v798_v59 = vmul.f32 0.5, %v797_v37 }
 0x1b7   : > { %v681_v22 = vpop.xlane.xlu1 %680  ;;  %v940_v50 = vadd.f32 %v2419_v35, %v921_v55 }
 0x1b8   : > { %v711_v47 = vmul.f32 %v681_v22, %v2170_v26  ;;  %v687_v38 = vpop.xlane.xlu0 %686  ;;  %v799_v45 = vsub.f32 1.5, %v798_v59 }
 0x1b9   : > { %v713_v28 = vmul.f32 %v687_v38, %v2170_v26  ;;  %v2546_v39 = vpop.eup %1800 }
 0x1ba   : > { %v2549_v41 = vadd.f32 1e-05, %v711_v47  ;;  %v800_v48 = vmul.f32 %v1799_v20, %v799_v45  ;;  %v826_v10 = vmul.f32 %v2546_v39, %v2541_v36  ;;  %vm832_vm10 = vweird.f32 %v2546_v39 }
 0x1bb   : > { %v2553_v46 = vadd.f32 1e-05, %v713_v28  ;;  %vm2605_vm11 = vmor %vm831_vm9, %vm832_vm10 }
 0x1bc   : > { %1802 = vrsqrt.f32 %v2549_v41  ;;  %v804_v51 = vsel %vm803_vm7, %v1799_v20, %v800_v48  ;;  %v827_v52 = vmul.f32 %v2546_v39, %v826_v10  ;;  %vm821_vm13 = vweird.f32 %v2549_v41 }
 0x1bd   : > { %1804 = vrsqrt.f32 %v2553_v46  ;;  %v901_v42 = vmul.f32 %v804_v51, %v2353_v30  ;;  %vm841_vm15 = vweird.f32 %v2553_v46 }
 0x1be   : > { %v828_v0 = vmul.f32 0.5, %v827_v52 }
 0x1bf   : > { %v690_v56 = vpop.xlane.xlu1 %689  ;;  %v920_v4 = vmul.f32 %v2384_v2, %v901_v42 }
 0x1c0   : > { %v714_v31 = vmul.f32 %v690_v56, %v2170_v26  ;;  %v1026_v62 = vpop.f32.mrf.mxu0  ;;  %v1111_v63 = vpop.f32.mrf.mxu1  ;;  %v829_v16 = vsub.f32 1.5, %v828_v0 }
 0x1c1   : > { %v1027_v43 = vadd.f32 %v2561_v58, %v1026_v62  ;;  %v1112_v30 = vadd.f32 %v2563_v61, %v1111_v63  ;;  %v939_v40 = vadd.f32 %v2419_v35, %v920_v4 }
 0x1c2   : > { %v1803_v15 = vpop.eup %1802  ;;  %v2581_v26 = vadd.f32 1e-05, %v714_v31  ;;  %v830_v33 = vmul.f32 %v2546_v39, %v829_v16 }
 0x1c3   : > { %v2585_v9 = vpop.eup %1804  ;;  %v816_v49 = vmul.f32 %v1803_v15, %v2549_v41  ;;  %v1236_v25 = vpack.c.bf16 %v1027_v43, %v1027_v43  ;;  %v1269_v14 = vpack.c.bf16 %v1112_v30, %v1112_v30  ;;  %v952_v8 = vpack.c.bf16 %v940_v50, %v939_v40 }
 0x1c4   : > { %v836_v32 = vmul.f32 %v2585_v9, %v2553_v46  ;;  %1806 = vrsqrt.f32 %v2581_v26  ;;  %v834_v17 = vsel %vm2605_vm11, %v2546_v39, %v830_v33  ;;  %vm822_vm12 = vweird.f32 %v1803_v15 }
 0x1c5   : > { %v817_v13 = vmul.f32 %v1803_v15, %v816_v49  ;;  %1253 = vst.msk [vmem:[%s2578_s23] sm:$0xf] %vm1252_vm8, %v1236_v25  ;;  %v1056_v21 = vpop.f32.mrf.mxu3  ;;  %1608 = vmatmul.msk.bf16.gmra.mxu0 %vm551_vm0, %v952_v8  ;;  %1632 = vmatmul.msk.bf16.gmra.mxu1 %vm551_vm0, %v952_v8  ;;  %v904_v18 = vmul.f32 %v834_v17, %v2398_v11  ;;  %vm823_vm14 = vmor %vm821_vm13, %vm822_vm12  ;;  %vm842_vm1 = vweird.f32 %v2585_v9  ;;  %vm851_vm2 = vweird.f32 %v2581_v26 }
 0x1c6   : > { %v1057_v57 = vadd.f32 %v2561_v58, %v1056_v21  ;;  %1285 = vst.msk [vmem:[%s2594_s18] sm:$0xf] %vm1252_vm8, %v1269_v14  ;;  %v837_v23 = vmul.f32 %v2585_v9, %v836_v32  ;;  %1656 = vmatmul.msk.bf16.gmra.mxu2 %vm551_vm0, %v952_v8  ;;  %vm2658_vm4 = vmor %vm841_vm15, %vm842_vm1 }
 0x1c7   : > { %v818_v19 = vmul.f32 0.5, %v817_v13  ;;  %v1196_v6 = vpop.f32.mrf.mxu2  ;;  %v923_v41 = vmul.f32 %v2384_v2, %v904_v18 }
 0x1c8   : > { %v1248_v27 = vpack.c.bf16 %v1057_v57, %v1057_v57  ;;  %v1197_v3 = vadd.f32 %v2599_v12, %v1196_v6  ;;  %v1028_v29 = vpop.f32.mrf.mxu0  ;;  %v1113_v1 = vpop.f32.mrf.mxu1  ;;  %v838_v47 = vmul.f32 0.5, %v837_v23 }
 0x1c9   : > { %v819_v24 = vsub.f32 1.5, %v818_v19  ;;  %v1029_v20 = vadd.f32 %v2561_v58, %v1028_v29  ;;  %v1114_v36 = vadd.f32 %v2563_v61, %v1113_v1  ;;  %v942_v16 = vadd.f32 %v2419_v35, %v923_v41 }
 0x1ca   : > { %v1807_v44 = vpop.eup %1806  ;;  %1265 = vst.msk [vmem:[%s2578_s23 + $0x30] sm:$0xf] %vm1252_vm8, %v1248_v27  ;;  %v1301_v37 = vpack.c.bf16 %v1197_v3, %v1197_v3  ;;  %v839_v51 = vsub.f32 1.5, %v838_v47 }
 0x1cb   : > { %v820_v60 = vmul.f32 %v1803_v15, %v819_v24  ;;  %v846_v59 = vmul.f32 %v1807_v44, %v2581_v26  ;;  %v1237_v22 = vpack.c.bf16 %v1029_v20, %v1029_v20  ;;  %v1270_v38 = vpack.c.bf16 %v1114_v36, %v1114_v36 }
 0x1cc   : > { %1317 = vst.msk [vmem:[%s2624_s29] sm:$0xf] %vm1252_vm8, %v1301_v37  ;;  %vm852_vm3 = vweird.f32 %v1807_v44  ;;  %v840_v40 = vmul.f32 %v2585_v9, %v839_v51 }
 0x1cd   : > { %v824_v45 = vsel %vm823_vm14, %v1803_v15, %v820_v60  ;;  %v847_v28 = vmul.f32 %v1807_v44, %v846_v59  ;;  %1254 = vst.msk [vmem:[%s2578_s23 + $0x4] sm:$0xf] %vm1252_vm8, %v1237_v22  ;;  %v1058_v11 = vpop.f32.mrf.mxu3  ;;  %vm853_vm5 = vmor %vm851_vm2, %vm852_vm3 }
 0x1ce   : > { %v903_v39 = vmul.f32 %v824_v45, %v2436_v53  ;;  %1286 = vst.msk [vmem:[%s2594_s18 + $0x4] sm:$0xf] %vm1252_vm8, %v1270_v38  ;;  %v1059_v5 = vadd.f32 %v2561_v58, %v1058_v11  ;;  %v844_v26 = vsel %vm2658_vm4, %v2585_v9, %v840_v40 }
 0x1cf   : > { %v848_v48 = vmul.f32 0.5, %v847_v28  ;;  %v1198_v10 = vpop.f32.mrf.mxu2  ;;  %v905_v6 = vmul.f32 %v844_v26, %v2439_v54 }
 0x1d0   : > { %v1249_v52 = vpack.c.bf16 %v1059_v5, %v1059_v5  ;;  %v1199_v42 = vadd.f32 %v2599_v12, %v1198_v10  ;;  %v1031_v55 = vpop.f32.mrf.mxu0  ;;  %v1116_v0 = vpop.f32.mrf.mxu1  ;;  %v922_v53 = vmul.f32 %v2384_v2, %v903_v39 }
 0x1d1   : > { %v849_v56 = vsub.f32 1.5, %v848_v48  ;;  %v1032_v31 = vadd.f32 %v2561_v58, %v1031_v55  ;;  %v1117_v62 = vadd.f32 %v2563_v61, %v1116_v0  ;;  %v924_v1 = vmul.f32 %v2384_v2, %v905_v6 }
 0x1d2   : > { %1266 = vst.msk [vmem:[%s2578_s23 + $0x34] sm:$0xf] %vm1252_vm8, %v1249_v52  ;;  %v1302_v63 = vpack.c.bf16 %v1199_v42, %v1199_v42  ;;  %v941_v4 = vadd.f32 %v2419_v35, %v922_v53 }
 0x1d3   : > { %v850_v43 = vmul.f32 %v1807_v44, %v849_v56  ;;  %v1238_v30 = vpack.c.bf16 %v1032_v31, %v1032_v31  ;;  %v1271_v15 = vpack.c.bf16 %v1117_v62, %v1117_v62  ;;  %v943_v47 = vadd.f32 %v2419_v35, %v924_v1 }
 0x1d4   : > { %1318 = vst.msk [vmem:[%s2624_s29 + $0x4] sm:$0xf] %vm1252_vm8, %v1302_v63  ;;  %v953_v33 = vpack.c.bf16 %v942_v16, %v941_v4 }
 0x1d5   : > { %1255 = vst.msk [vmem:[%s2578_s23 + $0x8] sm:$0xf] %vm1252_vm8, %v1238_v30  ;;  %v1061_v49 = vpop.f32.mrf.mxu3  ;;  %v854_v25 = vsel %vm853_vm5, %v1807_v44, %v850_v43 }
 0x1d6   : > { %1287 = vst.msk [vmem:[%s2594_s18 + $0x8] sm:$0xf] %vm1252_vm8, %v1271_v15  ;;  %v1062_v32 = vadd.f32 %v2561_v58, %v1061_v49  ;;  %1609 = vmatmul.msk.bf16.gmra.mxu0 %vm551_vm0, %v953_v33  ;;  %1633 = vmatmul.msk.bf16.gmra.mxu1 %vm551_vm0, %v953_v33  ;;  %v906_v7 = vmul.f32 %v854_v25, %v2488_v34 }
 0x1d7   : > { %v1201_v46 = vpop.f32.mrf.mxu2  ;;  %1657 = vmatmul.msk.bf16.gmra.mxu2 %vm551_vm0, %v953_v33 }
 0x1d8   : > { %v1250_v13 = vpack.c.bf16 %v1062_v32, %v1062_v32  ;;  %v1202_v14 = vadd.f32 %v2599_v12, %v1201_v46  ;;  %v1033_v8 = vpop.f32.mrf.mxu0  ;;  %v1118_v21 = vpop.f32.mrf.mxu1  ;;  %v925_v3 = vmul.f32 %v2384_v2, %v906_v7 }
 0x1d9   : > { %v1034_v57 = vadd.f32 %v2561_v58, %v1033_v8  ;;  %v1119_v17 = vadd.f32 %v2563_v61, %v1118_v21 }
 0x1da   : > { %1267 = vst.msk [vmem:[%s2578_s23 + $0x38] sm:$0xf] %vm1252_vm8, %v1250_v13  ;;  %v1303_v19 = vpack.c.bf16 %v1202_v14, %v1202_v14  ;;  %v944_v37 = vadd.f32 %v2419_v35, %v925_v3 }
 0x1db   : > { %v1239_v9 = vpack.c.bf16 %v1034_v57, %v1034_v57  ;;  %v1272_v23 = vpack.c.bf16 %v1119_v17, %v1119_v17 }
 0x1dc   : > { %1319 = vst.msk [vmem:[%s2624_s29 + $0x8] sm:$0xf] %vm1252_vm8, %v1303_v19  ;;  %v954_v2 = vpack.c.bf16 %v944_v37, %v943_v47 }
 0x1dd   : > { %1256 = vst.msk [vmem:[%s2578_s23 + $0xc] sm:$0xf] %vm1252_vm8, %v1239_v9  ;;  %v1063_v27 = vpop.f32.mrf.mxu3 }
 0x1de   : > { %1288 = vst.msk [vmem:[%s2594_s18 + $0xc] sm:$0xf] %vm1252_vm8, %v1272_v23  ;;  %v1064_v34 = vadd.f32 %v2561_v58, %v1063_v27 }
 0x1df   : > { %v1203_v29 = vpop.f32.mrf.mxu2 }
 0x1e0   : > { %v1251_v54 = vpack.c.bf16 %v1064_v34, %v1064_v34  ;;  %v1204_v24 = vadd.f32 %v2599_v12, %v1203_v29  ;;  %v1036_v20 = vpop.f32.mrf.mxu0  ;;  %v1121_v36 = vpop.f32.mrf.mxu1 }
 0x1e1   : > { %v1037_v44 = vadd.f32 %v2561_v58, %v1036_v20  ;;  %v1122_v18 = vadd.f32 %v2563_v61, %v1121_v36 }
 0x1e2   : > { %1268 = vst.msk [vmem:[%s2578_s23 + $0x3c] sm:$0xf] %vm1252_vm8, %v1251_v54  ;;  %v1304_v60 = vpack.c.bf16 %v1204_v24, %v1204_v24 }
 0x1e3   : > { %v1240_v59 = vpack.c.bf16 %v1037_v44, %v1037_v44  ;;  %v1273_v22 = vpack.c.bf16 %v1122_v18, %v1122_v18 }
 0x1e4   : > { %1320 = vst.msk [vmem:[%s2624_s29 + $0xc] sm:$0xf] %vm1252_vm8, %v1304_v60 }
 0x1e5   : > { %1257 = vst.msk [vmem:[%s2578_s23 + $0x10] sm:$0xf] %vm1252_vm8, %v1240_v59  ;;  %v1141_v38 = vpop.f32.mrf.mxu3 }
 0x1e6   : > { %1289 = vst.msk [vmem:[%s2594_s18 + $0x10] sm:$0xf] %vm1252_vm8, %v1273_v22  ;;  %v1142_v45 = vadd.f32 %v2563_v61, %v1141_v38  ;;  %1610 = vmatmul.msk.bf16.gmra.mxu0 %vm551_vm0, %v954_v2  ;;  %1634 = vmatmul.msk.bf16.gmra.mxu1 %vm551_vm0, %v954_v2 }
 0x1e7   : > { %v1206_v28 = vpop.f32.mrf.mxu2  ;;  %1658 = vmatmul.msk.bf16.gmra.mxu2 %vm551_vm0, %v954_v2 }
 0x1e8   : > { %v1281_v35 = vpack.c.bf16 %v1142_v45, %v1142_v45  ;;  %v1207_v11 = vadd.f32 %v2599_v12, %v1206_v28  ;;  %v1038_v39 = vpop.f32.mrf.mxu0  ;;  %v1123_v5 = vpop.f32.mrf.mxu1 }
 0x1e9   : > { %v1039_v41 = vadd.f32 %v2561_v58, %v1038_v39  ;;  %v1124_v48 = vadd.f32 %v2563_v61, %v1123_v5 }
 0x1ea   : > { %1297 = vst.msk [vmem:[%s2594_s18 + $0x30] sm:$0xf] %vm1252_vm8, %v1281_v35  ;;  %v1305_v10 = vpack.c.bf16 %v1207_v11, %v1207_v11 }
 0x1eb   : > { %v1241_v51 = vpack.c.bf16 %v1039_v41, %v1039_v41  ;;  %v1274_v52 = vpack.c.bf16 %v1124_v48, %v1124_v48 }
 0x1ec   : > { %1321 = vst.msk [vmem:[%s2624_s29 + $0x10] sm:$0xf] %vm1252_vm8, %v1305_v10 }
 0x1ed   : > { %1258 = vst.msk [vmem:[%s2578_s23 + $0x14] sm:$0xf] %vm1252_vm8, %v1241_v51  ;;  %v1143_v42 = vpop.f32.mrf.mxu3 }
 0x1ee   : > { %1290 = vst.msk [vmem:[%s2594_s18 + $0x14] sm:$0xf] %vm1252_vm8, %v1274_v52  ;;  %v1144_v55 = vadd.f32 %v2563_v61, %v1143_v42 }
 0x1ef   : > { %v1208_v0 = vpop.f32.mrf.mxu2 }
 0x1f0   : > { %v1282_v53 = vpack.c.bf16 %v1144_v55, %v1144_v55  ;;  %v1209_v56 = vadd.f32 %v2599_v12, %v1208_v0 }
 0x1f2   : > { %1298 = vst.msk [vmem:[%s2594_s18 + $0x34] sm:$0xf] %vm1252_vm8, %v1282_v53  ;;  %v1306_v31 = vpack.c.bf16 %v1209_v56, %v1209_v56 }
 0x1f4   : > { %1322 = vst.msk [vmem:[%s2624_s29 + $0x14] sm:$0xf] %vm1252_vm8, %v1306_v31 }
 0x1f5   : > { %v1146_v62 = vpop.f32.mrf.mxu3 }
 0x1f6   : > { %v1147_v63 = vadd.f32 %v2563_v61, %v1146_v62 }
 0x1f8   : > { %v1283_v4 = vpack.c.bf16 %v1147_v63, %v1147_v63 }
 0x1fa   : > { %1299 = vst.msk [vmem:[%s2594_s18 + $0x38] sm:$0xf] %vm1252_vm8, %v1283_v4 }
 0x1fd   : > { %v1148_v16 = vpop.f32.mrf.mxu3 }
 0x1fe   : > { %v1149_v43 = vadd.f32 %v2563_v61, %v1148_v16 }
 0x200   : > { %v1284_v30 = vpack.c.bf16 %v1149_v43, %v1149_v43 }
 0x202   : > { %1300 = vst.msk [vmem:[%s2594_s18 + $0x3c] sm:$0xf] %vm1252_vm8, %v1284_v30 }
 0x205   : > { %v1226_v15 = vpop.f32.mrf.mxu3 }
 0x206   : > { %v1227_v40 = vadd.f32 %v2599_v12, %v1226_v15 }
 0x208   : > { %v1313_v50 = vpack.c.bf16 %v1227_v40, %v1227_v40 }
 0x20a   : > { %1329 = vst.msk [vmem:[%s2624_s29 + $0x30] sm:$0xf] %vm1252_vm8, %v1313_v50 }
 0x20d   : > { %v1228_v33 = vpop.f32.mrf.mxu3 }
 0x20e   : > { %v1229_v49 = vadd.f32 %v2599_v12, %v1228_v33 }
 0x210   : > { %v1314_v25 = vpack.c.bf16 %v1229_v49, %v1229_v49 }
 0x212   : > { %1330 = vst.msk [vmem:[%s2624_s29 + $0x34] sm:$0xf] %vm1252_vm8, %v1314_v25 }
 0x215   : > { %v1231_v32 = vpop.f32.mrf.mxu3 }
 0x216   : > { %v1232_v46 = vadd.f32 %v2599_v12, %v1231_v32 }
 0x218   : > { %v1315_v26 = vpack.c.bf16 %v1232_v46, %v1232_v46 }
 0x21a   : > { %1331 = vst.msk [vmem:[%s2624_s29 + $0x38] sm:$0xf] %vm1252_vm8, %v1315_v26 }
 0x21d   : > { %v1233_v13 = vpop.f32.mrf.mxu3 }
 0x21e   : > { %v1234_v14 = vadd.f32 %v2599_v12, %v1233_v13 }
 0x220   : > { %v1316_v8 = vpack.c.bf16 %v1234_v14, %v1234_v14 }
 0x222   : > { %1332 = vst.msk [vmem:[%s2624_s29 + $0x3c] sm:$0xf] %vm1252_vm8, %v1316_v8 }
 0x242   : > { %v1041_v21 = vpop.f32.mrf.mxu0  ;;  %v1126_v7 = vpop.f32.mrf.mxu1 }
 0x243   : > { %v1042_v57 = vadd.f32 %v2561_v58, %v1041_v21  ;;  %v1127_v17 = vadd.f32 %v2563_v61, %v1126_v7 }
 0x245   : > { %v1242_v19 = vpack.c.bf16 %v1042_v57, %v1042_v57  ;;  %v1275_v6 = vpack.c.bf16 %v1127_v17, %v1127_v17 }
 0x247   : > { %1259 = vst.msk [vmem:[%s2578_s23 + $0x18] sm:$0xf] %vm1252_vm8, %v1242_v19 }
 0x248   : > { %1291 = vst.msk [vmem:[%s2594_s18 + $0x18] sm:$0xf] %vm1252_vm8, %v1275_v6 }
 0x249   : > { %v1211_v9 = vpop.f32.mrf.mxu2 }
 0x24a   : > { %v1212_v23 = vadd.f32 %v2599_v12, %v1211_v9  ;;  %v1043_v27 = vpop.f32.mrf.mxu0  ;;  %v1128_v3 = vpop.f32.mrf.mxu1 }
 0x24b   : > { %v1044_v34 = vadd.f32 %v2561_v58, %v1043_v27  ;;  %v1129_v29 = vadd.f32 %v2563_v61, %v1128_v3 }
 0x24c   : > { %v1307_v1 = vpack.c.bf16 %v1212_v23, %v1212_v23 }
 0x24d   : > { %v1243_v54 = vpack.c.bf16 %v1044_v34, %v1044_v34  ;;  %v1276_v24 = vpack.c.bf16 %v1129_v29, %v1129_v29 }
 0x24e   : > { %1323 = vst.msk [vmem:[%s2624_s29 + $0x18] sm:$0xf] %vm1252_vm8, %v1307_v1 }
 0x24f   : > { %1260 = vst.msk [vmem:[%s2578_s23 + $0x1c] sm:$0xf] %vm1252_vm8, %v1243_v54 }
 0x250   : > { %1292 = vst.msk [vmem:[%s2594_s18 + $0x1c] sm:$0xf] %vm1252_vm8, %v1276_v24 }
 0x251   : > { %v1213_v20 = vpop.f32.mrf.mxu2 }
 0x252   : > { %v1214_v36 = vadd.f32 %v2599_v12, %v1213_v20 }
 0x253   : > { %v1046_v44 = vpop.f32.mrf.mxu0  ;;  %v1131_v18 = vpop.f32.mrf.mxu1 }
 0x254   : > { %v1047_v37 = vadd.f32 %v2561_v58, %v1046_v44  ;;  %v1132_v60 = vadd.f32 %v2563_v61, %v1131_v18  ;;  %v1308_v59 = vpack.c.bf16 %v1214_v36, %v1214_v36 }
 0x256   : > { %v1244_v22 = vpack.c.bf16 %v1047_v37, %v1047_v37  ;;  %v1277_v47 = vpack.c.bf16 %v1132_v60, %v1132_v60  ;;  %1324 = vst.msk [vmem:[%s2624_s29 + $0x1c] sm:$0xf] %vm1252_vm8, %v1308_v59 }
 0x258   : > { %1261 = vst.msk [vmem:[%s2578_s23 + $0x20] sm:$0xf] %vm1252_vm8, %v1244_v22 }
 0x259   : > { %1293 = vst.msk [vmem:[%s2594_s18 + $0x20] sm:$0xf] %vm1252_vm8, %v1277_v47 }
 0x25a   : > { %v1216_v2 = vpop.f32.mrf.mxu2 }
 0x25b   : > { %v1217_v38 = vadd.f32 %v2599_v12, %v1216_v2  ;;  %v1048_v45 = vpop.f32.mrf.mxu0  ;;  %v1133_v28 = vpop.f32.mrf.mxu1 }
 0x25c   : > { %v1049_v35 = vadd.f32 %v2561_v58, %v1048_v45  ;;  %v1134_v11 = vadd.f32 %v2563_v61, %v1133_v28 }
 0x25d   : > { %v1309_v39 = vpack.c.bf16 %v1217_v38, %v1217_v38 }
 0x25e   : > { %v1245_v5 = vpack.c.bf16 %v1049_v35, %v1049_v35  ;;  %v1278_v41 = vpack.c.bf16 %v1134_v11, %v1134_v11 }
 0x25f   : > { %1325 = vst.msk [vmem:[%s2624_s29 + $0x20] sm:$0xf] %vm1252_vm8, %v1309_v39 }
 0x260   : > { %1262 = vst.msk [vmem:[%s2578_s23 + $0x24] sm:$0xf] %vm1252_vm8, %v1245_v5 }
 0x261   : > { %1294 = vst.msk [vmem:[%s2594_s18 + $0x24] sm:$0xf] %vm1252_vm8, %v1278_v41 }
 0x262   : > { %v1218_v48 = vpop.f32.mrf.mxu2 }
 0x263   : > { %v1219_v10 = vadd.f32 %v2599_v12, %v1218_v48  ;;  %v1051_v51 = vpop.f32.mrf.mxu0  ;;  %v1136_v52 = vpop.f32.mrf.mxu1 }
 0x264   : > { %v1052_v42 = vadd.f32 %v2561_v58, %v1051_v51  ;;  %v1137_v55 = vadd.f32 %v2563_v61, %v1136_v52 }
 0x265   : > { %v1310_v0 = vpack.c.bf16 %v1219_v10, %v1219_v10 }
 0x266   : > { %v1246_v53 = vpack.c.bf16 %v1052_v42, %v1052_v42  ;;  %v1279_v56 = vpack.c.bf16 %v1137_v55, %v1137_v55 }
 0x267   : > { %1326 = vst.msk [vmem:[%s2624_s29 + $0x24] sm:$0xf] %vm1252_vm8, %v1310_v0 }
 0x268   : > { %1263 = vst.msk [vmem:[%s2578_s23 + $0x28] sm:$0xf] %vm1252_vm8, %v1246_v53 }
 0x269   : > { %1295 = vst.msk [vmem:[%s2594_s18 + $0x28] sm:$0xf] %vm1252_vm8, %v1279_v56 }
 0x26a   : > { %v1221_v31 = vpop.f32.mrf.mxu2 }
 0x26b   : > { %v1222_v62 = vadd.f32 %v2599_v12, %v1221_v31  ;;  %v1053_v63 = vpop.f32.mrf.mxu0  ;;  %v1138_v4 = vpop.f32.mrf.mxu1 }
 0x26c   : > { %v1054_v16 = vadd.f32 %v2561_v58, %v1053_v63  ;;  %v1139_v43 = vadd.f32 %v2563_v61, %v1138_v4 }
 0x26d   : > { %v1311_v30 = vpack.c.bf16 %v1222_v62, %v1222_v62 }
 0x26e   : > { %v1247_v15 = vpack.c.bf16 %v1054_v16, %v1054_v16  ;;  %v1280_v40 = vpack.c.bf16 %v1139_v43, %v1139_v43 }
 0x26f   : > { %1327 = vst.msk [vmem:[%s2624_s29 + $0x28] sm:$0xf] %vm1252_vm8, %v1311_v30 }
 0x270   : > { %1264 = vst.msk [vmem:[%s2578_s23 + $0x2c] sm:$0xf] %vm1252_vm8, %v1247_v15 }
 0x271   : > { %1296 = vst.msk [vmem:[%s2594_s18 + $0x2c] sm:$0xf] %vm1252_vm8, %v1280_v40 }
 0x272   : > { %v1223_v50 = vpop.f32.mrf.mxu2 }
 0x273   : > { %v1224_v33 = vadd.f32 %v2599_v12, %v1223_v50 }
 0x275   : > { %v1312_v49 = vpack.c.bf16 %v1224_v33, %v1224_v33 }
 0x277   : > { %1328 = vst.msk [vmem:[%s2624_s29 + $0x2c] sm:$0xf] %vm1252_vm8, %v1312_v49 }
 0x278 PF: > { %s25_s21 = sadd.s32 1, %s1978_s21   ;;  %s2845_s17 = smov %s1970_s19 }
 0x279   : > { %p22_p10 = scmp.ge.s32.totalorder %s25_s21, 6   ;;  %s2846_s18 = smov %s1974_s20 }
 0x27a   : > { %s2847_s19 = smov %s2850_s12  ;;  %s2848_s20 = smov %s2854_s13 }
 0x27b   :  { %24 = sbr.rel (!%p22_p10) target bundleno = 8 (0x8), region = 127 }
 0x280   :  { %1413 = vsyncpa [#allocation3], 1 }
 0x281   :  { %1415 = vsyncpa [#allocation3 + $0x1], 1 }
 0x282   :  { %1416 = vsyncpa [#allocation5], 1 }
 0x283   :  { %1417 = vsyncpa [#allocation8], 1 }

// kernel: decoder_layer_pallas.3
= control target key start
LH: loop header
LB: loop body
LE: loop exit
PB: predicated region body
PF: predicated region fallthrough
CT: control target
= control target key end

     0   :  { %s8308_s0 = inlined_call_operand.vmem [shape: f32[2,256,64], index: 0, kind: input, shape index: {}]   ;;  %s8309_s1 = inlined_call_operand.vmem [shape: bf16[2,4,256,16], index: 1, kind: input, shape index: {}]   ;;  %s8310_s2 = inlined_call_operand.vmem [shape: bf16[2,4,256,16], index: 2, kind: input, shape index: {}]   ;;  %s8311_s3 = inlined_call_operand.vmem [shape: bf16[2,4,256,16], index: 3, kind: input, shape index: {}]   ;;  %s8312_s4 = inlined_call_operand.vmem [shape: bf16[64,64], index: 4, kind: input, shape index: {}]   ;;  %s8313_s5 = inlined_call_operand.vmem [shape: f32[1,64], index: 5, kind: input, shape index: {}]   ;;  %s8314_s6 = inlined_call_operand.vmem [shape: f32[1,64], index: 6, kind: input, shape index: {}]   ;;  %s8315_s7 = inlined_call_operand.vmem [shape: f32[1,64], index: 7, kind: input, shape index: {}]   ;;  %s8316_s8 = inlined_call_operand.vmem [shape: bf16[64,128], index: 8, kind: input, shape index: {}]   ;;  %s8317_s9 = inlined_call_operand.vmem [shape: f32[1,128], index: 9, kind: input, shape index: {}]   ;;  %s8318_s10 = inlined_call_operand.vmem [shape: bf16[128,64], index: 10, kind: input, shape index: {}]   ;;  %s8319_s11 = inlined_call_operand.vmem [shape: f32[1,64], index: 11, kind: input, shape index: {}]   ;;  %s8320_s12 = inlined_call_operand.vmem [shape: f32[2,256,64], index: 12, kind: output, shape index: {0}]   ;;  %s8321_s13 = inlined_call_operand.hbm [shape: f32[2,4,256,256], index: 13, kind: output, shape index: {1}]  }
   0x1   :  { %8339 = sst [smem:[#allocation28_spill]] %s8308_s0 }
   0x2   :  { %8340 = sst [smem:[#allocation29_spill]] %s8309_s1 }
   0x3   :  { %8341 = sst [smem:[#allocation30_spill]] %s8310_s2 }
   0x4   :  { %8342 = sst [smem:[#allocation31_spill]] %s8311_s3 }
   0x5   :  { %8343 = sst [smem:[#allocation32_spill]] %s8312_s4 }
   0x6   :  { %8344 = sst [smem:[#allocation33_spill]] %s8313_s5 }
   0x7   :  { %8345 = sst [smem:[#allocation34_spill]] %s8314_s6 }
   0x8   :  { %8346 = sst [smem:[#allocation35_spill]] %s8315_s7 }
   0x9   :  { %8347 = sst [smem:[#allocation36_spill]] %s8316_s8 }
   0xa   :  { %8348 = sst [smem:[#allocation37_spill]] %s8317_s9 }
   0xb   :  { %8349 = sst [smem:[#allocation38_spill]] %s8318_s10 }
   0xc   :  { %8350 = sst [smem:[#allocation39_spill]] %s8319_s11 }
   0xd   :  { %8351 = sst [smem:[#allocation40_spill]] %s8320_s12 }
   0xe   :  { %8352 = sst [smem:[#allocation41_spill]] %s8321_s13 }
   0xf   :  { %19 = vsyncpa [#allocation7], 0 }
  0x10   :  { %21 = vsyncpa [#allocation7 + $0x1], 0  ;;  %s6203_s25 = smov 0   ;;  %s6205_s26 = smov 0  }
  0x11   :  { %s6207_s27 = smov 0   ;;  %s6209_s28 = smov 0  }
  0x12   :  { %s6211_s29 = smov 0   ;;  %s6213_s30 = smov 0  }
  0x13   :  { %s6215_s14 = smov 0   ;;  %s6217_s15 = smov 0  }
  0x14   :  { %s6219_s16 = smov 0   ;;  %s6221_s17 = smov 0  }
  0x15   :  { %s6223_s18 = smov 0   ;;  %s6225_s19 = smov 0  }
  0x16   :  { %s6227_s20 = smov 0   ;;  %s6229_s21 = smov 0  }
  0x17 LB: > { %8353 = sst [smem:[#allocation11_spill]] %s6077_s28  ;;  %s4824_s22 = sadd.s32 4294967295, %s6117_s21   ;;  %s6117_s21 = sphi %s6229_s21, %s27_s21   ;;  %s6113_s20 = sphi %s6227_s20, %s8415_s20   ;;  %s6109_s19 = sphi %s6225_s19, %s8414_s19   ;;  %s6105_s18 = sphi %s6223_s18, %s8413_s18   ;;  %s6101_s17 = sphi %s6221_s17, %s8412_s17   ;;  %s6097_s16 = sphi %s6219_s16, %s8421_s16   ;;  %s6093_s15 = sphi %s6217_s15, %s8410_s15   ;;  %s6089_s14 = sphi %s6215_s14, %s8409_s14   ;;  %s6085_s30 = sphi %s6213_s30, %s8408_s30   ;;  %s6081_s29 = sphi %s6211_s29, %s8420_s29   ;;  %s6077_s28 = sphi %s6209_s28, %s8419_s28   ;;  %s6073_s27 = sphi %s6207_s27, %s8418_s27   ;;  %s6069_s26 = sphi %s6205_s26, %s8417_s26   ;;  %s6065_s25 = sphi %s6203_s25, %s8416_s25  }
  0x18   : > { %8354 = sst [smem:[#allocation12_spill]] %s6089_s14  ;;  %s4825_s23 = sadd.s32 4294967294, %s6117_s21  }
  0x19   : > { %8355 = sst [smem:[#allocation13_spill]] %s6093_s15  ;;  %s39_s24 = sadd.s32 1, %s6105_s18 }
  0x1a   : > { %8356 = sst [smem:[#allocation14_spill]] %s6097_s16  ;;  %s42_s13 = sadd.s32 1, %s6109_s19 }
  0x1b   : > { %8357 = sst [smem:[#allocation15_spill]] %s6101_s17  ;;  %p40_p0 = scmp.ge.s32.totalorder %s39_s24, 2 }
  0x1c   : > { %8358 = sst [smem:[#allocation16_spill]] %s6105_s18  ;;  %s46_s11 = sadd.s32 1, %s6113_s20 }
  0x1d   : > { %8359 = sst [smem:[#allocation17_spill]] %s6109_s19  ;;  %p90_p1 = scmp.ne.s32.totalorder %s6089_s14, %s6085_s30 }
  0x1e   : > { %8360 = sst [smem:[#allocation18_spill]] %s6113_s20  ;;  %s8423_s24 = smov (%p40_p0, %s39_s24), 0 }
  0x1f   : > { %8361 = sst [smem:[#allocation19_spill]] %s8423_s24  ;;  %s8425_s13 = smov (!%p40_p0, %s42_s13), %s6109_s19 }
  0x20   : > { %p91_p2 = scmp.eq.s32.totalorder %s6117_s21, 0  ;;  %s107_s10 = ssub.s32 %s6105_s18, %s8423_s24 }
  0x21   : > { %p44_p3 = scmp.ge.s32.totalorder %s8425_s13, 2  ;;  %s111_s7 = sadd.s32 1, %s6081_s29 }
  0x22   : > { %p6288_p4 = por %p91_p2, %p90_p1  ;;  %p118_p5 = scmp.ne.s32.totalorder %s6081_s29, %s6077_s28 }
  0x23   : > { %s8427_s13 = smov (%p44_p3, %s8425_s13), 0  ;;  %s8429_s11 = smov (!%p44_p3, %s46_s11), %s6113_s20 }
  0x24   : > { %8363 = sst [smem:[#allocation20_spill]] %s8427_s13  ;;  %s79_s9 = ssub.s32 %s6109_s19, %s8427_s13 }
  0x25   : > { %p6299_p6 = por %p118_p5, %p91_p2  ;;  %p48_p7 = scmp.ge.s32.totalorder %s8429_s11, 2 }
  0x26   : > { %s365_s24 = sadd.s32 1, %s6073_s27  ;;  %p375_p8 = scmp.ne.s32.totalorder %s6073_s27, %s6069_s26 }
  0x27   : > { %p376_p9 = scmp.eq.s32.totalorder %s4824_s22, 7  ;;  %s8431_s11 = smov (%p48_p7, %s8429_s11), 0 }
  0x28   : > { %8365 = sst [smem:[#allocation21_spill]] %s8431_s11  ;;  %p381_p11 = scmp.ne.s32.totalorder %s6069_s26, %s6065_s25 }
  0x29   : > { %p6308_p10 = por %p376_p9, %p375_p8  ;;  %s78_s13 = ssub.s32 %s6113_s20, %s8431_s11 }
  0x2a   : > { %p382_p12 = scmp.eq.s32.totalorder %s4825_s23, 7  ;;  %s80_s4 = sor.u32 %s79_s9, %s78_s13 }
  0x2b   : > { %s108_s12 = sor.u32 %s107_s10, %s78_s13  ;;  %p81_p13 = scmp.eq.s32.totalorder %s80_s4, 0 }
  0x2c   : > { %p109_p0 = scmp.eq.s32.totalorder %s108_s12, 0  ;;  %s362_s0 = sor.u32 %s107_s10, %s80_s4 }
  0x2d   : > { %p6316_p1 = por %p382_p12, %p381_p11  ;;  %s8368_s22 = sadd.s32 1, %s6089_s14 }
  0x2e   : > { %s6323_s17 = scalar_select %p81_p13, %s6089_s14, %s8368_s22  }
  0x2f   : > { %s6326_s16 = scalar_select %p109_p0, %s6081_s29, %s111_s7  }
  0x30   : > { %8369 = sst [smem:[#allocation22_spill]] %s6323_s17  ;;  %p363_p2 = scmp.eq.s32.totalorder %s362_s0, 0 }
  0x31   : > { %p4827_p3 = scmp.ge.s32.totalorder %s6117_s21, 8 }
  0x32   : > { %s6329_s28 = scalar_select %p363_p2, %s6073_s27, %s365_s24  }
  0x33   : > { %422 = sbr.rel (%p4827_p3) target bundleno = 182 (0xb6), region = 48 }
  0x38   : > { %438 = sbr.rel (!%p6288_p4) target bundleno = 98 (0x62), region = 56  ;;  %s440_s4 = sand.u32 (%p6288_p4), 1, %s6089_s14  }
  0x39   : > { %s4829_s9 = sshll.u32 (%p6288_p4), %s6109_s19, 4  ;;  %s4828_s10 = sshll.u32 (%p6288_p4), %s440_s4, 8 }
  0x3a   : > { %s4830_s12 = sshll.u32 (%p6288_p4), %s6113_s20, 7  ;;  %s8370_s1 = sld [smem:[#allocation29_spill]] (%p6288_p4) }
  0x3b   : > { %s445_s13 = sadd.s32 (%p6288_p4), %s4830_s12, %s4829_s9  ;;  %s6345_s6 = scalar_lea.vmem (%p6288_p4), [#allocation3], %s4828_s10 }
  0x3c   : > { %s4831_s23 = sshll.u32 (%p6288_p4), %s445_s13, 2 }
  0x40   : > { %s6340_s0 = scalar_lea.vmem %s8370_s1, %s4831_s23 }
  0x41   : > { %v464_v0 = vld [vmem:[%s6340_s0] sm:$0xff]   ;;  %v468_v1 = vld [vmem:[%s6340_s0 + $0x8] sm:$0xff]   ;;  %v472_v2 = vld [vmem:[%s6340_s0 + $0x10] sm:$0xff]  }
  0x42   : > { %465 = vst [vmem:[%s6345_s6] sm:$0xff] %v464_v0   ;;  %v476_v3 = vld [vmem:[%s6340_s0 + $0x18] sm:$0xff]   ;;  %v480_v4 = vld [vmem:[%s6340_s0 + $0x20] sm:$0xff]   ;;  %v484_v5 = vld [vmem:[%s6340_s0 + $0x28] sm:$0xff]  }
  0x43   : > { %469 = vst [vmem:[%s6345_s6 + $0x8] sm:$0xff] %v468_v1   ;;  %v488_v6 = vld [vmem:[%s6340_s0 + $0x30] sm:$0xff]   ;;  %v492_v7 = vld [vmem:[%s6340_s0 + $0x38] sm:$0xff]   ;;  %v496_v8 = vld [vmem:[%s6340_s0 + $0x80] sm:$0xff]  }
  0x44   : > { %473 = vst [vmem:[%s6345_s6 + $0x10] sm:$0xff] %v472_v2   ;;  %v500_v9 = vld [vmem:[%s6340_s0 + $0x88] sm:$0xff]   ;;  %v504_v10 = vld [vmem:[%s6340_s0 + $0x90] sm:$0xff]   ;;  %v508_v11 = vld [vmem:[%s6340_s0 + $0x98] sm:$0xff]  }
  0x45   : > { %477 = vst [vmem:[%s6345_s6 + $0x18] sm:$0xff] %v476_v3   ;;  %v512_v12 = vld [vmem:[%s6340_s0 + $0xa0] sm:$0xff]   ;;  %v516_v13 = vld [vmem:[%s6340_s0 + $0xa8] sm:$0xff]   ;;  %v520_v14 = vld [vmem:[%s6340_s0 + $0xb0] sm:$0xff]  }
  0x46   : > { %481 = vst [vmem:[%s6345_s6 + $0x20] sm:$0xff] %v480_v4   ;;  %v524_v15 = vld [vmem:[%s6340_s0 + $0xb8] sm:$0xff]   ;;  %v528_v16 = vld [vmem:[%s6340_s0 + $0x100] sm:$0xff]   ;;  %v532_v17 = vld [vmem:[%s6340_s0 + $0x108] sm:$0xff]  }
  0x47   : > { %485 = vst [vmem:[%s6345_s6 + $0x28] sm:$0xff] %v484_v5   ;;  %v536_v18 = vld [vmem:[%s6340_s0 + $0x110] sm:$0xff]   ;;  %v540_v19 = vld [vmem:[%s6340_s0 + $0x118] sm:$0xff]   ;;  %v544_v20 = vld [vmem:[%s6340_s0 + $0x120] sm:$0xff]  }
  0x48   : > { %489 = vst [vmem:[%s6345_s6 + $0x30] sm:$0xff] %v488_v6   ;;  %v548_v21 = vld [vmem:[%s6340_s0 + $0x128] sm:$0xff]   ;;  %v552_v22 = vld [vmem:[%s6340_s0 + $0x130] sm:$0xff]   ;;  %v556_v23 = vld [vmem:[%s6340_s0 + $0x138] sm:$0xff]  }
  0x49   : > { %493 = vst [vmem:[%s6345_s6 + $0x38] sm:$0xff] %v492_v7   ;;  %v560_v24 = vld [vmem:[%s6340_s0 + $0x180] sm:$0xff]   ;;  %v564_v25 = vld [vmem:[%s6340_s0 + $0x188] sm:$0xff]   ;;  %v568_v26 = vld [vmem:[%s6340_s0 + $0x190] sm:$0xff]  }
  0x4a   : > { %497 = vst [vmem:[%s6345_s6 + $0x40] sm:$0xff] %v496_v8   ;;  %v572_v27 = vld [vmem:[%s6340_s0 + $0x198] sm:$0xff]   ;;  %v576_v28 = vld [vmem:[%s6340_s0 + $0x1a0] sm:$0xff]   ;;  %v580_v29 = vld [vmem:[%s6340_s0 + $0x1a8] sm:$0xff]  }
  0x4b   : > { %501 = vst [vmem:[%s6345_s6 + $0x48] sm:$0xff] %v500_v9   ;;  %v584_v30 = vld [vmem:[%s6340_s0 + $0x1b0] sm:$0xff]   ;;  %v588_v31 = vld [vmem:[%s6340_s0 + $0x1b8] sm:$0xff]  }
  0x4c   : > { %505 = vst [vmem:[%s6345_s6 + $0x50] sm:$0xff] %v504_v10  }
  0x4d   : > { %509 = vst [vmem:[%s6345_s6 + $0x58] sm:$0xff] %v508_v11  }
  0x4e   : > { %513 = vst [vmem:[%s6345_s6 + $0x60] sm:$0xff] %v512_v12  }
  0x4f   : > { %517 = vst [vmem:[%s6345_s6 + $0x68] sm:$0xff] %v516_v13  }
  0x50   : > { %521 = vst [vmem:[%s6345_s6 + $0x70] sm:$0xff] %v520_v14  }
  0x51   : > { %525 = vst [vmem:[%s6345_s6 + $0x78] sm:$0xff] %v524_v15  }
  0x52   : > { %529 = vst [vmem:[%s6345_s6 + $0x80] sm:$0xff] %v528_v16  }
  0x53   : > { %533 = vst [vmem:[%s6345_s6 + $0x88] sm:$0xff] %v532_v17  }
  0x54   : > { %537 = vst [vmem:[%s6345_s6 + $0x90] sm:$0xff] %v536_v18  }
  0x55   : > { %541 = vst [vmem:[%s6345_s6 + $0x98] sm:$0xff] %v540_v19  }
  0x56   : > { %545 = vst [vmem:[%s6345_s6 + $0xa0] sm:$0xff] %v544_v20  }
  0x57   : > { %549 = vst [vmem:[%s6345_s6 + $0xa8] sm:$0xff] %v548_v21  }
  0x58   : > { %553 = vst [vmem:[%s6345_s6 + $0xb0] sm:$0xff] %v552_v22  }
  0x59   : > { %557 = vst [vmem:[%s6345_s6 + $0xb8] sm:$0xff] %v556_v23  }
  0x5a   : > { %561 = vst [vmem:[%s6345_s6 + $0xc0] sm:$0xff] %v560_v24  }
  0x5b   : > { %565 = vst [vmem:[%s6345_s6 + $0xc8] sm:$0xff] %v564_v25  }
  0x5c   : > { %569 = vst [vmem:[%s6345_s6 + $0xd0] sm:$0xff] %v568_v26  }
  0x5d   : > { %573 = vst [vmem:[%s6345_s6 + $0xd8] sm:$0xff] %v572_v27  }
  0x5e   : > { %577 = vst [vmem:[%s6345_s6 + $0xe0] sm:$0xff] %v576_v28  }
  0x5f   : > { %581 = vst [vmem:[%s6345_s6 + $0xe8] sm:$0xff] %v580_v29  }
  0x60   : > { %585 = vst [vmem:[%s6345_s6 + $0xf0] sm:$0xff] %v584_v30  }
  0x61   : > { %589 = vst [vmem:[%s6345_s6 + $0xf8] sm:$0xff] %v588_v31  }
  0x62 PF: > { %743 = sbr.rel (!%p6299_p6) target bundleno = 140 (0x8c), region = 97  ;;  %s745_s24 = sand.u32 (%p6299_p6), 1, %s6081_s29  }
  0x63   : > { %s4833_s4 = sshll.u32 (%p6299_p6), %s6105_s18, 4  ;;  %s4832_s9 = sshll.u32 (%p6299_p6), %s745_s24, 8 }
  0x64   : > { %s4834_s10 = sshll.u32 (%p6299_p6), %s6113_s20, 7  ;;  %s8371_s2 = sld [smem:[#allocation30_spill]] (%p6299_p6) }
  0x65   : > { %s750_s12 = sadd.s32 (%p6299_p6), %s4834_s10, %s4833_s4  ;;  %s6421_s0 = scalar_lea.vmem (%p6299_p6), [#allocation4], %s4832_s9 }
  0x66   : > { %s4835_s13 = sshll.u32 (%p6299_p6), %s750_s12, 2 }
  0x6a   : > { %s6416_s22 = scalar_lea.vmem %s8371_s2, %s4835_s13 }
  0x6b   : > { %v769_v32 = vld [vmem:[%s6416_s22] sm:$0xff]   ;;  %v773_v33 = vld [vmem:[%s6416_s22 + $0x8] sm:$0xff]   ;;  %v777_v34 = vld [vmem:[%s6416_s22 + $0x10] sm:$0xff]  }
  0x6c   : > { %770 = vst [vmem:[%s6421_s0] sm:$0xff] %v769_v32   ;;  %v781_v35 = vld [vmem:[%s6416_s22 + $0x18] sm:$0xff]   ;;  %v785_v36 = vld [vmem:[%s6416_s22 + $0x20] sm:$0xff]   ;;  %v789_v37 = vld [vmem:[%s6416_s22 + $0x28] sm:$0xff]  }
  0x6d   : > { %774 = vst [vmem:[%s6421_s0 + $0x8] sm:$0xff] %v773_v33   ;;  %v793_v38 = vld [vmem:[%s6416_s22 + $0x30] sm:$0xff]   ;;  %v797_v39 = vld [vmem:[%s6416_s22 + $0x38] sm:$0xff]   ;;  %v801_v40 = vld [vmem:[%s6416_s22 + $0x80] sm:$0xff]  }
  0x6e   : > { %778 = vst [vmem:[%s6421_s0 + $0x10] sm:$0xff] %v777_v34   ;;  %v805_v41 = vld [vmem:[%s6416_s22 + $0x88] sm:$0xff]   ;;  %v809_v42 = vld [vmem:[%s6416_s22 + $0x90] sm:$0xff]   ;;  %v813_v43 = vld [vmem:[%s6416_s22 + $0x98] sm:$0xff]  }
  0x6f   : > { %782 = vst [vmem:[%s6421_s0 + $0x18] sm:$0xff] %v781_v35   ;;  %v817_v44 = vld [vmem:[%s6416_s22 + $0xa0] sm:$0xff]   ;;  %v821_v45 = vld [vmem:[%s6416_s22 + $0xa8] sm:$0xff]   ;;  %v825_v46 = vld [vmem:[%s6416_s22 + $0xb0] sm:$0xff]  }
  0x70   : > { %786 = vst [vmem:[%s6421_s0 + $0x20] sm:$0xff] %v785_v36   ;;  %v829_v47 = vld [vmem:[%s6416_s22 + $0xb8] sm:$0xff]   ;;  %v833_v48 = vld [vmem:[%s6416_s22 + $0x100] sm:$0xff]   ;;  %v837_v49 = vld [vmem:[%s6416_s22 + $0x108] sm:$0xff]  }
  0x71   : > { %790 = vst [vmem:[%s6421_s0 + $0x28] sm:$0xff] %v789_v37   ;;  %v841_v50 = vld [vmem:[%s6416_s22 + $0x110] sm:$0xff]   ;;  %v845_v51 = vld [vmem:[%s6416_s22 + $0x118] sm:$0xff]   ;;  %v849_v52 = vld [vmem:[%s6416_s22 + $0x120] sm:$0xff]  }
  0x72   : > { %794 = vst [vmem:[%s6421_s0 + $0x30] sm:$0xff] %v793_v38   ;;  %v853_v53 = vld [vmem:[%s6416_s22 + $0x128] sm:$0xff]   ;;  %v857_v54 = vld [vmem:[%s6416_s22 + $0x130] sm:$0xff]   ;;  %v861_v55 = vld [vmem:[%s6416_s22 + $0x138] sm:$0xff]  }
  0x73   : > { %798 = vst [vmem:[%s6421_s0 + $0x38] sm:$0xff] %v797_v39   ;;  %v865_v56 = vld [vmem:[%s6416_s22 + $0x180] sm:$0xff]   ;;  %v869_v57 = vld [vmem:[%s6416_s22 + $0x188] sm:$0xff]   ;;  %v873_v58 = vld [vmem:[%s6416_s22 + $0x190] sm:$0xff]  }
  0x74   : > { %802 = vst [vmem:[%s6421_s0 + $0x40] sm:$0xff] %v801_v40   ;;  %v877_v59 = vld [vmem:[%s6416_s22 + $0x198] sm:$0xff]   ;;  %v881_v60 = vld [vmem:[%s6416_s22 + $0x1a0] sm:$0xff]   ;;  %v885_v61 = vld [vmem:[%s6416_s22 + $0x1a8] sm:$0xff]  }
  0x75   : > { %806 = vst [vmem:[%s6421_s0 + $0x48] sm:$0xff] %v805_v41   ;;  %v889_v62 = vld [vmem:[%s6416_s22 + $0x1b0] sm:$0xff]   ;;  %v893_v63 = vld [vmem:[%s6416_s22 + $0x1b8] sm:$0xff]  }
  0x76   : > { %810 = vst [vmem:[%s6421_s0 + $0x50] sm:$0xff] %v809_v42  }
  0x77   : > { %814 = vst [vmem:[%s6421_s0 + $0x58] sm:$0xff] %v813_v43  }
  0x78   : > { %818 = vst [vmem:[%s6421_s0 + $0x60] sm:$0xff] %v817_v44  }
  0x79   : > { %822 = vst [vmem:[%s6421_s0 + $0x68] sm:$0xff] %v821_v45  }
  0x7a   : > { %826 = vst [vmem:[%s6421_s0 + $0x70] sm:$0xff] %v825_v46  }
  0x7b   : > { %830 = vst [vmem:[%s6421_s0 + $0x78] sm:$0xff] %v829_v47  }
  0x7c   : > { %834 = vst [vmem:[%s6421_s0 + $0x80] sm:$0xff] %v833_v48  }
  0x7d   : > { %838 = vst [vmem:[%s6421_s0 + $0x88] sm:$0xff] %v837_v49  }
  0x7e   : > { %842 = vst [vmem:[%s6421_s0 + $0x90] sm:$0xff] %v841_v50  }
  0x7f   : > { %846 = vst [vmem:[%s6421_s0 + $0x98] sm:$0xff] %v845_v51  }
  0x80   : > { %850 = vst [vmem:[%s6421_s0 + $0xa0] sm:$0xff] %v849_v52  }
  0x81   : > { %854 = vst [vmem:[%s6421_s0 + $0xa8] sm:$0xff] %v853_v53  }
  0x82   : > { %858 = vst [vmem:[%s6421_s0 + $0xb0] sm:$0xff] %v857_v54  }
  0x83   : > { %862 = vst [vmem:[%s6421_s0 + $0xb8] sm:$0xff] %v861_v55  }
  0x84   : > { %866 = vst [vmem:[%s6421_s0 + $0xc0] sm:$0xff] %v865_v56  }
  0x85   : > { %870 = vst [vmem:[%s6421_s0 + $0xc8] sm:$0xff] %v869_v57  }
  0x86   : > { %874 = vst [vmem:[%s6421_s0 + $0xd0] sm:$0xff] %v873_v58  }
  0x87   : > { %878 = vst [vmem:[%s6421_s0 + $0xd8] sm:$0xff] %v877_v59  }
  0x88   : > { %882 = vst [vmem:[%s6421_s0 + $0xe0] sm:$0xff] %v881_v60  }
  0x89   : > { %886 = vst [vmem:[%s6421_s0 + $0xe8] sm:$0xff] %v885_v61  }
  0x8a   : > { %890 = vst [vmem:[%s6421_s0 + $0xf0] sm:$0xff] %v889_v62  }
  0x8b   : > { %894 = vst [vmem:[%s6421_s0 + $0xf8] sm:$0xff] %v893_v63  }
  0x8c PF: > { %1048 = sbr.rel (!%p6299_p6) target bundleno = 182 (0xb6), region = 138  ;;  %s1050_s6 = sand.u32 (%p6299_p6), 1, %s6081_s29  }
  0x8d   : > { %s4837_s24 = sshll.u32 (%p6299_p6), %s6105_s18, 4  ;;  %s4836_s4 = sshll.u32 (%p6299_p6), %s1050_s6, 8 }
  0x8e   : > { %s4838_s9 = sshll.u32 (%p6299_p6), %s6113_s20, 7  ;;  %s8372_s3 = sld [smem:[#allocation31_spill]] (%p6299_p6) }
  0x8f   : > { %s1055_s10 = sadd.s32 (%p6299_p6), %s4838_s9, %s4837_s24  ;;  %s6497_s8 = scalar_lea.vmem (%p6299_p6), [#allocation5], %s4836_s4 }
  0x90   : > { %s4839_s12 = sshll.u32 (%p6299_p6), %s1055_s10, 2 }
  0x94   : > { %s6492_s7 = scalar_lea.vmem %s8372_s3, %s4839_s12 }
  0x95   : > { %v1074_v0 = vld [vmem:[%s6492_s7] sm:$0xff]   ;;  %v1078_v1 = vld [vmem:[%s6492_s7 + $0x8] sm:$0xff]   ;;  %v1082_v2 = vld [vmem:[%s6492_s7 + $0x10] sm:$0xff]  }
  0x96   : > { %1075 = vst [vmem:[%s6497_s8] sm:$0xff] %v1074_v0   ;;  %v1086_v3 = vld [vmem:[%s6492_s7 + $0x18] sm:$0xff]   ;;  %v1090_v4 = vld [vmem:[%s6492_s7 + $0x20] sm:$0xff]   ;;  %v1094_v5 = vld [vmem:[%s6492_s7 + $0x28] sm:$0xff]  }
  0x97   : > { %1079 = vst [vmem:[%s6497_s8 + $0x8] sm:$0xff] %v1078_v1   ;;  %v1098_v6 = vld [vmem:[%s6492_s7 + $0x30] sm:$0xff]   ;;  %v1102_v7 = vld [vmem:[%s6492_s7 + $0x38] sm:$0xff]   ;;  %v1106_v8 = vld [vmem:[%s6492_s7 + $0x80] sm:$0xff]  }
  0x98   : > { %1083 = vst [vmem:[%s6497_s8 + $0x10] sm:$0xff] %v1082_v2   ;;  %v1110_v9 = vld [vmem:[%s6492_s7 + $0x88] sm:$0xff]   ;;  %v1114_v10 = vld [vmem:[%s6492_s7 + $0x90] sm:$0xff]   ;;  %v1118_v11 = vld [vmem:[%s6492_s7 + $0x98] sm:$0xff]  }
  0x99   : > { %1087 = vst [vmem:[%s6497_s8 + $0x18] sm:$0xff] %v1086_v3   ;;  %v1122_v12 = vld [vmem:[%s6492_s7 + $0xa0] sm:$0xff]   ;;  %v1126_v13 = vld [vmem:[%s6492_s7 + $0xa8] sm:$0xff]   ;;  %v1130_v14 = vld [vmem:[%s6492_s7 + $0xb0] sm:$0xff]  }
  0x9a   : > { %1091 = vst [vmem:[%s6497_s8 + $0x20] sm:$0xff] %v1090_v4   ;;  %v1134_v15 = vld [vmem:[%s6492_s7 + $0xb8] sm:$0xff]   ;;  %v1138_v16 = vld [vmem:[%s6492_s7 + $0x100] sm:$0xff]   ;;  %v1142_v17 = vld [vmem:[%s6492_s7 + $0x108] sm:$0xff]  }
  0x9b   : > { %1095 = vst [vmem:[%s6497_s8 + $0x28] sm:$0xff] %v1094_v5   ;;  %v1146_v18 = vld [vmem:[%s6492_s7 + $0x110] sm:$0xff]   ;;  %v1150_v19 = vld [vmem:[%s6492_s7 + $0x118] sm:$0xff]   ;;  %v1154_v20 = vld [vmem:[%s6492_s7 + $0x120] sm:$0xff]  }
  0x9c   : > { %1099 = vst [vmem:[%s6497_s8 + $0x30] sm:$0xff] %v1098_v6   ;;  %v1158_v21 = vld [vmem:[%s6492_s7 + $0x128] sm:$0xff]   ;;  %v1162_v22 = vld [vmem:[%s6492_s7 + $0x130] sm:$0xff]   ;;  %v1166_v23 = vld [vmem:[%s6492_s7 + $0x138] sm:$0xff]  }
  0x9d   : > { %1103 = vst [vmem:[%s6497_s8 + $0x38] sm:$0xff] %v1102_v7   ;;  %v1170_v24 = vld [vmem:[%s6492_s7 + $0x180] sm:$0xff]   ;;  %v1174_v25 = vld [vmem:[%s6492_s7 + $0x188] sm:$0xff]   ;;  %v1178_v26 = vld [vmem:[%s6492_s7 + $0x190] sm:$0xff]  }
  0x9e   : > { %1107 = vst [vmem:[%s6497_s8 + $0x40] sm:$0xff] %v1106_v8   ;;  %v1182_v27 = vld [vmem:[%s6492_s7 + $0x198] sm:$0xff]   ;;  %v1186_v28 = vld [vmem:[%s6492_s7 + $0x1a0] sm:$0xff]   ;;  %v1190_v29 = vld [vmem:[%s6492_s7 + $0x1a8] sm:$0xff]  }
  0x9f   : > { %1111 = vst [vmem:[%s6497_s8 + $0x48] sm:$0xff] %v1110_v9   ;;  %v1194_v30 = vld [vmem:[%s6492_s7 + $0x1b0] sm:$0xff]   ;;  %v1198_v31 = vld [vmem:[%s6492_s7 + $0x1b8] sm:$0xff]  }
  0xa0   : > { %1115 = vst [vmem:[%s6497_s8 + $0x50] sm:$0xff] %v1114_v10  }
  0xa1   : > { %1119 = vst [vmem:[%s6497_s8 + $0x58] sm:$0xff] %v1118_v11  }
  0xa2   : > { %1123 = vst [vmem:[%s6497_s8 + $0x60] sm:$0xff] %v1122_v12  }
  0xa3   : > { %1127 = vst [vmem:[%s6497_s8 + $0x68] sm:$0xff] %v1126_v13  }
  0xa4   : > { %1131 = vst [vmem:[%s6497_s8 + $0x70] sm:$0xff] %v1130_v14  }
  0xa5   : > { %1135 = vst [vmem:[%s6497_s8 + $0x78] sm:$0xff] %v1134_v15  }
  0xa6   : > { %1139 = vst [vmem:[%s6497_s8 + $0x80] sm:$0xff] %v1138_v16  }
  0xa7   : > { %1143 = vst [vmem:[%s6497_s8 + $0x88] sm:$0xff] %v1142_v17  }
  0xa8   : > { %1147 = vst [vmem:[%s6497_s8 + $0x90] sm:$0xff] %v1146_v18  }
  0xa9   : > { %1151 = vst [vmem:[%s6497_s8 + $0x98] sm:$0xff] %v1150_v19  }
  0xaa   : > { %1155 = vst [vmem:[%s6497_s8 + $0xa0] sm:$0xff] %v1154_v20  }
  0xab   : > { %1159 = vst [vmem:[%s6497_s8 + $0xa8] sm:$0xff] %v1158_v21  }
  0xac   : > { %1163 = vst [vmem:[%s6497_s8 + $0xb0] sm:$0xff] %v1162_v22  }
  0xad   : > { %1167 = vst [vmem:[%s6497_s8 + $0xb8] sm:$0xff] %v1166_v23  }
  0xae   : > { %1171 = vst [vmem:[%s6497_s8 + $0xc0] sm:$0xff] %v1170_v24  }
  0xaf   : > { %1175 = vst [vmem:[%s6497_s8 + $0xc8] sm:$0xff] %v1174_v25  }
  0xb0   : > { %1179 = vst [vmem:[%s6497_s8 + $0xd0] sm:$0xff] %v1178_v26  }
  0xb1   : > { %1183 = vst [vmem:[%s6497_s8 + $0xd8] sm:$0xff] %v1182_v27  }
  0xb2   : > { %1187 = vst [vmem:[%s6497_s8 + $0xe0] sm:$0xff] %v1186_v28  }
  0xb3   : > { %1191 = vst [vmem:[%s6497_s8 + $0xe8] sm:$0xff] %v1190_v29  }
  0xb4   : > { %1195 = vst [vmem:[%s6497_s8 + $0xf0] sm:$0xff] %v1194_v30  }
  0xb5   : > { %1199 = vst [vmem:[%s6497_s8 + $0xf8] sm:$0xff] %v1198_v31  }
  0xb6 PF: > { %p4840_p4 = scmp.ge.s32.totalorder %s6117_s21, 1  ;;  %p1352_p5 = scmp.lt.s32.totalorder %s6117_s21, 9 }
  0xb8   : > { %p1353_p6 = pnand %p4840_p4, %p1352_p5 }
  0xb9   : > { %s8373_s22 = sld [smem:[#allocation11_spill]] (!%p1353_p6)  ;;  %s1359_s4 = sand.u32 (!%p1353_p6), 1, %s6085_s30  }
  0xba   : > { %1356 = sbr.rel (%p1353_p6) target bundleno = 2151 (0x867), region = 179  ;;  %s8374_s0 = sld [smem:[#allocation14_spill]] (!%p1353_p6) }
  0xbb   : > { %s8375_s6 = sld [smem:[#allocation15_spill]] (!%p1353_p6)  ;;  %s4841_s10 = sshll.u32 (!%p1353_p6), %s1359_s4, 8 }
  0xbc   : > { %s8376_s24 = sld [smem:[#allocation13_spill]] (!%p1353_p6)  ;;  %s8334_s13 = sand.u32 (!%p1353_p6), 1, %s6069_s26  }
  0xbd   : > { %s4844_s23 = sshll.u32 (!%p1353_p6), %s8334_s13, 9  ;;  %s8378_s13 = sld [smem:[#allocation40_spill]] (!%p1353_p6) }
  0xbe   : > { %s6586_s17 = scalar_lea.vmem (!%p1353_p6), [#allocation3], %s4841_s10 }
  0xbf   : > { %s1366_s9 = sand.u32 1, %s8373_s22   ;;  %s8377_s22 = sld [smem:[#allocation28_spill]] }
  0xc0   : > { %s4842_s12 = sshll.u32 %s1366_s9, 8  ;;  %s4845_s7 = sshll.u32 %s8374_s0, 4 }
  0xc1   : > { %p1443_p7 = scmp.lt.s32.totalorder %s8375_s6, 1  ;;  %p1445_p8 = scmp.lt.s32.totalorder %s4845_s7, 31 }
  0xc2   : > { %s6570_s8 = sshll.u32 %s8374_s0, 7  ;;  %s6574_s2 = sshll.u32 %s8376_s24, 7 }
  0xc3   : > { %s8433_s6 = smov (!%p1443_p7, %s8375_s6), 1  ;;  %s8435_s7 = smov (!%p1445_p8, %s4845_s7), 31 }
  0xc4   : > { %s4846_s1 = sshll.u32 %s8433_s6, 5  ;;  %s6588_s0 = scalar_lea.vmem [#allocation4], %s4842_s12 }
  0xc5   : > { %s1448_s3 = sadd.s32 %s4846_s1, %s8435_s7  ;;  %s6590_s14 = scalar_lea.vmem [#allocation5], %s4842_s12 }
  0xc6   : > { %s4847_s11 = sshll.u32 %s1448_s3, 3  ;;  %s6592_s6 = scalar_lea.vmem [#allocation6], %s4844_s23 }
  0xc7   : > { %s6579_s4 = scalar_lea.vmem %s8377_s22, %s4847_s11  ;;  %s6584_s18 = scalar_lea.vmem %s8378_s13, %s4847_s11 }
  0xc8   : > { %p4853_p9 = scmp.ne.s32.totalorder %s8376_s24, 0 }
  0xca   : > { %1472 = sbr.rel (%p4853_p9) target bundleno = 224 (0xe0), region = 195 }
  0xcf   : > { %vm1473_vm0 = vcmask 523264   ;;  %v6119_v32 = vmov 0.0  }
  0xd0   : > { %1474 = vst.msk [vmem:[#allocation2] sm:$0xff] %vm1473_vm0, %v6119_v32 }
  0xd1   : > { %1475 = vst.msk [vmem:[#allocation2 + $0x8] sm:$0xff] %vm1473_vm0, %v6119_v32 }
  0xd2   : > { %1476 = vst.msk [vmem:[#allocation2 + $0x10] sm:$0xff] %vm1473_vm0, %v6119_v32 }
  0xd3   : > { %1477 = vst.msk [vmem:[#allocation2 + $0x18] sm:$0xff] %vm1473_vm0, %v6119_v32 }
  0xd4   : > { %1478 = vst.msk [vmem:[#allocation2 + $0x20] sm:$0xff] %vm1473_vm0, %v6119_v32 }
  0xd5   : > { %1479 = vst.msk [vmem:[#allocation2 + $0x28] sm:$0xff] %vm1473_vm0, %v6119_v32 }
  0xd6   : > { %1480 = vst.msk [vmem:[#allocation2 + $0x30] sm:$0xff] %vm1473_vm0, %v6119_v32 }
  0xd7   : > { %1481 = vst.msk [vmem:[#allocation2 + $0x38] sm:$0xff] %vm1473_vm0, %v6119_v32 }
  0xd8   : > { %1482 = vst.msk [vmem:[#allocation2 + $0x40] sm:$0xff] %vm1473_vm0, %v6119_v32 }
  0xd9   : > { %1483 = vst.msk [vmem:[#allocation2 + $0x48] sm:$0xff] %vm1473_vm0, %v6119_v32 }
  0xda   : > { %1484 = vst.msk [vmem:[#allocation2 + $0x50] sm:$0xff] %vm1473_vm0, %v6119_v32 }
  0xdb   : > { %1485 = vst.msk [vmem:[#allocation2 + $0x58] sm:$0xff] %vm1473_vm0, %v6119_v32 }
  0xdc   : > { %1486 = vst.msk [vmem:[#allocation2 + $0x60] sm:$0xff] %vm1473_vm0, %v6119_v32 }
  0xdd   : > { %1487 = vst.msk [vmem:[#allocation2 + $0x68] sm:$0xff] %vm1473_vm0, %v6119_v32 }
  0xde   : > { %1488 = vst.msk [vmem:[#allocation2 + $0x70] sm:$0xff] %vm1473_vm0, %v6119_v32 }
  0xdf   : > { %1489 = vst.msk [vmem:[#allocation2 + $0x78] sm:$0xff] %vm1473_vm0, %v6119_v32 }
  0xe0 PF: > { %s1490_s1 = sadd.s32 127, %s6570_s8 }
  0xe1   : > { %p4854_p11 = scmp.gt.s32.totalorder %s6574_s2, %s1490_s1 }
  0xe3   : > { %1494 = sbr.rel (%p4854_p11) target bundleno = 1080 (0x438), region = 199 }
  0xe8   : > { %v5567_v33 = vld [vmem:[%s6588_s0 + $0x38] sm:$0xff]  ;;  %vm1779_vm1 = vcmask 130048   ;;  %v5566_v37 = vld [vmem:[%s6588_s0 + $0x30] sm:$0xff]  ;;  %v5565_v41 = vld [vmem:[%s6588_s0 + $0x28] sm:$0xff]  ;;  %v1495_v25 = vlaneseq  ;;  %s1549_s3 = ssub.s32 %s6570_s8, %s6574_s2  ;;  %s6120_s11 = smov 16  }
  0xe9   : > { %v5591_v34 = vld [vmem:[%s6588_s0 + $0x78] sm:$0xff]  ;;  %v1826_v35 = vsel %vm1779_vm1, %v5567_v33, 0  ;;  %v5590_v38 = vld [vmem:[%s6588_s0 + $0x70] sm:$0xff]  ;;  %v1823_v39 = vsel %vm1779_vm1, %v5566_v37, 0  ;;  %v5589_v42 = vld [vmem:[%s6588_s0 + $0x68] sm:$0xff]  ;;  %v1820_v43 = vsel %vm1779_vm1, %v5565_v41, 0  ;;  %v6697_v29 = vstv %s1549_s3 }
  0xea   : > { %v2273_v36 = vsel %vm1779_vm1, %v5591_v34, 0  ;;  %1828 = vmatpush.bf16.xpose.msra.mxu0 %v1826_v35  ;;  %v2270_v40 = vsel %vm1779_vm1, %v5590_v38, 0  ;;  %v2267_v44 = vsel %vm1779_vm1, %v5589_v42, 0  ;;  %v5564_v45 = vld [vmem:[%s6588_s0 + $0x20] sm:$0xff]  ;;  %v5563_v49 = vld [vmem:[%s6588_s0 + $0x18] sm:$0xff]  ;;  %v5562_v53 = vld [vmem:[%s6588_s0 + $0x10] sm:$0xff] }
  0xeb   : > { %2275 = vmatpush.bf16.xpose.msra.mxu2 %v2273_v36  ;;  %v5588_v46 = vld [vmem:[%s6588_s0 + $0x60] sm:$0xff]  ;;  %v1817_v47 = vsel %vm1779_vm1, %v5564_v45, 0  ;;  %v5587_v50 = vld [vmem:[%s6588_s0 + $0x58] sm:$0xff]  ;;  %v1814_v51 = vsel %vm1779_vm1, %v5563_v49, 0  ;;  %v5586_v54 = vld [vmem:[%s6588_s0 + $0x50] sm:$0xff]  ;;  %v1811_v55 = vsel %vm1779_vm1, %v5562_v53, 0 }
  0xec   : > { %v2264_v48 = vsel %vm1779_vm1, %v5588_v46, 0  ;;  %v2261_v52 = vsel %vm1779_vm1, %v5587_v50, 0  ;;  %v2258_v56 = vsel %vm1779_vm1, %v5586_v54, 0  ;;  %v5561_v57 = vld [vmem:[%s6588_s0 + $0x8] sm:$0xff]  ;;  %v5560_v61 = vld [vmem:[%s6588_s0] sm:$0xff]  ;;  %v5554_v5 = vld [vmem:[%s6586_s17 + $0x10] sm:$0xff] }
  0xed   : > { %v5585_v58 = vld [vmem:[%s6588_s0 + $0x48] sm:$0xff]  ;;  %v1808_v59 = vsel %vm1779_vm1, %v5561_v57, 0  ;;  %v5584_v62 = vld [vmem:[%s6588_s0 + $0x40] sm:$0xff]  ;;  %v1805_v63 = vsel %vm1779_vm1, %v5560_v61, 0  ;;  %v5578_v6 = vld [vmem:[%s6586_s17 + $0x50] sm:$0xff]  ;;  %v6695_v28 = vshrl.u32 %v1495_v25, 7 }
  0xee   : > { %v2255_v60 = vsel %vm1779_vm1, %v5585_v58, 0  ;;  %v2252_v0 = vsel %vm1779_vm1, %v5584_v62, 0  ;;  %v5552_v1 = vld [vmem:[%s6586_s17] sm:$0xff]  ;;  %v5553_v3 = vld [vmem:[%s6586_s17 + $0x8] sm:$0xff]  ;;  %v5555_v7 = vld [vmem:[%s6586_s17 + $0x18] sm:$0xff]  ;;  %v1513_v35 = vand.u32 127, %v1495_v25 }
  0xef   : > { %v5576_v2 = vld [vmem:[%s6586_s17 + $0x40] sm:$0xff]  ;;  %v5577_v4 = vld [vmem:[%s6586_s17 + $0x48] sm:$0xff]  ;;  %v5579_v8 = vld [vmem:[%s6586_s17 + $0x58] sm:$0xff]  ;;  %v1551_v33 = vadd.s32 %v6697_v29, %v6695_v28  ;;  %v6719_v42 = vadd.s32 8, %v6695_v28 }
  0xf0   : > { %v5556_v9 = vld [vmem:[%s6586_s17 + $0x20] sm:$0xff]  ;;  %v5575_v11 = vld [vmem:[%s6590_s14 + $0x38] sm:$0xff]  ;;  %v5574_v14 = vld [vmem:[%s6590_s14 + $0x30] sm:$0xff] }
  0xf1   : > { %v5580_v10 = vld [vmem:[%s6586_s17 + $0x60] sm:$0xff]  ;;  %v5639_v12 = vld [vmem:[%s6588_s0 + $0xf8] sm:$0xff]  ;;  %1981 = vmatpush.bf16.msra.mxu1 %v5575_v11  ;;  %v5557_v15 = vld [vmem:[%s6586_s17 + $0x28] sm:$0xff] }
  0xf2   : > { %1829 = vmatpush.bf16.xpose.msra.mxu0 %v1823_v39  ;;  %v6670_v13 = vsel %vm1779_vm1, %v5639_v12, 0  ;;  %v5581_v16 = vld [vmem:[%s6586_s17 + $0x68] sm:$0xff]  ;;  %v5599_v17 = vld [vmem:[%s6590_s14 + $0x78] sm:$0xff]  ;;  %v5638_v19 = vld [vmem:[%s6588_s0 + $0xf0] sm:$0xff]  ;;  %v6711_v39 = vcvt.s32.f32 %v1551_v33 }
  0xf3   : > { %2276 = vmatpush.bf16.xpose.msra.mxu2 %v2270_v40  ;;  %v5573_v18 = vld [vmem:[%s6590_s14 + $0x28] sm:$0xff]  ;;  %2430 = vmatpush.bf16.msra.mxu3 %v5599_v17  ;;  %v5598_v20 = vld [vmem:[%s6590_s14 + $0x70] sm:$0xff]  ;;  %v6683_v21 = vsel %vm1779_vm1, %v5638_v19, 0  ;;  %v5572_v22 = vld [vmem:[%s6590_s14 + $0x20] sm:$0xff]  ;;  %v6713_v40 = vcvt.s32.f32 %v1513_v35 }
  0xf4   : > { %v5637_v23 = vld [vmem:[%s6588_s0 + $0xe8] sm:$0xff]  ;;  %v5571_v26 = vld [vmem:[%s6590_s14 + $0x18] sm:$0xff]  ;;  %v5596_v30 = vld [vmem:[%s6590_s14 + $0x60] sm:$0xff] }
  0xf5   : > { %1982 = vmatpush.bf16.msra.mxu1 %v5574_v14  ;;  %v5597_v24 = vld [vmem:[%s6590_s14 + $0x68] sm:$0xff]  ;;  %v6693_v27 = vsel %vm1779_vm1, %v5637_v23, 0  ;;  %v5558_v31 = vld [vmem:[%s6586_s17 + $0x30] sm:$0xff]  ;;  %v5595_v36 = vld [vmem:[%s6590_s14 + $0x58] sm:$0xff]  ;;  %v1632_v46 = vmul.f32 0.031748697, %v6713_v40 }
  0xf6   : > { %v5582_v32 = vld [vmem:[%s6586_s17 + $0x70] sm:$0xff]  ;;  %v5569_v37 = vld [vmem:[%s6590_s14 + $0x8] sm:$0xff]  ;;  %v5636_v38 = vld [vmem:[%s6588_s0 + $0xe0] sm:$0xff] }
  0xf7   : > { %2431 = vmatpush.bf16.msra.mxu3 %v5598_v20  ;;  %v5570_v34 = vld [vmem:[%s6590_s14 + $0x10] sm:$0xff]  ;;  %v6716_v41 = vsel %vm1779_vm1, %v5636_v38, 0  ;;  %v5568_v45 = vld [vmem:[%s6590_s14] sm:$0xff]  ;;  %v5635_v49 = vld [vmem:[%s6588_s0 + $0xd8] sm:$0xff] }
  0xf8   : > { %v5615_v53 = vld [vmem:[%s6588_s0 + $0xb8] sm:$0xff]  ;;  %v6734_v54 = vsel %vm1779_vm1, %v5635_v49, 0  ;;  %v5592_v57 = vld [vmem:[%s6590_s14 + $0x40] sm:$0xff]  ;;  %v5633_v19 = vld [vmem:[%s6588_s0 + $0xc8] sm:$0xff] }
  0xf9   : > { %1983 = vmatpush.bf16.msra.mxu1 %v5573_v18  ;;  %v5559_v58 = vld [vmem:[%s6586_s17 + $0x38] sm:$0xff]  ;;  %v2722_v61 = vsel %vm1779_vm1, %v5615_v53, 0  ;;  %v6820_v53 = vadd.s32 40, %v6695_v28 }
  0xfa   : > { %1830 = vmatpush.bf16.xpose.msra.mxu0 %v1820_v43  ;;  %v5594_v43 = vld [vmem:[%s6590_s14 + $0x50] sm:$0xff] }
  0xfb   : > { %2277 = vmatpush.bf16.xpose.msra.mxu2 %v2267_v44  ;;  %2432 = vmatpush.bf16.msra.mxu3 %v5597_v24  ;;  %v1584_v44 = vmul.f32 -0.031748697, %v6711_v39 }
  0xfd   : > { %1984 = vmatpush.bf16.msra.mxu1 %v5572_v22  ;;  %v1600_v50 = vmul.f32 1.442695, %v1584_v44  ;;  %v6782_v22 = vadd.s32 32, %v6695_v28 }
  0xff   : > { %2433 = vmatpush.bf16.msra.mxu3 %v5596_v30  ;;  %5828 = vpow2.f32 %v1600_v50  ;;  %v6790_v30 = vsel %vm1779_vm1, %v5633_v19, 0  ;;  %v1555_v38 = vadd.s32 %v6697_v29, %v6782_v22  ;;  %v6849_v19 = vadd.s32 48, %v6695_v28 }
 0x101   : > { %1985 = vmatpush.bf16.msra.mxu1 %v5571_v26  ;;  %v5614_v26 = vld [vmem:[%s6588_s0 + $0xb0] sm:$0xff] }
 0x102   : > { %1831 = vmatpush.bf16.xpose.msra.mxu0 %v1817_v47  ;;  %v1552_v47 = vadd.s32 %v6697_v29, %v6719_v42 }
 0x103   : > { %2278 = vmatpush.bf16.xpose.msra.mxu2 %v2264_v48  ;;  %2434 = vmatpush.bf16.msra.mxu3 %v5595_v36  ;;  %v5593_v48 = vld [vmem:[%s6590_s14 + $0x48] sm:$0xff] }
 0x105   : > { %1986 = vmatpush.bf16.msra.mxu1 %v5570_v34 }
 0x107   : > { %2435 = vmatpush.bf16.msra.mxu3 %v5594_v43 }
 0x109   : > { %1987 = vmatpush.bf16.msra.mxu1 %v5569_v37 }
 0x10a   : > { %1832 = vmatpush.bf16.xpose.msra.mxu0 %v1814_v51  ;;  %v1633_v51 = vmul.f32 1.442695, %v1632_v46  ;;  %v5632_v46 = vld [vmem:[%s6588_s0 + $0xc0] sm:$0xff] }
 0x10b   : > { %2279 = vmatpush.bf16.xpose.msra.mxu2 %v2261_v52  ;;  %2436 = vmatpush.bf16.msra.mxu3 %v5593_v48  ;;  %v6730_v52 = vcvt.s32.f32 %v1552_v47  ;;  %v6814_v48 = vcvt.s32.f32 %v1555_v38 }
 0x10c   : > { %5830 = vpow2.f32 %v1633_v51  ;;  %v6817_v51 = vsel %vm1779_vm1, %v5632_v46, 0 }
 0x10d   : > { %1988 = vmatpush.bf16.msra.mxu1 %v5568_v45  ;;  %v1585_v62 = vmul.f32 -0.031748697, %v6730_v52  ;;  %v2031_v14 = vmul.f32 -0.015748357, %v6730_v52 }
 0x10f   : > { %2437 = vmatpush.bf16.msra.mxu3 %v5592_v57  ;;  %v2048_v18 = vmul.f32 1.442695, %v2031_v14 }
 0x111   : > { %2724 = vmatpush.bf16.xpose.msrb.mxu1 %v2722_v61 }
 0x112   : > { %1833 = vmatpush.bf16.xpose.msra.mxu0 %v1811_v55  ;;  %v6737_v55 = vadd.s32 16, %v6695_v28 }
 0x113   : > { %2280 = vmatpush.bf16.xpose.msra.mxu2 %v2258_v56  ;;  %v2030_v56 = vmul.f32 -0.015748357, %v6711_v39 }
 0x11a   : > { %1834 = vmatpush.bf16.xpose.msra.mxu0 %v1808_v59  ;;  %v5583_v59 = vld [vmem:[%s6586_s17 + $0x78] sm:$0xff] }
 0x11b   : > { %2281 = vmatpush.bf16.xpose.msra.mxu2 %v2255_v60  ;;  %v2078_v60 = vmul.f32 0.015748357, %v6713_v40 }
 0x122   : > { %1835 = vmatpush.bf16.xpose.msra.mxu0 %v1805_v63  ;;  %v1553_v63 = vadd.s32 %v6697_v29, %v6737_v55 }
 0x123   : > { %2282 = vmatpush.bf16.xpose.msra.mxu2 %v2252_v0  ;;  %v2046_v0 = vmul.f32 1.442695, %v2030_v56 }
 0x125   : > { %5832 = vpow2.f32 %v2046_v0  ;;  %v1588_v0 = vmul.f32 -0.031748697, %v6814_v48 }
 0x129   : > { %4919 = vmatmul.msk.bf16.vlgmr.msra.gmra.mxu0 %vm1779_vm1, %v5552_v1  ;;  %v2079_v1 = vmul.f32 1.442695, %v2078_v60 }
 0x12a   : > { %5055 = vmatmul.msk.bf16.vlgmr.msra.gmra.mxu2 %vm1779_vm1, %v5576_v2  ;;  %3173 = vmatpush.bf16.xpose.msrb.mxu0 %v6670_v13  ;;  %v5634_v2 = vld [vmem:[%s6588_s0 + $0xd0] sm:$0xff] }
 0x12b   : > { %5834 = vpow2.f32 %v2079_v1 }
 0x132   : > { %3174 = vmatpush.bf16.xpose.msrb.mxu0 %v6683_v21 }
 0x139   : > { %4920 = vmatmul.msk.bf16.gmra.mxu0 %vm1779_vm1, %v5553_v3  ;;  %v6753_v3 = vstv %s6570_s8 }
 0x13a   : > { %5056 = vmatmul.msk.bf16.gmra.mxu2 %vm1779_vm1, %v5577_v4  ;;  %3175 = vmatpush.bf16.xpose.msrb.mxu0 %v6693_v27  ;;  %v1531_v4 = vstv %s6574_s2  ;;  %v6769_v11 = vadd.s32 %v6753_v3, %v6695_v28  ;;  %v6798_v33 = vadd.s32 %v6753_v3, %v6719_v42  ;;  %v6828_v60 = vadd.s32 %v6753_v3, %v6737_v55 }
 0x13b   : > { %v6771_v12 = vadd.s32 %v1531_v4, %v1513_v35  ;;  %v2719_v35 = vsel %vm1779_vm1, %v5614_v26, 0 }
 0x13c   : > { %2725 = vmatpush.bf16.xpose.msrb.mxu1 %v2719_v35 }
 0x13d   : > { %vm1533_vm2 = vcmp.ge.s32.totalorder %v6769_v11, %v6771_v12  ;;  %vm1534_vm3 = vcmp.ge.s32.totalorder %v6798_v33, %v6771_v12  ;;  %vm1535_vm4 = vcmp.ge.s32.totalorder %v6828_v60, %v6771_v12 }
 0x142   : > { %3176 = vmatpush.bf16.xpose.msrb.mxu0 %v6716_v41 }
 0x149   : > { %4921 = vmatmul.msk.bf16.gmra.mxu0 %vm1779_vm1, %v5554_v5  ;;  %v1602_v5 = vmul.f32 1.442695, %v1585_v62 }
 0x14a   : > { %5057 = vmatmul.msk.bf16.gmra.mxu2 %vm1779_vm1, %v5578_v6  ;;  %3177 = vmatpush.bf16.xpose.msrb.mxu0 %v6734_v54  ;;  %v6756_v6 = vcvt.s32.f32 %v1553_v63 }
 0x14b   : > { %5836 = vpow2.f32 %v1602_v5 }
 0x14c   : > { %5838 = vpow2.f32 %v2048_v18  ;;  %v2032_v34 = vmul.f32 -0.015748357, %v6756_v6  ;;  %v5613_v18 = vld [vmem:[%s6588_s0 + $0xa8] sm:$0xff] }
 0x14d   : > { %v2716_v35 = vsel %vm1779_vm1, %v5613_v18, 0 }
 0x14e   : > { %v2050_v42 = vmul.f32 1.442695, %v2032_v34  ;;  %v2034_v34 = vmul.f32 -0.015748357, %v6814_v48  ;;  %2726 = vmatpush.bf16.xpose.msrb.mxu1 %v2716_v35  ;;  %v6910_v35 = vadd.s32 %v6753_v3, %v6820_v53 }
 0x150   : > { %vm1538_vm7 = vcmp.ge.s32.totalorder %v6910_v35, %v6771_v12 }
 0x159   : > { %4922 = vmatmul.msk.bf16.gmra.mxu0 %vm1779_vm1, %v5555_v7  ;;  %v6759_v7 = vsel %vm1779_vm1, %v5634_v2, 0  ;;  %v1556_v2 = vadd.s32 %v6697_v29, %v6820_v53 }
 0x15a   : > { %5058 = vmatmul.msk.bf16.gmra.mxu2 %vm1779_vm1, %v5579_v8  ;;  %v6762_v8 = vadd.s32 24, %v6695_v28  ;;  %3178 = vmatpush.bf16.xpose.msrb.mxu0 %v6759_v7 }
 0x15c   : > { %v6856_v26 = vadd.s32 %v6753_v3, %v6762_v8 }
 0x15e   : > { %vm1536_vm5 = vcmp.ge.s32.totalorder %v6856_v26, %v6771_v12 }
 0x162   : > { %3179 = vmatpush.bf16.xpose.msrb.mxu0 %v6790_v30 }
 0x169   : > { %4923 = vmatmul.msk.bf16.gmra.mxu0 %vm1779_vm1, %v5556_v9  ;;  %v5829_v9 = vpop.eup %5828 }
 0x16a   : > { %5059 = vmatmul.msk.bf16.gmra.mxu2 %vm1779_vm1, %v5580_v10  ;;  %v6765_v10 = vpop.eup %5830  ;;  %3180 = vmatpush.bf16.xpose.msrb.mxu0 %v6817_v51 }
 0x16b   : > { %v1635_v17 = vmul.f32 %v6765_v10, %v5829_v9  ;;  %v5833_v20 = vpop.eup %5832  ;;  %v5624_v9 = vld [vmem:[%s6586_s17 + $0xc0] sm:$0xff] }
 0x16c   : > { %v6784_v23 = vpop.eup %5834 }
 0x16d   : > { %v2081_v37 = vmul.f32 %v6784_v23, %v5833_v20 }
 0x16f   : > { %v2097_v47 = vsel %vm1533_vm2, %v2081_v37, 0.0 }
 0x179   : > { %4924 = vmatmul.msk.bf16.gmra.mxu0 %vm1779_vm1, %v5557_v15  ;;  %v1586_v15 = vmul.f32 -0.031748697, %v6756_v6 }
 0x17a   : > { %5060 = vmatmul.msk.bf16.gmra.mxu2 %vm1779_vm1, %v5581_v16  ;;  %v1554_v16 = vadd.s32 %v6697_v29, %v6762_v8  ;;  %v1557_v8 = vadd.s32 %v6697_v29, %v6849_v19 }
 0x17b   : > { %v1604_v24 = vmul.f32 1.442695, %v1586_v15  ;;  %v1608_v15 = vmul.f32 1.442695, %v1588_v0 }
 0x17c   : > { %v6786_v25 = vcvt.s32.f32 %v1554_v16 }
 0x17d   : > { %5840 = vpow2.f32 %v1604_v24 }
 0x17e   : > { %v1587_v44 = vmul.f32 -0.031748697, %v6786_v25  ;;  %5842 = vpow2.f32 %v2050_v42  ;;  %v2033_v61 = vmul.f32 -0.015748357, %v6786_v25  ;;  %v2054_v42 = vmul.f32 1.442695, %v2034_v34 }
 0x180   : > { %v1606_v50 = vmul.f32 1.442695, %v1587_v44  ;;  %v2052_v5 = vmul.f32 1.442695, %v2033_v61 }
 0x182   : > { %5844 = vpow2.f32 %v1606_v50  ;;  %v6872_v50 = vcvt.s32.f32 %v1557_v8 }
 0x183   : > { %5846 = vpow2.f32 %v2052_v5 }
 0x184   : > { %5848 = vpow2.f32 %v1608_v15 }
 0x185   : > { %5850 = vpow2.f32 %v2054_v42 }
 0x189   : > { %4925 = vmatmul.msk.bf16.gmra.mxu0 %vm1779_vm1, %v5558_v31  ;;  %v1651_v31 = vsel %vm1533_vm2, %v1635_v17, 0.0  ;;  %v6844_v17 = vcvt.s32.f32 %v1556_v2 }
 0x18a   : > { %5061 = vmatmul.msk.bf16.gmra.mxu2 %vm1779_vm1, %v5582_v32  ;;  %v5837_v32 = vpop.eup %5836 }
 0x18b   : > { %v1636_v45 = vmul.f32 %v5837_v32, %v6765_v10  ;;  %v5839_v49 = vpop.eup %5838  ;;  %v1589_v44 = vmul.f32 -0.031748697, %v6844_v17 }
 0x18c   : > { %v2082_v63 = vmul.f32 %v5839_v49, %v6784_v23 }
 0x18d   : > { %v1652_v57 = vsel %vm1534_vm3, %v1636_v45, 0.0  ;;  %v1610_v49 = vmul.f32 1.442695, %v1589_v44 }
 0x18e   : > { %v2098_v14 = vsel %vm1534_vm3, %v2082_v63, 0.0  ;;  %v2035_v63 = vmul.f32 -0.015748357, %v6844_v17 }
 0x18f   : > { %5852 = vpow2.f32 %v1610_v49 }
 0x199   : > { %4926 = vmatmul.msk.bf16.gmra.mxu0 %vm1779_vm1, %v5559_v58  ;;  %v5841_v58 = vpop.eup %5840 }
 0x19a   : > { %5062 = vmatmul.msk.bf16.gmra.mxu2 %vm1779_vm1, %v5583_v59  ;;  %v1637_v4 = vmul.f32 %v5841_v58, %v6765_v10  ;;  %v5843_v16 = vpop.eup %5842 }
 0x19b   : > { %v2083_v37 = vmul.f32 %v5843_v16, %v6784_v23  ;;  %v6899_v16 = vadd.s32 64, %v6695_v28 }
 0x19c   : > { %v1653_v24 = vsel %vm1535_vm4, %v1637_v4, 0.0  ;;  %v1590_v4 = vmul.f32 -0.031748697, %v6872_v50 }
 0x19d   : > { %v2099_v46 = vsel %vm1535_vm4, %v2083_v37, 0.0 }
 0x1a6   : > { %v1837_v36 = vpop.f32.mrf.mxu0 }
 0x1a7   : > { %v1877_v43 = vmul.f32 %v1837_v36, %v1651_v31  ;;  %v5845_v31 = vpop.eup %5844 }
 0x1a8   : > { %v1638_v45 = vmul.f32 %v5845_v31, %v6765_v10  ;;  %v5612_v31 = vld [vmem:[%s6588_s0 + $0xa0] sm:$0xff] }
 0x1a9   : > { %1893 = vst [vmem:[%s6592_s6] sm:$0xff] %v1877_v43  ;;  %5391 = vmatmul.msk.bf16.vlgmr.msrb.gmra.mxu0 %vm1779_vm1, %v5624_v9  ;;  %v2056_v9 = vmul.f32 1.442695, %v2035_v63  ;;  %v6929_v63 = vadd.s32 72, %v6695_v28 }
 0x1ab   : > { %5854 = vpow2.f32 %v2056_v9 }
 0x1ad   : > { %v2284_v56 = vpop.f32.mrf.mxu2 }
 0x1ae   : > { %v2324_v59 = vmul.f32 %v2284_v56, %v2097_v47  ;;  %v1839_v62 = vpop.f32.mrf.mxu0  ;;  %v5847_v47 = vpop.eup %5846  ;;  %v6875_v56 = vadd.s32 56, %v6695_v28 }
 0x1af   : > { %v1878_v1 = vmul.f32 %v1839_v62, %v1652_v57  ;;  %v5849_v57 = vpop.eup %5848  ;;  %v6882_v62 = vadd.s32 %v6753_v3, %v6782_v22 }
 0x1b0   : > { %5063 = vst [vmem:[%s6592_s6 + $0x80] sm:$0xff] %v2324_v59  ;;  %v1639_v5 = vmul.f32 %v5849_v57, %v6765_v10  ;;  %v5851_v18 = vpop.eup %5850 }
 0x1b1   : > { %1894 = vst [vmem:[%s6592_s6 + $0x8] sm:$0xff] %v1878_v1  ;;  %v1909_v55 = vpack.c.bf16 %v1878_v1, %v1877_v43  ;;  %v2084_v1 = vmul.f32 %v5847_v47, %v6784_v23  ;;  %vm1537_vm6 = vcmp.ge.s32.totalorder %v6882_v62, %v6771_v12  ;;  %v2085_v8 = vmul.f32 %v5851_v18, %v6784_v23 }
 0x1b2   : > { %v1655_v34 = vsel %vm1537_vm6, %v1639_v5, 0.0  ;;  %v1560_v18 = vadd.s32 %v6697_v29, %v6929_v63 }
 0x1b3   : > { %1989 = vmatmul.bf16.vlgmr.msra.gmra.mxu1 %v1909_v55  ;;  %v1558_v55 = vadd.s32 %v6697_v29, %v6875_v56  ;;  %v2100_v15 = vsel %vm1536_vm5, %v2084_v1, 0.0  ;;  %v2101_v57 = vsel %vm1537_vm6, %v2085_v8, 0.0 }
 0x1b5   : > { %v2286_v20 = vpop.f32.mrf.mxu2 }
 0x1b6   : > { %v2325_v32 = vmul.f32 %v2286_v20, %v2098_v14  ;;  %v1842_v36 = vpop.f32.mrf.mxu0  ;;  %v5625_v14 = vld [vmem:[%s6586_s17 + $0xc8] sm:$0xff]  ;;  %v1612_v20 = vmul.f32 1.442695, %v1590_v4 }
 0x1b7   : > { %v1879_v38 = vmul.f32 %v1842_v36, %v1653_v24  ;;  %v6901_v24 = vcvt.s32.f32 %v1558_v55  ;;  %v5853_v36 = vpop.eup %5852  ;;  %v6936_v55 = vadd.s32 %v6753_v3, %v6849_v19 }
 0x1b8   : > { %5064 = vst [vmem:[%s6592_s6 + $0x88] sm:$0xff] %v2325_v32  ;;  %v2357_v43 = vpack.c.bf16 %v2325_v32, %v2324_v59  ;;  %v1654_v59 = vsel %vm1536_vm5, %v1638_v45, 0.0  ;;  %v1559_v45 = vadd.s32 %v6697_v29, %v6899_v16  ;;  %5856 = vpow2.f32 %v1612_v20 }
 0x1b9   : > { %1895 = vst [vmem:[%s6592_s6 + $0x10] sm:$0xff] %v1879_v38  ;;  %5392 = vmatmul.msk.bf16.gmra.mxu0 %vm1779_vm1, %v5625_v14  ;;  %v1591_v53 = vmul.f32 -0.031748697, %v6901_v24  ;;  %v1640_v47 = vmul.f32 %v5853_v36, %v6765_v10  ;;  %v2037_v5 = vmul.f32 -0.015748357, %v6901_v24  ;;  %vm1539_vm8 = vcmp.ge.s32.totalorder %v6936_v55, %v6771_v12 }
 0x1ba   : > { %2438 = vmatmul.bf16.vlgmr.msra.gmra.mxu3 %v2357_v43  ;;  %v2713_v43 = vsel %vm1779_vm1, %v5612_v31, 0 }
 0x1bb   : > { %2727 = vmatpush.bf16.xpose.msrb.mxu1 %v2713_v43  ;;  %v1656_v1 = vsel %vm1538_vm7, %v1640_v47, 0.0  ;;  %v2060_v31 = vmul.f32 1.442695, %v2037_v5  ;;  %v5611_v43 = vld [vmem:[%s6588_s0 + $0x98] sm:$0xff] }
 0x1bd   : > { %v2289_v58 = vpop.f32.mrf.mxu2 }
 0x1be   : > { %v2326_v61 = vmul.f32 %v2289_v58, %v2099_v46  ;;  %v1844_v0 = vpop.f32.mrf.mxu0  ;;  %v6926_v58 = vcvt.s32.f32 %v1559_v45 }
 0x1bf   : > { %v1880_v2 = vmul.f32 %v1844_v0, %v1654_v59  ;;  %v5855_v59 = vpop.eup %5854 }
 0x1c0   : > { %5065 = vst [vmem:[%s6592_s6 + $0x90] sm:$0xff] %v2326_v61  ;;  %v2086_v9 = vmul.f32 %v5855_v59, %v6784_v23  ;;  %v1592_v14 = vmul.f32 -0.031748697, %v6926_v58  ;;  %v2038_v47 = vmul.f32 -0.015748357, %v6926_v58 }
 0x1c1   : > { %1896 = vst [vmem:[%s6592_s6 + $0x18] sm:$0xff] %v1880_v2  ;;  %v1910_v22 = vpack.c.bf16 %v1880_v2, %v1879_v38  ;;  %v2036_v38 = vmul.f32 -0.015748357, %v6872_v50  ;;  %v5857_v2 = vpop.eup %5856 }
 0x1c2   : > { %v1641_v20 = vmul.f32 %v5857_v2, %v6765_v10  ;;  %v1616_v36 = vmul.f32 1.442695, %v1592_v14  ;;  %v2062_v5 = vmul.f32 1.442695, %v2038_v47  ;;  %v5627_v47 = vld [vmem:[%s6586_s17 + $0xd8] sm:$0xff] }
 0x1c3   : > { %1994 = vmatmul.bf16.gmra.mxu1 %v1910_v22  ;;  %v2058_v49 = vmul.f32 1.442695, %v2036_v38  ;;  %v6952_v38 = vcvt.s32.f32 %v1560_v18 }
 0x1c4   : > { %v1657_v45 = vsel %vm1539_vm8, %v1641_v20, 0.0 }
 0x1c5   : > { %v2291_v32 = vpop.f32.mrf.mxu2  ;;  %5858 = vpow2.f32 %v2058_v49  ;;  %v2710_v49 = vsel %vm1779_vm1, %v5611_v43, 0 }
 0x1c6   : > { %v2327_v37 = vmul.f32 %v2291_v32, %v2100_v15  ;;  %v1847_v44 = vpop.f32.mrf.mxu0  ;;  %v5626_v32 = vld [vmem:[%s6586_s17 + $0xd0] sm:$0xff]  ;;  %2728 = vmatpush.bf16.xpose.msrb.mxu1 %v2710_v49 }
 0x1c7   : > { %v1881_v42 = vmul.f32 %v1847_v44, %v1655_v34  ;;  %v2102_v34 = vsel %vm1538_vm7, %v2086_v9, 0.0  ;;  %v6957_v44 = vadd.s32 80, %v6695_v28 }
 0x1c8   : > { %5066 = vst [vmem:[%s6592_s6 + $0x98] sm:$0xff] %v2327_v37  ;;  %v2358_v46 = vpack.c.bf16 %v2327_v37, %v2326_v61  ;;  %v1614_v61 = vmul.f32 1.442695, %v1591_v53 }
 0x1c9   : > { %1897 = vst [vmem:[%s6592_s6 + $0x20] sm:$0xff] %v1881_v42  ;;  %5393 = vmatmul.msk.bf16.gmra.mxu0 %vm1779_vm1, %v5626_v32  ;;  %v6990_v32 = vadd.s32 %v6753_v3, %v6899_v16 }
 0x1ca   : > { %2443 = vmatmul.bf16.gmra.mxu3 %v2358_v46  ;;  %5860 = vpow2.f32 %v1614_v61 }
 0x1cb   : > { %v5859_v37 = vpop.eup %5858  ;;  %5862 = vpow2.f32 %v2060_v31  ;;  %vm1541_vm10 = vcmp.ge.s32.totalorder %v6990_v32, %v6771_v12 }
 0x1cc   : > { %v2087_v59 = vmul.f32 %v5859_v37, %v6784_v23  ;;  %5864 = vpow2.f32 %v1616_v36 }
 0x1cd   : > { %v2294_v0 = vpop.f32.mrf.mxu2  ;;  %5866 = vpow2.f32 %v2062_v5  ;;  %v7018_v5 = vadd.s32 %v6753_v3, %v6929_v63 }
 0x1ce   : > { %v2328_v4 = vmul.f32 %v2294_v0, %v2101_v57  ;;  %v1849_v22 = vpop.f32.mrf.mxu0 }
 0x1cf   : > { %v1882_v15 = vmul.f32 %v1849_v22, %v1656_v1  ;;  %v1593_v1 = vmul.f32 -0.031748697, %v6952_v38  ;;  %v2103_v22 = vsel %vm1539_vm8, %v2087_v59, 0.0  ;;  %vm1542_vm11 = vcmp.ge.s32.totalorder %v7018_v5, %v6771_v12 }
 0x1d0   : > { %5067 = vst [vmem:[%s6592_s6 + $0xa0] sm:$0xff] %v2328_v4  ;;  %v5861_v46 = vpop.eup %5860 }
 0x1d1   : > { %1898 = vst [vmem:[%s6592_s6 + $0x28] sm:$0xff] %v1882_v15  ;;  %v1911_v19 = vpack.c.bf16 %v1882_v15, %v1881_v42  ;;  %v6964_v42 = vadd.s32 %v6753_v3, %v6875_v56  ;;  %v1561_v56 = vadd.s32 %v6697_v29, %v6957_v44  ;;  %v1642_v2 = vmul.f32 %v5861_v46, %v6765_v10  ;;  %v5863_v9 = vpop.eup %5862 }
 0x1d2   : > { %v6983_v15 = vadd.s32 88, %v6695_v28  ;;  %v5865_v18 = vpop.eup %5864  ;;  %v2088_v37 = vmul.f32 %v5863_v9, %v6784_v23 }
 0x1d3   : > { %1999 = vmatmul.bf16.gmra.mxu1 %v1911_v19  ;;  %vm1540_vm9 = vcmp.ge.s32.totalorder %v6964_v42, %v6771_v12  ;;  %v6980_v14 = vcvt.s32.f32 %v1561_v56  ;;  %v1643_v46 = vmul.f32 %v5865_v18, %v6765_v10  ;;  %v5867_v59 = vpop.eup %5866  ;;  %v5610_v56 = vld [vmem:[%s6588_s0 + $0x90] sm:$0xff] }
 0x1d4   : > { %v1658_v19 = vsel %vm1540_vm9, %v1642_v2, 0.0  ;;  %v2104_v49 = vsel %vm1540_vm9, %v2088_v37, 0.0  ;;  %v2707_v18 = vsel %vm1779_vm1, %v5610_v56, 0  ;;  %v7044_v56 = vadd.s32 %v6753_v3, %v6957_v44 }
 0x1d5   : > { %v2296_v8 = vpop.f32.mrf.mxu2  ;;  %v1659_v2 = vsel %vm1541_vm10, %v1643_v46, 0.0  ;;  %2729 = vmatpush.bf16.xpose.msrb.mxu1 %v2707_v18 }
 0x1d6   : > { %v2329_v53 = vmul.f32 %v2296_v8, %v2102_v34  ;;  %v1852_v57 = vpop.f32.mrf.mxu0  ;;  %v2039_v34 = vmul.f32 -0.015748357, %v6952_v38  ;;  %v1594_v8 = vmul.f32 -0.031748697, %v6980_v14  ;;  %vm1543_vm12 = vcmp.ge.s32.totalorder %v7044_v56, %v6771_v12 }
 0x1d7   : > { %v1883_v61 = vmul.f32 %v1852_v57, %v1657_v45  ;;  %v1562_v45 = vadd.s32 %v6697_v29, %v6983_v15  ;;  %v7007_v57 = vadd.s32 96, %v6695_v28 }
 0x1d8   : > { %5068 = vst [vmem:[%s6592_s6 + $0xa8] sm:$0xff] %v2329_v53  ;;  %v2359_v0 = vpack.c.bf16 %v2329_v53, %v2328_v4  ;;  %v1618_v4 = vmul.f32 1.442695, %v1593_v1  ;;  %v2064_v53 = vmul.f32 1.442695, %v2039_v34 }
 0x1d9   : > { %1899 = vst [vmem:[%s6592_s6 + $0x30] sm:$0xff] %v1883_v61  ;;  %v7009_v1 = vcvt.s32.f32 %v1562_v45  ;;  %5394 = vmatmul.msk.bf16.gmra.mxu0 %vm1779_vm1, %v5627_v47  ;;  %v1563_v34 = vadd.s32 %v6697_v29, %v7007_v57 }
 0x1da   : > { %2448 = vmatmul.bf16.gmra.mxu3 %v2359_v0  ;;  %5868 = vpow2.f32 %v1618_v4  ;;  %v1620_v0 = vmul.f32 1.442695, %v1594_v8  ;;  %v2040_v4 = vmul.f32 -0.015748357, %v6980_v14 }
 0x1db   : > { %5870 = vpow2.f32 %v2064_v53  ;;  %v1595_v63 = vmul.f32 -0.031748697, %v7009_v1  ;;  %v7034_v46 = vcvt.s32.f32 %v1563_v34  ;;  %v7037_v53 = vadd.s32 104, %v6695_v28  ;;  %v5628_v34 = vld [vmem:[%s6586_s17 + $0xe0] sm:$0xff] }
 0x1dc   : > { %5872 = vpow2.f32 %v1620_v0  ;;  %v2066_v8 = vmul.f32 1.442695, %v2040_v4 }
 0x1dd   : > { %v2299_v20 = vpop.f32.mrf.mxu2  ;;  %v1564_v18 = vadd.s32 %v6697_v29, %v7037_v53 }
 0x1de   : > { %v2330_v31 = vmul.f32 %v2299_v20, %v2103_v22  ;;  %v1854_v36 = vpop.f32.mrf.mxu0  ;;  %5874 = vpow2.f32 %v2066_v8 }
 0x1df   : > { %v1884_v43 = vmul.f32 %v1854_v36, %v1658_v19  ;;  %v2089_v19 = vmul.f32 %v5867_v59, %v6784_v23  ;;  %v7060_v8 = vcvt.s32.f32 %v1564_v18 }
 0x1e0   : > { %5069 = vst [vmem:[%s6592_s6 + $0xb0] sm:$0xff] %v2330_v31  ;;  %v5869_v22 = vpop.eup %5868 }
 0x1e1   : > { %1900 = vst [vmem:[%s6592_s6 + $0x38] sm:$0xff] %v1884_v43  ;;  %v1912_v16 = vpack.c.bf16 %v1884_v43, %v1883_v61  ;;  %v1644_v43 = vmul.f32 %v5869_v22, %v6765_v10  ;;  %v2105_v45 = vsel %vm1541_vm10, %v2089_v19, 0.0 }
 0x1e3   : > { %2004 = vmatmul.bf16.gmra.mxu1 %v1912_v16  ;;  %v5871_v16 = vpop.eup %5870 }
 0x1e4   : > { %v5873_v59 = vpop.eup %5872  ;;  %v2090_v22 = vmul.f32 %v5871_v16, %v6784_v23 }
 0x1e5   : > { %v2301_v61 = vpop.f32.mrf.mxu2 }
 0x1e6   : > { %v2331_v9 = vmul.f32 %v2301_v61, %v2104_v49  ;;  %v1857_v20 = vpop.f32.mrf.mxu0  ;;  %v1660_v49 = vsel %vm1542_vm11, %v1644_v43, 0.0  ;;  %v2041_v61 = vmul.f32 -0.015748357, %v7009_v1  ;;  %v5875_v43 = vpop.eup %5874 }
 0x1e7   : > { %v1885_v36 = vmul.f32 %v1857_v20, %v1659_v2  ;;  %v1645_v20 = vmul.f32 %v5873_v59, %v6765_v10 }
 0x1e8   : > { %5070 = vst [vmem:[%s6592_s6 + $0xb8] sm:$0xff] %v2331_v9  ;;  %v2360_v37 = vpack.c.bf16 %v2331_v9, %v2330_v31  ;;  %v1622_v31 = vmul.f32 1.442695, %v1595_v63  ;;  %v1596_v9 = vmul.f32 -0.031748697, %v7034_v46 }
 0x1e9   : > { %1901 = vst [vmem:[%s6592_s6 + $0x40] sm:$0xff] %v1885_v36  ;;  %v2068_v19 = vmul.f32 1.442695, %v2041_v61  ;;  %5395 = vmatmul.msk.bf16.gmra.mxu0 %vm1779_vm1, %v5628_v34  ;;  %v2042_v61 = vmul.f32 -0.015748357, %v7034_v46 }
 0x1ea   : > { %2453 = vmatmul.bf16.gmra.mxu3 %v2360_v37  ;;  %5876 = vpow2.f32 %v1622_v31  ;;  %v2106_v37 = vsel %vm1542_vm11, %v2090_v22, 0.0  ;;  %v1624_v63 = vmul.f32 1.442695, %v1596_v9  ;;  %v1661_v31 = vsel %vm1543_vm12, %v1645_v20, 0.0 }
 0x1eb   : > { %5878 = vpow2.f32 %v2068_v19  ;;  %v2091_v9 = vmul.f32 %v5875_v43, %v6784_v23  ;;  %v1597_v20 = vmul.f32 -0.031748697, %v7060_v8  ;;  %v2070_v19 = vmul.f32 1.442695, %v2042_v61 }
 0x1ec   : > { %5880 = vpow2.f32 %v1624_v63  ;;  %v7091_v43 = vadd.s32 120, %v6695_v28  ;;  %v2043_v61 = vmul.f32 -0.015748357, %v7060_v8 }
 0x1ed   : > { %v2304_v47 = vpop.f32.mrf.mxu2  ;;  %v2107_v34 = vsel %vm1543_vm12, %v2091_v9, 0.0  ;;  %5882 = vpow2.f32 %v2070_v19 }
 0x1ee   : > { %v2332_v0 = vmul.f32 %v2304_v47, %v2105_v45  ;;  %v1859_v2 = vpop.f32.mrf.mxu0  ;;  %v5609_v45 = vld [vmem:[%s6588_s0 + $0x88] sm:$0xff]  ;;  %v7072_v47 = vadd.s32 %v6753_v3, %v6983_v15 }
 0x1ef   : > { %v1886_v4 = vmul.f32 %v1859_v2, %v1660_v49  ;;  %v2704_v2 = vsel %vm1779_vm1, %v5609_v45, 0 }
 0x1f0   : > { %5071 = vst [vmem:[%s6592_s6 + $0xc0] sm:$0xff] %v2332_v0  ;;  %v5877_v49 = vpop.eup %5876  ;;  %2730 = vmatpush.bf16.xpose.msrb.mxu1 %v2704_v2  ;;  %vm1544_vm13 = vcmp.ge.s32.totalorder %v7072_v47, %v6771_v12 }
 0x1f1   : > { %1902 = vst [vmem:[%s6592_s6 + $0x48] sm:$0xff] %v1886_v4  ;;  %v1913_v44 = vpack.c.bf16 %v1886_v4, %v1885_v36  ;;  %v7065_v36 = vadd.s32 112, %v6695_v28 }
 0x1f3   : > { %2009 = vmatmul.bf16.gmra.mxu1 %v1913_v44  ;;  %v1565_v15 = vadd.s32 %v6697_v29, %v7065_v36  ;;  %v1646_v44 = vmul.f32 %v5877_v49, %v6765_v10 }
 0x1f5   : > { %v2306_v16 = vpop.f32.mrf.mxu2  ;;  %v7088_v63 = vcvt.s32.f32 %v1565_v15  ;;  %v2072_v15 = vmul.f32 1.442695, %v2043_v61 }
 0x1f6   : > { %v2333_v59 = vmul.f32 %v2306_v16, %v2106_v37  ;;  %v1862_v22 = vpop.f32.mrf.mxu0  ;;  %v5879_v37 = vpop.eup %5878 }
 0x1f7   : > { %v1887_v4 = vmul.f32 %v1862_v22, %v1661_v31  ;;  %v5881_v45 = vpop.eup %5880  ;;  %v1662_v31 = vsel %vm1544_vm13, %v1646_v44, 0.0  ;;  %v2092_v28 = vmul.f32 %v5879_v37, %v6784_v23  ;;  %v1598_v9 = vmul.f32 -0.031748697, %v7088_v63  ;;  %v5629_v44 = vld [vmem:[%s6586_s17 + $0xe8] sm:$0xff] }
 0x1f8   : > { %5072 = vst [vmem:[%s6592_s6 + $0xc8] sm:$0xff] %v2333_v59  ;;  %v2361_v18 = vpack.c.bf16 %v2333_v59, %v2332_v0  ;;  %v1626_v0 = vmul.f32 1.442695, %v1597_v20  ;;  %v7098_v59 = vadd.s32 %v6753_v3, %v7007_v57  ;;  %v1647_v20 = vmul.f32 %v5881_v45, %v6765_v10 }
 0x1f9   : > { %1903 = vst [vmem:[%s6592_s6 + $0x50] sm:$0xff] %v1887_v4  ;;  %v2108_v19 = vsel %vm1544_vm13, %v2092_v28, 0.0  ;;  %v1628_v37 = vmul.f32 1.442695, %v1598_v9  ;;  %5396 = vmatmul.msk.bf16.gmra.mxu0 %vm1779_vm1, %v5629_v44  ;;  %v7136_v44 = vld [vmem:[%s6590_s14 + $0xf8] sm:$0xff] }
 0x1fa   : > { %2458 = vmatmul.bf16.gmra.mxu3 %v2361_v18  ;;  %5884 = vpow2.f32 %v1626_v0  ;;  %v1566_v18 = vadd.s32 %v6697_v29, %v7091_v43  ;;  %vm1545_vm14 = vcmp.ge.s32.totalorder %v7098_v59, %v6771_v12  ;;  %v5608_v29 = vld [vmem:[%s6588_s0 + $0x80] sm:$0xff]  ;;  %3328 = vmatpush.bf16.msrb.mxu2 %v7136_v44 }
 0x1fb   : > { %5886 = vpow2.f32 %v2072_v15  ;;  %v2701_v28 = vsel %vm1779_vm1, %v5608_v29, 0 }
 0x1fc   : > { %v7114_v0 = vcvt.s32.f32 %v1566_v18  ;;  %2731 = vmatpush.bf16.xpose.msrb.mxu1 %v2701_v28  ;;  %5888 = vpow2.f32 %v1628_v37 }
 0x1fd   : > { %v2309_v16 = vpop.f32.mrf.mxu2 }
 0x1fe   : > { %v2334_v49 = vmul.f32 %v2309_v16, %v2107_v34  ;;  %v1864_v2 = vpop.f32.mrf.mxu0  ;;  %v5883_v34 = vpop.eup %5882  ;;  %v7123_v16 = vadd.s32 %v6753_v3, %v7037_v53  ;;  %v1599_v53 = vmul.f32 -0.031748697, %v7114_v0 }
 0x1ff   : > { %v1888_v22 = vmul.f32 %v1864_v2, %v1662_v31  ;;  %v2044_v2 = vmul.f32 -0.015748357, %v7088_v63  ;;  %v2093_v9 = vmul.f32 %v5883_v34, %v6784_v23 }
 0x200   : > { %5073 = vst [vmem:[%s6592_s6 + $0xd0] sm:$0xff] %v2334_v49  ;;  %v5885_v31 = vpop.eup %5884  ;;  %vm8337_vm15 = vcmp.ge.s32.totalorder %v7123_v16, %v6771_v12  ;;  %v1630_v34 = vmul.f32 1.442695, %v1599_v53 }
 0x201   : > { %1904 = vst [vmem:[%s6592_s6 + $0x58] sm:$0xff] %v1888_v22  ;;  %v1914_v57 = vpack.c.bf16 %v1888_v22, %v1887_v4  ;;  %v1663_v4 = vsel %vm1545_vm14, %v1647_v20, 0.0  ;;  %v2074_v15 = vmul.f32 1.442695, %v2044_v2 }
 0x203   : > { %2014 = vmatmul.bf16.gmra.mxu1 %v1914_v57  ;;  %v1648_v57 = vmul.f32 %v5885_v31, %v6765_v10  ;;  %5890 = vpow2.f32 %v2074_v15  ;;  %v2045_v31 = vmul.f32 -0.015748357, %v7114_v0 }
 0x204   : > { %5665 = vmatpush.bf16.xpose.msra.mxu1 %v6670_v13  ;;  %5892 = vpow2.f32 %v1630_v34 }
 0x205   : > { %v2311_v45 = vpop.f32.mrf.mxu2  ;;  %v1664_v37 = vsel %vm8337_vm15, %v1648_v57, 0.0 }
 0x206   : > { %v2335_v61 = vmul.f32 %v2311_v45, %v2108_v19  ;;  %v1867_v22 = vpop.f32.mrf.mxu0  ;;  %v5887_v19 = vpop.eup %5886 }
 0x207   : > { %v1889_v18 = vmul.f32 %v1867_v22, %v1663_v4  ;;  %v5889_v29 = vpop.eup %5888  ;;  %v7147_v4 = vadd.s32 %v6753_v3, %v7065_v36  ;;  %v2094_v2 = vmul.f32 %v5887_v19, %v6784_v23  ;;  %v2076_v36 = vmul.f32 1.442695, %v2045_v31 }
 0x208   : > { %5074 = vst [vmem:[%s6592_s6 + $0xd8] sm:$0xff] %v2335_v61  ;;  %v2362_v20 = vpack.c.bf16 %v2335_v61, %v2334_v49  ;;  %v2109_v49 = vsel %vm1545_vm14, %v2093_v9, 0.0  ;;  %v1649_v22 = vmul.f32 %v5889_v29, %v6765_v10  ;;  %v7167_v19 = vadd.s32 %v6753_v3, %v7091_v43 }
 0x209   : > { %1905 = vst [vmem:[%s6592_s6 + $0x60] sm:$0xff] %v1889_v18  ;;  %vm1547_vm0 = vcmp.ge.s32.totalorder %v7147_v4, %v6771_v12  ;;  %v2110_v53 = vsel %vm8337_vm15, %v2094_v2, 0.0  ;;  %v5891_v57 = vpop.eup %5890  ;;  %5894 = vpow2.f32 %v2076_v36  ;;  %v7184_v2 = vld [vmem:[%s6590_s14 + $0xf0] sm:$0xff] }
 0x20a   : > { %2463 = vmatmul.bf16.gmra.mxu3 %v2362_v20  ;;  %v5630_v20 = vld [vmem:[%s6586_s17 + $0xf0] sm:$0xff]  ;;  %v5893_v15 = vpop.eup %5892  ;;  %vm8338_vm15 = vcmp.ge.s32.totalorder %v7167_v19, %v6771_v12  ;;  %3329 = vmatpush.bf16.msrb.mxu2 %v7184_v2 }
 0x20b   : > { %5397 = vmatmul.msk.bf16.gmra.mxu0 %vm1779_vm1, %v5630_v20  ;;  %v1650_v31 = vmul.f32 %v5893_v15, %v6765_v10  ;;  %v2976_v15 = vmul.f32 0.0039138994, %v6713_v40 }
 0x20c   : > { %5666 = vmatpush.bf16.xpose.msra.mxu1 %v6683_v21 }
 0x20d   : > { %v2314_v13 = vpop.f32.mrf.mxu2 }
 0x20e   : > { %v2336_v45 = vmul.f32 %v2314_v13, %v2109_v49  ;;  %v1869_v61 = vpop.f32.mrf.mxu0  ;;  %v2095_v13 = vmul.f32 %v5891_v57, %v6784_v23  ;;  %v7195_v57 = vld [vmem:[%s6590_s14 + $0xe8] sm:$0xff] }
 0x20f   : > { %v1890_v28 = vmul.f32 %v1869_v61, %v1664_v37  ;;  %v5895_v43 = vpop.eup %5894  ;;  %3330 = vmatpush.bf16.msrb.mxu2 %v7195_v57 }
 0x210   : > { %5075 = vst [vmem:[%s6592_s6 + $0xe0] sm:$0xff] %v2336_v45  ;;  %v2111_v3 = vsel %vm1547_vm0, %v2095_v13, 0.0  ;;  %v7209_v13 = vld [vmem:[%s6590_s14 + $0xd8] sm:$0xff] }
 0x211   : > { %1906 = vst [vmem:[%s6592_s6 + $0x68] sm:$0xff] %v1890_v28  ;;  %v1915_v9 = vpack.c.bf16 %v1890_v28, %v1889_v18  ;;  %v1665_v18 = vsel %vm1547_vm0, %v1649_v22, 0.0  ;;  %v2096_v22 = vmul.f32 %v5895_v43, %v6784_v23 }
 0x213   : > { %2019 = vmatmul.bf16.gmra.mxu1 %v1915_v9  ;;  %v2112_v20 = vsel %vm8338_vm15, %v2096_v22, 0.0 }
 0x214   : > { %5667 = vmatpush.bf16.xpose.msra.mxu1 %v6693_v27  ;;  %v5623_v27 = vld [vmem:[%s6590_s14 + $0xb8] sm:$0xff] }
 0x215   : > { %v2316_v21 = vpop.f32.mrf.mxu2  ;;  %2879 = vmatpush.bf16.msrb.mxu3 %v5623_v27 }
 0x216   : > { %v2337_v49 = vmul.f32 %v2316_v21, %v2110_v53  ;;  %v1872_v34 = vpop.f32.mrf.mxu0 }
 0x217   : > { %v1891_v37 = vmul.f32 %v1872_v34, %v1665_v18  ;;  %v2928_v18 = vmul.f32 -0.0039138994, %v6711_v39  ;;  %v5622_v34 = vld [vmem:[%s6590_s14 + $0xb0] sm:$0xff] }
 0x218   : > { %5076 = vst [vmem:[%s6592_s6 + $0xe8] sm:$0xff] %v2337_v49  ;;  %v2363_v29 = vpack.c.bf16 %v2337_v49, %v2336_v45  ;;  %v1666_v45 = vsel %vm8338_vm15, %v1650_v31, 0.0  ;;  %v2929_v49 = vmul.f32 -0.0039138994, %v6730_v52  ;;  %vm8384_vm15 = vcmp.ge.s32.totalorder %v7123_v16, %v6771_v12 }
 0x219   : > { %1907 = vst [vmem:[%s6592_s6 + $0x70] sm:$0xff] %v1891_v37  ;;  %2880 = vmatpush.bf16.msrb.mxu3 %v5622_v34  ;;  %v5621_v34 = vld [vmem:[%s6590_s14 + $0xa8] sm:$0xff] }
 0x21a   : > { %2468 = vmatmul.bf16.gmra.mxu3 %v2363_v29  ;;  %v2977_v29 = vmul.f32 1.442695, %v2976_v15  ;;  %v2946_v31 = vmul.f32 1.442695, %v2929_v49  ;;  %v2931_v15 = vmul.f32 -0.0039138994, %v6786_v25 }
 0x21c   : > { %5668 = vmatpush.bf16.xpose.msra.mxu1 %v6716_v41  ;;  %v7201_v41 = vld [vmem:[%s6590_s14 + $0xe0] sm:$0xff] }
 0x21d   : > { %v2319_v61 = vpop.f32.mrf.mxu2  ;;  %3331 = vmatpush.bf16.msrb.mxu2 %v7201_v41  ;;  %2881 = vmatpush.bf16.msrb.mxu3 %v5621_v34  ;;  %v2933_v34 = vmul.f32 -0.0039138994, %v6844_v17 }
 0x21e   : > { %v2338_v10 = vmul.f32 %v2319_v61, %v2111_v3  ;;  %v1874_v28 = vpop.f32.mrf.mxu0  ;;  %v7217_v61 = vld [vmem:[%s6590_s14 + $0xd0] sm:$0xff] }
 0x21f   : > { %v1892_v9 = vmul.f32 %v1874_v28, %v1666_v45  ;;  %v7222_v45 = vld [vmem:[%s6590_s14 + $0xc8] sm:$0xff] }
 0x220   : > { %5077 = vst [vmem:[%s6592_s6 + $0xf0] sm:$0xff] %v2338_v10 }
 0x221   : > { %1908 = vst [vmem:[%s6592_s6 + $0x78] sm:$0xff] %v1892_v9  ;;  %v1916_v36 = vpack.c.bf16 %v1892_v9, %v1891_v37  ;;  %v2944_v37 = vmul.f32 1.442695, %v2928_v18  ;;  %3332 = vmatpush.bf16.msrb.mxu2 %v7209_v13  ;;  %v2930_v18 = vmul.f32 -0.0039138994, %v6756_v6 }
 0x223   : > { %2024 = vmatmul.bf16.gmra.mxu1 %v1916_v36  ;;  %5896 = vpow2.f32 %v2944_v37 }
 0x224   : > { %5669 = vmatpush.bf16.xpose.msra.mxu1 %v6734_v54  ;;  %v5600_v54 = vld [vmem:[%s6586_s17 + $0x80] sm:$0xff]  ;;  %5898 = vpow2.f32 %v2977_v29  ;;  %v2948_v29 = vmul.f32 1.442695, %v2930_v18 }
 0x225   : > { %v2321_v53 = vpop.f32.mrf.mxu2  ;;  %5900 = vpow2.f32 %v2946_v31  ;;  %3333 = vmatpush.bf16.msrb.mxu2 %v7217_v61  ;;  %v2950_v31 = vmul.f32 1.442695, %v2931_v15 }
 0x226   : > { %v2339_v23 = vmul.f32 %v2321_v53, %v2112_v20  ;;  %v3182_v43 = vpop.f32.mrf.mxu0  ;;  %v7233_v20 = vld [vmem:[%s6590_s14 + $0xc0] sm:$0xff]  ;;  %5902 = vpow2.f32 %v2948_v29 }
 0x227   : > { %5904 = vpow2.f32 %v2950_v31  ;;  %v5620_v29 = vld [vmem:[%s6590_s14 + $0xa0] sm:$0xff] }
 0x228   : > { %5078 = vst [vmem:[%s6592_s6 + $0xf8] sm:$0xff] %v2339_v23  ;;  %v2364_v21 = vpack.c.bf16 %v2339_v23, %v2338_v10  ;;  %2882 = vmatpush.bf16.msrb.mxu3 %v5620_v29 }
 0x229   : > { %v5897_v27 = vpop.eup %5896  ;;  %3334 = vmatpush.bf16.msrb.mxu2 %v7222_v45 }
 0x22a   : > { %2473 = vmatmul.bf16.gmra.mxu3 %v2364_v21  ;;  %v7224_v10 = vpop.eup %5898 }
 0x22b   : > { %v2979_v28 = vmul.f32 %v7224_v10, %v5897_v27 }
 0x22c   : > { %5670 = vmatpush.bf16.xpose.msra.mxu1 %v6759_v7  ;;  %v5901_v7 = vpop.eup %5900 }
 0x22d   : > { %v2980_v9 = vmul.f32 %v5901_v7, %v7224_v10  ;;  %v2995_v53 = vsel %vm1533_vm2, %v2979_v28, 0.0  ;;  %3335 = vmatpush.bf16.msrb.mxu2 %v7233_v20  ;;  %v5903_v28 = vpop.eup %5902 }
 0x22e   : > { %v3184_v36 = vpop.f32.mrf.mxu0  ;;  %v3222_v23 = vmul.f32 %v3182_v43, %v2995_v53 }
 0x22f   : > { %v2996_v21 = vsel %vm1534_vm3, %v2980_v9, 0.0  ;;  %v5905_v9 = vpop.eup %5904 }
 0x230   : > { %v7214_v3 = vpop.f32.mrf.mxu1  ;;  %5399 = vst [vmem:[%s6592_s6 + $0x180] sm:$0xff] %v3222_v23  ;;  %v2982_v53 = vmul.f32 %v5905_v9, %v7224_v10 }
 0x232   : > { %v2998_v18 = vsel %vm1536_vm5, %v2982_v53, 0.0 }
 0x233   : > { %5223 = vmatmul.msk.bf16.vlgmr.msrb.gmra.mxu1 %vm1779_vm1, %v5600_v54  ;;  %v5601_v54 = vld [vmem:[%s6586_s17 + $0x88] sm:$0xff] }
 0x234   : > { %5671 = vmatpush.bf16.xpose.msra.mxu1 %v6790_v30  ;;  %v3223_v30 = vmul.f32 %v3184_v36, %v2996_v21  ;;  %v2981_v36 = vmul.f32 %v5903_v28, %v7224_v10 }
 0x236   : > { %5400 = vst [vmem:[%s6592_s6 + $0x188] sm:$0xff] %v3223_v30  ;;  %v3255_v37 = vpack.c.bf16 %v3223_v30, %v3222_v23  ;;  %v3187_v27 = vpop.f32.mrf.mxu0 }
 0x238   : > { %v7229_v22 = vpop.f32.mrf.mxu1  ;;  %3336 = vmatmul.bf16.vlgmr.msrb.gmra.mxu2 %v3255_v37 }
 0x23c   : > { %5672 = vmatpush.bf16.xpose.msra.mxu1 %v6817_v51  ;;  %v2997_v51 = vsel %vm1535_vm4, %v2981_v36, 0.0 }
 0x23d   : > { %v2439_v49 = vpop.f32.mrf.mxu3  ;;  %v3224_v30 = vmul.f32 %v3187_v27, %v2997_v51  ;;  %v5602_v27 = vld [vmem:[%s6586_s17 + $0x90] sm:$0xff] }
 0x23e   : > { %3409 = vrot.lane.b32.xlu0 %v2439_v49, %s6120_s11  ;;  %v3189_v21 = vpop.f32.mrf.mxu0  ;;  %v2932_v49 = vmul.f32 -0.0039138994, %v6814_v48 }
 0x23f   : > { %v3225_v15 = vmul.f32 %v3189_v21, %v2998_v18  ;;  %5401 = vst [vmem:[%s6592_s6 + $0x190] sm:$0xff] %v3224_v30 }
 0x240   : > { %v7250_v43 = vpop.f32.mrf.mxu1 }
 0x241   : > { %5402 = vst [vmem:[%s6592_s6 + $0x198] sm:$0xff] %v3225_v15  ;;  %v3256_v31 = vpack.c.bf16 %v3225_v15, %v3224_v30 }
 0x243   : > { %5224 = vmatmul.msk.bf16.gmra.mxu1 %vm1779_vm1, %v5601_v54  ;;  %v2952_v54 = vmul.f32 1.442695, %v2932_v49 }
 0x245   : > { %v2441_v7 = vpop.f32.mrf.mxu3  ;;  %5906 = vpow2.f32 %v2952_v54  ;;  %v2935_v54 = vmul.f32 -0.0039138994, %v6901_v24 }
 0x246   : > { %3411 = vrot.lane.b32.xlu0 %v2441_v7, %s6120_s11  ;;  %v2954_v7 = vmul.f32 1.442695, %v2933_v34  ;;  %v3192_v9 = vpop.f32.mrf.mxu0 }
 0x248   : > { %v7256_v23 = vpop.f32.mrf.mxu1  ;;  %3341 = vmatmul.bf16.gmra.mxu2 %v3256_v31  ;;  %5908 = vpow2.f32 %v2954_v7  ;;  %v2934_v31 = vmul.f32 -0.0039138994, %v6872_v50 }
 0x24b   : > { %v5907_v53 = vpop.eup %5906 }
 0x24c   : > { %v2983_v21 = vmul.f32 %v5907_v53, %v7224_v10  ;;  %v2956_v53 = vmul.f32 1.442695, %v2934_v31 }
 0x24d   : > { %v2444_v37 = vpop.f32.mrf.mxu3 }
 0x24e   : > { %3413 = vrot.lane.b32.xlu1 %v2444_v37, %s6120_s11  ;;  %v5909_v51 = vpop.eup %5908  ;;  %v2999_v15 = vsel %vm1537_vm6, %v2983_v21, 0.0  ;;  %v3194_v49 = vpop.f32.mrf.mxu0  ;;  %5910 = vpow2.f32 %v2956_v53 }
 0x24f   : > { %v2984_v30 = vmul.f32 %v5909_v51, %v7224_v10  ;;  %v3226_v34 = vmul.f32 %v3192_v9, %v2999_v15  ;;  %v2958_v51 = vmul.f32 1.442695, %v2935_v54  ;;  %v5603_v9 = vld [vmem:[%s6586_s17 + $0x98] sm:$0xff] }
 0x250   : > { %v7271_v28 = vpop.f32.mrf.mxu1 }
 0x251   : > { %v3000_v37 = vsel %vm1538_vm7, %v2984_v30, 0.0  ;;  %5403 = vst [vmem:[%s6592_s6 + $0x1a0] sm:$0xff] %v3226_v34  ;;  %5912 = vpow2.f32 %v2958_v51  ;;  %v2936_v51 = vmul.f32 -0.0039138994, %v6926_v58 }
 0x252   : > { %v3227_v29 = vmul.f32 %v3194_v49, %v3000_v37 }
 0x253   : > { %5225 = vmatmul.msk.bf16.gmra.mxu1 %vm1779_vm1, %v5602_v27  ;;  %v5619_v27 = vld [vmem:[%s6590_s14 + $0x98] sm:$0xff] }
 0x254   : > { %5404 = vst [vmem:[%s6592_s6 + $0x1a8] sm:$0xff] %v3227_v29  ;;  %2883 = vmatpush.bf16.msrb.mxu3 %v5619_v27  ;;  %v5911_v49 = vpop.eup %5910 }
 0x255   : > { %v2446_v36 = vpop.f32.mrf.mxu3  ;;  %v2985_v37 = vmul.f32 %v5911_v49, %v7224_v10  ;;  %v5618_v49 = vld [vmem:[%s6590_s14 + $0x90] sm:$0xff] }
 0x256   : > { %3415 = vrot.lane.b32.xlu1 %v2446_v36, %s6120_s11  ;;  %v3257_v36 = vpack.c.bf16 %v3227_v29, %v3226_v34  ;;  %v3197_v30 = vpop.f32.mrf.mxu0 }
 0x257   : > { %v5913_v34 = vpop.eup %5912  ;;  %v3001_v54 = vsel %vm1539_vm8, %v2985_v37, 0.0  ;;  %v2960_v37 = vmul.f32 1.442695, %v2936_v51 }
 0x258   : > { %v7277_v18 = vpop.f32.mrf.mxu1  ;;  %3346 = vmatmul.bf16.gmra.mxu2 %v3257_v36  ;;  %v2986_v29 = vmul.f32 %v5913_v34, %v7224_v10  ;;  %v3228_v27 = vmul.f32 %v3197_v30, %v3001_v54  ;;  %2884 = vmatpush.bf16.msrb.mxu3 %v5618_v49  ;;  %v5604_v30 = vld [vmem:[%s6586_s17 + $0xa0] sm:$0xff] }
 0x259   : > { %5914 = vpow2.f32 %v2960_v37 }
 0x25a   : > { %v3002_v36 = vsel %vm1540_vm9, %v2986_v29, 0.0  ;;  %5405 = vst [vmem:[%s6592_s6 + $0x1b0] sm:$0xff] %v3228_v27 }
 0x25d   : > { %v2449_v7 = vpop.f32.mrf.mxu3 }
 0x25e   : > { %3417 = vrot.lane.b32.xlu2 %v2449_v7, %s6120_s11  ;;  %v3199_v7 = vpop.f32.mrf.mxu0 }
 0x25f   : > { %v3229_v53 = vmul.f32 %v3199_v7, %v3002_v36  ;;  %v5915_v36 = vpop.eup %5914 }
 0x260   : > { %v7292_v21 = vpop.f32.mrf.mxu1 }
 0x261   : > { %8379 = vst [vmem:[#allocation23_spill] sm:$0xff] %v7292_v21  ;;  %v3258_v34 = vpack.c.bf16 %v3229_v53, %v3228_v27 }
 0x262   : > { %5406 = vst [vmem:[%s6592_s6 + $0x1b8] sm:$0xff] %v3229_v53  ;;  %v2987_v53 = vmul.f32 %v5915_v36, %v7224_v10 }
 0x263   : > { %5226 = vmatmul.msk.bf16.gmra.mxu1 %vm1779_vm1, %v5603_v9  ;;  %v2937_v9 = vmul.f32 -0.0039138994, %v6952_v38 }
 0x265   : > { %v2451_v15 = vpop.f32.mrf.mxu3  ;;  %v2962_v21 = vmul.f32 1.442695, %v2937_v9 }
 0x266   : > { %3419 = vrot.lane.b32.xlu2 %v2451_v15, %s6120_s11  ;;  %v3202_v29 = vpop.f32.mrf.mxu0 }
 0x267   : > { %5916 = vpow2.f32 %v2962_v21 }
 0x268   : > { %v7298_v31 = vpop.f32.mrf.mxu1  ;;  %3351 = vmatmul.bf16.gmra.mxu2 %v3258_v34 }
 0x26d   : > { %v2454_v15 = vpop.f32.mrf.mxu3  ;;  %v5917_v27 = vpop.eup %5916 }
 0x26e   : > { %3421 = vrot.lane.b32.xlu0 %v2454_v15, %s6120_s11  ;;  %v2988_v51 = vmul.f32 %v5917_v27, %v7224_v10  ;;  %v3003_v15 = vsel %vm1541_vm10, %v2987_v53, 0.0  ;;  %v3204_v21 = vpop.f32.mrf.mxu0 }
 0x26f   : > { %v3230_v49 = vmul.f32 %v3202_v29, %v3003_v15  ;;  %v5605_v29 = vld [vmem:[%s6586_s17 + $0xa8] sm:$0xff] }
 0x270   : > { %v7313_v54 = vpop.f32.mrf.mxu1  ;;  %v3004_v34 = vsel %vm1542_vm11, %v2988_v51, 0.0 }
 0x271   : > { %8380 = vst [vmem:[#allocation24_spill] sm:$0xff] %v7313_v54  ;;  %v3231_v37 = vmul.f32 %v3204_v21, %v3004_v34 }
 0x272   : > { %5407 = vst [vmem:[%s6592_s6 + $0x1c0] sm:$0xff] %v3230_v49 }
 0x273   : > { %5227 = vmatmul.msk.bf16.gmra.mxu1 %vm1779_vm1, %v5604_v30  ;;  %v2938_v30 = vmul.f32 -0.0039138994, %v6980_v14  ;;  %5408 = vst [vmem:[%s6592_s6 + $0x1c8] sm:$0xff] %v3231_v37  ;;  %v3259_v27 = vpack.c.bf16 %v3231_v37, %v3230_v49 }
 0x275   : > { %v2456_v7 = vpop.f32.mrf.mxu3  ;;  %v2964_v53 = vmul.f32 1.442695, %v2938_v30 }
 0x276   : > { %3423 = vrot.lane.b32.xlu1 %v2456_v7, %s6120_s11  ;;  %v2939_v7 = vmul.f32 -0.0039138994, %v7009_v1  ;;  %v3207_v51 = vpop.f32.mrf.mxu0 }
 0x277   : > { %5918 = vpow2.f32 %v2964_v53 }
 0x278   : > { %v7319_v9 = vpop.f32.mrf.mxu1  ;;  %v2966_v54 = vmul.f32 1.442695, %v2939_v7  ;;  %3356 = vmatmul.bf16.gmra.mxu2 %v3259_v27 }
 0x279   : > { %8381 = vst [vmem:[#allocation25_spill] sm:$0xff] %v7319_v9  ;;  %v5617_v9 = vld [vmem:[%s6590_s14 + $0x88] sm:$0xff] }
 0x27a   : > { %2885 = vmatpush.bf16.msrb.mxu3 %v5617_v9  ;;  %5920 = vpow2.f32 %v2966_v54 }
 0x27d   : > { %v2459_v36 = vpop.f32.mrf.mxu3  ;;  %v5919_v34 = vpop.eup %5918 }
 0x27e   : > { %3425 = vrot.lane.b32.xlu2 %v2459_v36, %s6120_s11  ;;  %v2989_v37 = vmul.f32 %v5919_v34, %v7224_v10  ;;  %v3209_v54 = vpop.f32.mrf.mxu0 }
 0x280   : > { %v7334_v15 = vpop.f32.mrf.mxu1  ;;  %v5921_v49 = vpop.eup %5920  ;;  %v3005_v7 = vsel %vm1543_vm12, %v2989_v37, 0.0 }
 0x281   : > { %8382 = vst [vmem:[#allocation26_spill] sm:$0xff] %v7334_v15  ;;  %v2990_v9 = vmul.f32 %v5921_v49, %v7224_v10  ;;  %v3232_v36 = vmul.f32 %v3207_v51, %v3005_v7  ;;  %v5616_v49 = vld [vmem:[%s6590_s14 + $0x80] sm:$0xff]  ;;  %v5606_v51 = vld [vmem:[%s6586_s17 + $0xb0] sm:$0xff]  ;;  %s6121_s14 = smov 48  }
 0x282   : > { %2886 = vmatpush.bf16.msrb.mxu3 %v5616_v49 }
 0x283   : > { %5228 = vmatmul.msk.bf16.gmra.mxu1 %vm1779_vm1, %v5605_v29  ;;  %v3006_v27 = vsel %vm1544_vm13, %v2990_v9, 0.0  ;;  %5409 = vst [vmem:[%s6592_s6 + $0x1d0] sm:$0xff] %v3232_v36  ;;  %v2940_v29 = vmul.f32 -0.0039138994, %v7034_v46 }
 0x284   : > { %v3233_v53 = vmul.f32 %v3209_v54, %v3006_v27 }
 0x285   : > { %v2461_v21 = vpop.f32.mrf.mxu3  ;;  %v2968_v37 = vmul.f32 1.442695, %v2940_v29 }
 0x286   : > { %3427 = vrot.lane.b32.xlu0 %v2461_v21, %s6120_s11  ;;  %5410 = vst [vmem:[%s6592_s6 + $0x1d8] sm:$0xff] %v3233_v53  ;;  %v3260_v34 = vpack.c.bf16 %v3233_v53, %v3232_v36  ;;  %5673 = vmatpush.bf16.msra.mxu3 %v7136_v44  ;;  %v2479_v53 = vmul.f32 -0.007843178, %v6711_v39 }
 0x287   : > { %5922 = vpow2.f32 %v2968_v37 }
 0x288   : > { %v7340_v30 = vpop.f32.mrf.mxu1  ;;  %3361 = vmatmul.bf16.gmra.mxu2 %v3260_v34  ;;  %v3212_v7 = vpop.f32.mrf.mxu0  ;;  %v2495_v37 = vmul.f32 1.442695, %v2479_v53 }
 0x289   : > { %8383 = vst [vmem:[#allocation27_spill] sm:$0xff] %v7340_v30  ;;  %v2941_v30 = vmul.f32 -0.0039138994, %v7060_v8 }
 0x28a   : > { %5674 = vmatpush.bf16.msra.mxu3 %v7184_v2 }
 0x28b   : > { %v2970_v15 = vmul.f32 1.442695, %v2941_v30 }
 0x28d   : > { %v2464_v21 = vpop.f32.mrf.mxu3  ;;  %5924 = vpow2.f32 %v2970_v15  ;;  %v5923_v36 = vpop.eup %5922 }
 0x28e   : > { %3429 = vrot.lane.b32.xlu1 %v2464_v21, %s6120_s11  ;;  %v2991_v30 = vmul.f32 %v5923_v36, %v7224_v10  ;;  %5675 = vmatpush.bf16.msra.mxu3 %v7195_v57  ;;  %v2527_v21 = vmul.f32 0.007843178, %v6713_v40  ;;  %v5607_v36 = vld [vmem:[%s6586_s17 + $0xb8] sm:$0xff]  ;;  %5926 = vpow2.f32 %v2495_v37 }
 0x290   : > { %v7356_v9 = vpop.f32.mrf.mxu1  ;;  %v3007_v15 = vsel %vm1545_vm14, %v2991_v30, 0.0  ;;  %v3214_v29 = vpop.f32.mrf.mxu0 }
 0x291   : > { %v3234_v34 = vmul.f32 %v3212_v7, %v3007_v15  ;;  %v2480_v7 = vmul.f32 -0.007843178, %v6730_v52  ;;  %v2481_v52 = vmul.f32 -0.007843178, %v6756_v6  ;;  %v2482_v6 = vmul.f32 -0.007843178, %v6786_v25 }
 0x292   : > { %5676 = vmatpush.bf16.msra.mxu3 %v7201_v41  ;;  %v2483_v25 = vmul.f32 -0.007843178, %v6814_v48 }
 0x293   : > { %5229 = vmatmul.msk.bf16.gmra.mxu1 %vm1779_vm1, %v5606_v51  ;;  %v5925_v27 = vpop.eup %5924  ;;  %5411 = vst [vmem:[%s6592_s6 + $0x1e0] sm:$0xff] %v3234_v34  ;;  %v2528_v51 = vmul.f32 1.442695, %v2527_v21  ;;  %v2497_v30 = vmul.f32 1.442695, %v2480_v7 }
 0x294   : > { %v2992_v2 = vmul.f32 %v5925_v27, %v7224_v10  ;;  %v5927_v27 = vpop.eup %5926 }
 0x295   : > { %v2466_v54 = vpop.f32.mrf.mxu3  ;;  %5928 = vpow2.f32 %v2528_v51 }
 0x296   : > { %3431 = vrot.lane.b32.xlu2 %v2466_v54, %s6120_s11  ;;  %v3008_v57 = vsel %vm8384_vm15, %v2992_v2, 0.0  ;;  %5677 = vmatpush.bf16.msra.mxu3 %v7209_v13  ;;  %5930 = vpow2.f32 %v2497_v30  ;;  %v2499_v2 = vmul.f32 1.442695, %v2481_v52 }
 0x297   : > { %v3235_v49 = vmul.f32 %v3214_v29, %v3008_v57 }
 0x298   : > { %v7363_v44 = vpop.f32.mrf.mxu1  ;;  %5932 = vpow2.f32 %v2499_v2 }
 0x299   : > { %5412 = vst [vmem:[%s6592_s6 + $0x1e8] sm:$0xff] %v3235_v49  ;;  %v3261_v54 = vpack.c.bf16 %v3235_v49, %v3234_v34 }
 0x29a   : > { %5678 = vmatpush.bf16.msra.mxu3 %v7217_v61 }
 0x29b   : > { %3366 = vmatmul.bf16.gmra.mxu2 %v3261_v54  ;;  %v7386_v53 = vpop.eup %5928 }
 0x29c   : > { %v2530_v15 = vmul.f32 %v7386_v53, %v5927_v27  ;;  %v5931_v21 = vpop.eup %5930 }
 0x29d   : > { %v2469_v39 = vpop.f32.mrf.mxu3  ;;  %v2531_v49 = vmul.f32 %v5931_v21, %v7386_v53 }
 0x29e   : > { %3433 = vrot.lane.b32.xlu0 %v2469_v39, %s6120_s11  ;;  %5679 = vmatpush.bf16.msra.mxu3 %v7222_v45  ;;  %v2546_v29 = vsel %vm1533_vm2, %v2530_v15, 0.0  ;;  %v5631_v45 = vld [vmem:[%s6586_s17 + $0xf8] sm:$0xff]  ;;  %v2501_v39 = vmul.f32 1.442695, %v2482_v6  ;;  %v5933_v37 = vpop.eup %5932  ;;  %v2484_v15 = vmul.f32 -0.007843178, %v6844_v17  ;;  %vm8385_vm2 = vmmov %vm8384_vm15 }
 0x29f   : > { %v2547_v11 = vsel %vm1534_vm3, %v2531_v49, 0.0  ;;  %vm8386_vm3 = vcmp.ge.s32.totalorder %v7167_v19, %v6771_v12  ;;  %s6122_s17 = smov 32  }
 0x2a0   : > { %v7380_v40 = vpop.f32.mrf.mxu1  ;;  %5934 = vpow2.f32 %v2501_v39  ;;  %v2505_v2 = vmul.f32 1.442695, %v2484_v15 }
 0x2a2   : > { %5680 = vmatpush.bf16.msra.mxu3 %v7233_v20 }
 0x2a3   : > { %5230 = vmatmul.msk.bf16.gmra.mxu1 %vm1779_vm1, %v5607_v36  ;;  %v2532_v36 = vmul.f32 %v5933_v37, %v7386_v53 }
 0x2a5   : > { %v2471_v41 = vpop.f32.mrf.mxu3  ;;  %v2548_v30 = vsel %vm1535_vm4, %v2532_v36, 0.0  ;;  %vm8387_vm4 = vmmov %vm8386_vm3 }
 0x2a6   : > { %3435 = vrot.lane.b32.xlu1 %v2471_v41, %s6120_s11  ;;  %v2503_v41 = vmul.f32 1.442695, %v2483_v25  ;;  %v5935_v27 = vpop.eup %5934 }
 0x2a8   : > { %v7389_v13 = vpop.f32.mrf.mxu1  ;;  %5936 = vpow2.f32 %v2503_v41  ;;  %v2487_v41 = vmul.f32 -0.007843178, %v6926_v58  ;;  %v2488_v58 = vmul.f32 -0.007843178, %v6952_v38 }
 0x2a9   : > { %5938 = vpow2.f32 %v2505_v2 }
 0x2ad   : > { %v2474_v61 = vpop.f32.mrf.mxu3 }
 0x2ae   : > { %3437 = vrot.lane.b32.xlu2 %v2474_v61, %s6120_s11  ;;  %v2533_v61 = vmul.f32 %v5935_v27, %v7386_v53 }
 0x2b0   : > { %v2733_v34 = vpop.f32.mrf.mxu1  ;;  %v2549_v60 = vsel %vm1536_vm5, %v2533_v61, 0.0  ;;  %vm3601_vm5 = vcmask 261120  }
 0x2b1   : > { %v2773_v57 = vmul.f32 %v2733_v34, %v2546_v29  ;;  %v5937_v29 = vpop.eup %5936  ;;  %v2485_v34 = vmul.f32 -0.007843178, %v6872_v50  ;;  %v2486_v50 = vmul.f32 -0.007843178, %v6901_v24 }
 0x2b2   : > { %v2534_v17 = vmul.f32 %v5937_v29, %v7386_v53 }
 0x2b3   : > { %5231 = vst [vmem:[%s6592_s6 + $0x100] sm:$0xff] %v2773_v57  ;;  %5398 = vmatmul.msk.bf16.vlgmr.msra.gmra.mxu1 %vm1779_vm1, %v5631_v45  ;;  %v2507_v49 = vmul.f32 1.442695, %v2485_v34  ;;  %v2489_v34 = vmul.f32 -0.007843178, %v6980_v14 }
 0x2b4   : > { %v2550_v26 = vsel %vm1537_vm6, %v2534_v17, 0.0  ;;  %v2490_v14 = vmul.f32 -0.007843178, %v7009_v1  ;;  %vm3618_vm6 = vcmask 392192  }
 0x2b5   : > { %v2476_v20 = vpop.f32.mrf.mxu3  ;;  %5940 = vpow2.f32 %v2507_v49 }
 0x2b6   : > { %3439 = vrot.lane.b32.xlu0 %v2476_v20, %s6120_s11  ;;  %v5939_v20 = vpop.eup %5938 }
 0x2b7   : > { %v2535_v37 = vmul.f32 %v5939_v20, %v7386_v53 }
 0x2b8   : > { %v2735_v51 = vpop.f32.mrf.mxu1  ;;  %v7516_v4 = vpop.permute.xlu2 %3417 }
 0x2b9   : > { %v2774_v54 = vmul.f32 %v2735_v51, %v2547_v11  ;;  %v2551_v25 = vsel %vm1538_vm7, %v2535_v37, 0.0  ;;  %vm3651_vm7 = vcmask 523264  }
 0x2bb   : > { %5232 = vst [vmem:[%s6592_s6 + $0x108] sm:$0xff] %v2774_v54  ;;  %v2806_v7 = vpack.c.bf16 %v2774_v54, %v2773_v57  ;;  %v3337_v48 = vpop.f32.mrf.mxu2  ;;  %v2509_v54 = vmul.f32 1.442695, %v2486_v50  ;;  %v5941_v62 = vpop.eup %5940  ;;  %v2517_v50 = vmul.f32 1.442695, %v2490_v14 }
 0x2bc   : > { %3537 = vrot.lane.b32.xlu2 %v3337_v48, %s6121_s14  ;;  %v2536_v24 = vmul.f32 %v5941_v62, %v7386_v53 }
 0x2bd   : > { %2887 = vmatmul.bf16.vlgmr.msrb.gmra.mxu3 %v2806_v7  ;;  %5942 = vpow2.f32 %v2509_v54 }
 0x2be   : > { %v2552_v35 = vsel %vm1539_vm8, %v2536_v24, 0.0 }
 0x2c0   : > { %v2738_v33 = vpop.f32.mrf.mxu1 }
 0x2c1   : > { %v2775_v52 = vmul.f32 %v2738_v33, %v2548_v30  ;;  %v2511_v33 = vmul.f32 1.442695, %v2487_v41 }
 0x2c3   : > { %5233 = vst [vmem:[%s6592_s6 + $0x110] sm:$0xff] %v2775_v52  ;;  %v3339_v57 = vpop.f32.mrf.mxu2  ;;  %5944 = vpow2.f32 %v2511_v33 }
 0x2c4   : > { %3539 = vrot.lane.b32.xlu0 %v3339_v57, %s6121_s14 }
 0x2c8   : > { %v2740_v21 = vpop.f32.mrf.mxu1 }
 0x2c9   : > { %v2776_v45 = vmul.f32 %v2740_v21, %v2549_v60  ;;  %v2513_v60 = vmul.f32 1.442695, %v2488_v58  ;;  %v2493_v58 = vmul.f32 -0.007843178, %v7088_v63 }
 0x2cb   : > { %5234 = vst [vmem:[%s6592_s6 + $0x118] sm:$0xff] %v2776_v45  ;;  %v2807_v6 = vpack.c.bf16 %v2776_v45, %v2775_v52  ;;  %v3342_v51 = vpop.f32.mrf.mxu2  ;;  %v5943_v52 = vpop.eup %5942  ;;  %5946 = vpow2.f32 %v2513_v60  ;;  %v2523_v60 = vmul.f32 1.442695, %v2493_v58 }
 0x2cc   : > { %3541 = vrot.lane.b32.xlu1 %v3342_v51, %s6121_s14  ;;  %v2537_v48 = vmul.f32 %v5943_v52, %v7386_v53  ;;  %v5945_v55 = vpop.eup %5944  ;;  %v7525_v58 = vpop.permute.xlu1 %3413 }
 0x2cd   : > { %2892 = vmatmul.bf16.gmra.mxu3 %v2807_v6  ;;  %v2538_v38 = vmul.f32 %v5945_v55, %v7386_v53  ;;  %v2515_v6 = vmul.f32 1.442695, %v2489_v34 }
 0x2ce   : > { %v2553_v29 = vsel %vm1540_vm9, %v2537_v48, 0.0 }
 0x2cf   : > { %v2554_v42 = vsel %vm1541_vm10, %v2538_v38, 0.0  ;;  %5948 = vpow2.f32 %v2515_v6 }
 0x2d0   : > { %v2743_v39 = vpop.f32.mrf.mxu1  ;;  %5950 = vpow2.f32 %v2517_v50 }
 0x2d1   : > { %v2777_v11 = vmul.f32 %v2743_v39, %v2550_v26  ;;  %v5947_v49 = vpop.eup %5946 }
 0x2d2   : > { %v2539_v39 = vmul.f32 %v5947_v49, %v7386_v53  ;;  %v2942_v49 = vmul.f32 -0.0039138994, %v7088_v63  ;;  %v2943_v63 = vmul.f32 -0.0039138994, %v7114_v0 }
 0x2d3   : > { %5235 = vst [vmem:[%s6592_s6 + $0x120] sm:$0xff] %v2777_v11  ;;  %v3344_v30 = vpop.f32.mrf.mxu2 }
 0x2d4   : > { %3543 = vrot.lane.b32.xlu2 %v3344_v30, %s6121_s14  ;;  %v2555_v37 = vsel %vm1542_vm11, %v2539_v39, 0.0  ;;  %v2972_v39 = vmul.f32 1.442695, %v2942_v49 }
 0x2d5   : > { %v5949_v32 = vpop.eup %5948 }
 0x2d6   : > { %v2540_v1 = vmul.f32 %v5949_v32, %v7386_v53  ;;  %v5951_v41 = vpop.eup %5950 }
 0x2d8   : > { %v2745_v36 = vpop.f32.mrf.mxu1  ;;  %v2556_v5 = vsel %vm1543_vm12, %v2540_v1, 0.0 }
 0x2d9   : > { %v2778_v7 = vmul.f32 %v2745_v36, %v2551_v25  ;;  %v2491_v25 = vmul.f32 -0.007843178, %v7034_v46  ;;  %v2492_v46 = vmul.f32 -0.007843178, %v7060_v8 }
 0x2db   : > { %5236 = vst [vmem:[%s6592_s6 + $0x128] sm:$0xff] %v2778_v7  ;;  %v2808_v27 = vpack.c.bf16 %v2778_v7, %v2777_v11  ;;  %v3347_v2 = vpop.f32.mrf.mxu2  ;;  %v2519_v7 = vmul.f32 1.442695, %v2491_v25 }
 0x2dc   : > { %3545 = vrot.lane.b32.xlu0 %v3347_v2, %s6121_s14 }
 0x2dd   : > { %2897 = vmatmul.bf16.gmra.mxu3 %v2808_v27  ;;  %5952 = vpow2.f32 %v2519_v7  ;;  %v2541_v27 = vmul.f32 %v5951_v41, %v7386_v53 }
 0x2df   : > { %v2557_v52 = vsel %vm1544_vm13, %v2541_v27, 0.0 }
 0x2e0   : > { %v2748_v15 = vpop.f32.mrf.mxu1 }
 0x2e1   : > { %v2779_v61 = vmul.f32 %v2748_v15, %v2552_v35  ;;  %v2521_v35 = vmul.f32 1.442695, %v2492_v46 }
 0x2e3   : > { %5237 = vst [vmem:[%s6592_s6 + $0x130] sm:$0xff] %v2779_v61  ;;  %v3349_v17 = vpop.f32.mrf.mxu2  ;;  %v5953_v56 = vpop.eup %5952  ;;  %5954 = vpow2.f32 %v2521_v35 }
 0x2e4   : > { %3547 = vrot.lane.b32.xlu1 %v3349_v17, %s6121_s14  ;;  %v2542_v8 = vmul.f32 %v5953_v56, %v7386_v53  ;;  %5956 = vpow2.f32 %v2523_v60  ;;  %v3410_v60 = vpop.permute.xlu0 %3409 }
 0x2e6   : > { %v2558_v47 = vsel %vm1545_vm14, %v2542_v8, 0.0 }
 0x2e8   : > { %v2750_v21 = vpop.f32.mrf.mxu1 }
 0x2e9   : > { %v2780_v45 = vmul.f32 %v2750_v21, %v2553_v29  ;;  %v5955_v29 = vpop.eup %5954 }
 0x2ea   : > { %v2543_v34 = vmul.f32 %v5955_v29, %v7386_v53  ;;  %v5957_v59 = vpop.eup %5956 }
 0x2eb   : > { %5238 = vst [vmem:[%s6592_s6 + $0x138] sm:$0xff] %v2780_v45  ;;  %v2809_v57 = vpack.c.bf16 %v2780_v45, %v2779_v61  ;;  %v3352_v11 = vpop.f32.mrf.mxu2  ;;  %v2494_v45 = vmul.f32 -0.007843178, %v7114_v0 }
 0x2ec   : > { %3549 = vrot.lane.b32.xlu2 %v3352_v11, %s6121_s14 }
 0x2ed   : > { %2902 = vmatmul.bf16.gmra.mxu3 %v2809_v57  ;;  %v2525_v17 = vmul.f32 1.442695, %v2494_v45  ;;  %v2559_v57 = vsel %vm8385_vm2, %v2543_v34, 0.0  ;;  %v3412_v45 = vpop.permute.xlu0 %3411 }
 0x2ef   : > { %5958 = vpow2.f32 %v2525_v17 }
 0x2f0   : > { %v2753_v26 = vpop.f32.mrf.mxu1  ;;  %5960 = vpow2.f32 %v2972_v39 }
 0x2f1   : > { %v2781_v20 = vmul.f32 %v2753_v26, %v2554_v42  ;;  %v2544_v26 = vmul.f32 %v5957_v59, %v7386_v53 }
 0x2f3   : > { %5239 = vst [vmem:[%s6592_s6 + $0x140] sm:$0xff] %v2781_v20  ;;  %v3354_v62 = vpop.f32.mrf.mxu2  ;;  %v2560_v16 = vsel %vm1547_vm0, %v2544_v26, 0.0 }
 0x2f4   : > { %3551 = vrot.lane.b32.xlu0 %v3354_v62, %s6121_s14 }
 0x2f5   : > { %v5959_v11 = vpop.eup %5958 }
 0x2f6   : > { %v2545_v32 = vmul.f32 %v5959_v11, %v7386_v53  ;;  %v5961_v1 = vpop.eup %5960 }
 0x2f7   : > { %v2993_v7 = vmul.f32 %v5961_v1, %v7224_v10  ;;  %v3378_v1 = vld [vmem:[#allocation2 + $0x8] sm:$0xff] }
 0x2f8   : > { %v2755_v51 = vpop.f32.mrf.mxu1  ;;  %v2561_v25 = vsel %vm8386_vm3, %v2545_v32, 0.0 }
 0x2f9   : > { %v2782_v54 = vmul.f32 %v2755_v51, %v2555_v37  ;;  %v3009_v53 = vsel %vm1547_vm0, %v2993_v7, 0.0 }
 0x2fb   : > { %5240 = vst [vmem:[%s6592_s6 + $0x148] sm:$0xff] %v2782_v54  ;;  %v2810_v36 = vpack.c.bf16 %v2782_v54, %v2781_v20  ;;  %v3357_v33 = vpop.f32.mrf.mxu2  ;;  %v2974_v54 = vmul.f32 1.442695, %v2943_v63 }
 0x2fc   : > { %3553 = vrot.lane.b32.xlu1 %v3357_v33, %s6121_s14 }
 0x2fd   : > { %2907 = vmatmul.bf16.gmra.mxu3 %v2810_v36  ;;  %5962 = vpow2.f32 %v2974_v54 }
 0x300   : > { %v2758_v24 = vpop.f32.mrf.mxu1 }
 0x301   : > { %v2783_v30 = vmul.f32 %v2758_v24, %v2556_v5 }
 0x303   : > { %5241 = vst [vmem:[%s6592_s6 + $0x150] sm:$0xff] %v2783_v30  ;;  %v3359_v48 = vpop.f32.mrf.mxu2  ;;  %v5963_v5 = vpop.eup %5962 }
 0x304   : > { %3555 = vrot.lane.b32.xlu2 %v3359_v48, %s6121_s14 }
 0x308   : > { %v2760_v15 = vpop.f32.mrf.mxu1 }
 0x309   : > { %v2784_v61 = vmul.f32 %v2760_v15, %v2557_v52  ;;  %v7519_v15 = vpop.permute.xlu2 %3419 }
 0x30b   : > { %5242 = vst [vmem:[%s6592_s6 + $0x158] sm:$0xff] %v2784_v61  ;;  %v2811_v2 = vpack.c.bf16 %v2784_v61, %v2783_v30  ;;  %v3362_v38 = vpop.f32.mrf.mxu2  ;;  %v2994_v30 = vmul.f32 %v5963_v5, %v7224_v10 }
 0x30c   : > { %3557 = vrot.lane.b32.xlu0 %v3362_v38, %s6121_s14 }
 0x30d   : > { %2912 = vmatmul.bf16.gmra.mxu3 %v2811_v2  ;;  %v3010_v46 = vsel %vm8387_vm4, %v2994_v30, 0.0 }
 0x310   : > { %v2763_v55 = vpop.f32.mrf.mxu1 }
 0x311   : > { %v2785_v21 = vmul.f32 %v2763_v55, %v2558_v47  ;;  %v7522_v19 = vpop.permute.xlu2 %3425  ;;  %v7533_v47 = vpop.permute.xlu1 %3415 }
 0x313   : > { %5243 = vst [vmem:[%s6592_s6 + $0x160] sm:$0xff] %v2785_v21  ;;  %v3364_v20 = vpop.f32.mrf.mxu2 }
 0x314   : > { %3559 = vrot.lane.b32.xlu1 %v3364_v20, %s6121_s14 }
 0x318   : > { %v2765_v6 = vpop.f32.mrf.mxu1 }
 0x319   : > { %v2786_v42 = vmul.f32 %v2765_v6, %v2559_v57  ;;  %v7527_v8 = vpop.permute.xlu2 %3431  ;;  %v7543_v57 = vpop.permute.xlu0 %3421 }
 0x31b   : > { %5244 = vst [vmem:[%s6592_s6 + $0x168] sm:$0xff] %v2786_v42  ;;  %v2812_v14 = vpack.c.bf16 %v2786_v42, %v2785_v21  ;;  %v7536_v21 = vpop.permute.xlu1 %3423 }
 0x31d   : > { %2917 = vmatmul.bf16.gmra.mxu3 %v2812_v14 }
 0x31e   : > { %v3367_v51 = vpop.f32.mrf.mxu2 }
 0x31f   : > { %3561 = vrot.lane.b32.xlu2 %v3367_v51, %s6121_s14 }
 0x320   : > { %v2768_v50 = vpop.f32.mrf.mxu1 }
 0x321   : > { %v2787_v37 = vmul.f32 %v2768_v50, %v2560_v16  ;;  %v7530_v2 = vpop.permute.xlu2 %3437  ;;  %v7548_v42 = vpop.permute.xlu0 %3427 }
 0x323   : > { %5245 = vst [vmem:[%s6592_s6 + $0x170] sm:$0xff] %v2787_v37  ;;  %v7539_v38 = vpop.permute.xlu1 %3429 }
 0x328   : > { %v2770_v62 = vpop.f32.mrf.mxu1 }
 0x329   : > { %v2788_v36 = vmul.f32 %v2770_v62, %v2561_v25  ;;  %v3538_v55 = vpop.permute.xlu2 %3537  ;;  %v7553_v14 = vpop.permute.xlu0 %3433  ;;  %v3586_v25 = vsel %vm1779_vm1, %v7229_v22, %v3412_v45  ;;  %v3585_v22 = vsel %vm1779_vm1, %v7214_v3, %v3410_v60  ;;  %v3589_v3 = vsel %vm1779_vm1, %v7271_v28, %v7516_v4 }
 0x32b   : > { %5246 = vst [vmem:[%s6592_s6 + $0x178] sm:$0xff] %v2788_v36  ;;  %v2813_v0 = vpack.c.bf16 %v2788_v36, %v2787_v37  ;;  %v7546_v6 = vpop.permute.xlu1 %3435 }
 0x32d   : > { %2922 = vmatmul.bf16.gmra.mxu3 %v2813_v0 }
 0x330   : > { %v3217_v41 = vpop.f32.mrf.mxu1 }
 0x331   : > { %v3236_v24 = vmul.f32 %v3217_v41, %v3009_v53  ;;  %v7541_v17 = vpop.permute.xlu2 %3543  ;;  %v7558_v11 = vpop.permute.xlu0 %3439 }
 0x333   : > { %5413 = vst [vmem:[%s6592_s6 + $0x1f0] sm:$0xff] %v3236_v24 }
 0x338   : > { %v3219_v27 = vpop.f32.mrf.mxu1 }
 0x339   : > { %v3237_v33 = vmul.f32 %v3219_v27, %v3010_v46  ;;  %v3540_v32 = vpop.permute.xlu0 %3539  ;;  %v3377_v46 = vld [vmem:[#allocation2] sm:$0xff] }
 0x33b   : > { %5414 = vst [vmem:[%s6592_s6 + $0x1f8] sm:$0xff] %v3237_v33  ;;  %v3262_v35 = vpack.c.bf16 %v3237_v33, %v3236_v24 }
 0x33d   : > { %3371 = vmatmul.bf16.vlgmr.msra.gmra.mxu3 %v3262_v35 }
 0x33e   : > { %v3542_v20 = vpop.permute.xlu1 %3541 }
 0x340   : > { %v2888_v52 = vpop.f32.mrf.mxu3 }
 0x341   : > { %3473 = vrot.lane.b32.xlu1 %v2888_v52, %s6122_s17 }
 0x346   : > { %v7550_v49 = vpop.permute.xlu2 %3549 }
 0x348   : > { %v2890_v56 = vpop.f32.mrf.mxu3 }
 0x349   : > { %3475 = vrot.lane.b32.xlu2 %v2890_v56, %s6122_s17  ;;  %v3369_v56 = vpop.f32.mrf.mxu2 }
 0x34e   : > { %v3546_v0 = vpop.permute.xlu0 %3545 }
 0x350   : > { %v2893_v10 = vpop.f32.mrf.mxu3 }
 0x351   : > { %3477 = vrot.lane.b32.xlu0 %v2893_v10, %s6122_s17 }
 0x356   : > { %v7560_v50 = vpop.permute.xlu1 %3547 }
 0x358   : > { %v2895_v12 = vpop.f32.mrf.mxu3 }
 0x359   : > { %3479 = vrot.lane.b32.xlu1 %v2895_v12, %s6122_s17 }
 0x35e   : > { %v7555_v39 = vpop.permute.xlu2 %3555 }
 0x360   : > { %v2898_v61 = vpop.f32.mrf.mxu3 }
 0x361   : > { %3481 = vrot.lane.b32.xlu2 %v2898_v61, %s6122_s17  ;;  %v3381_v61 = vld [vmem:[#allocation2 + $0x20] sm:$0xff] }
 0x366   : > { %v3552_v24 = vpop.permute.xlu0 %3551 }
 0x368   : > { %v2900_v48 = vpop.f32.mrf.mxu3 }
 0x369   : > { %3483 = vrot.lane.b32.xlu0 %v2900_v48, %s6122_s17 }
 0x36e   : > { %v7565_v51 = vpop.permute.xlu1 %3553 }
 0x370   : > { %v2903_v29 = vpop.f32.mrf.mxu3 }
 0x371   : > { %3485 = vrot.lane.b32.xlu1 %v2903_v29, %s6122_s17 }
 0x378   : > { %v2905_v34 = vpop.f32.mrf.mxu3 }
 0x379   : > { %3487 = vrot.lane.b32.xlu2 %v2905_v34, %s6122_s17  ;;  %v7563_v63 = vpop.permute.xlu2 %3561  ;;  %v3587_v34 = vsel %vm1779_vm1, %v7250_v43, %v7525_v58 }
 0x37e   : > { %v3558_v12 = vpop.permute.xlu0 %3557 }
 0x380   : > { %v2908_v59 = vpop.f32.mrf.mxu3 }
 0x381   : > { %3489 = vrot.lane.b32.xlu0 %v2908_v59, %s6122_s17  ;;  %v3379_v59 = vld [vmem:[#allocation2 + $0x10] sm:$0xff] }
 0x386   : > { %v7574_v41 = vpop.permute.xlu1 %3559 }
 0x388   : > { %v2910_v26 = vpop.f32.mrf.mxu3 }
 0x389   : > { %3491 = vrot.lane.b32.xlu1 %v2910_v26, %s6122_s17 }
 0x390   : > { %v2913_v16 = vpop.f32.mrf.mxu3 }
 0x391   : > { %3493 = vrot.lane.b32.xlu2 %v2913_v16, %s6122_s17 }
 0x398   : > { %v2915_v37 = vpop.f32.mrf.mxu3 }
 0x399   : > { %3495 = vrot.lane.b32.xlu0 %v2915_v37, %s6122_s17 }
 0x3a0   : > { %v2918_v54 = vpop.f32.mrf.mxu3 }
 0x3a1   : > { %3497 = vrot.lane.b32.xlu1 %v2918_v54, %s6122_s17  ;;  %v3380_v54 = vld [vmem:[#allocation2 + $0x18] sm:$0xff] }
 0x3a3   : > { %v3476_v62 = vpop.permute.xlu2 %3475 }
 0x3a4   : > { %v3603_v36 = vsel %vm3601_vm5, %v3586_v25, %v3476_v62  ;;  %v3384_v62 = vld [vmem:[#allocation2 + $0x38] sm:$0xff] }
 0x3a5   : > { %v3620_v7 = vsel %vm3618_vm6, %v3603_v36, %v3540_v32  ;;  %v3588_v32 = vsel %vm1779_vm1, %v7256_v23, %v7533_v47 }
 0x3a6   : > { %v3636_v53 = vadd.f32 %v3620_v7, %v3378_v1 }
 0x3a8   : > { %3653 = vst.msk [vmem:[#allocation2 + $0x8] sm:$0xff] %vm3651_vm7, %v3636_v53  ;;  %v2920_v5 = vpop.f32.mrf.mxu3 }
 0x3a9   : > { %3499 = vrot.lane.b32.xlu2 %v2920_v5, %s6122_s17 }
 0x3b0   : > { %v2923_v30 = vpop.f32.mrf.mxu3 }
 0x3b1   : > { %3501 = vrot.lane.b32.xlu0 %v2923_v30, %s6122_s17  ;;  %v8388_v30 = vld [vmem:[#allocation23_spill] sm:$0xff] }
 0x3b3   : > { %v3474_v27 = vpop.permute.xlu1 %3473 }
 0x3b4   : > { %v3602_v33 = vsel %vm3601_vm5, %v3585_v22, %v3474_v27  ;;  %v3383_v22 = vld [vmem:[#allocation2 + $0x30] sm:$0xff] }
 0x3b5   : > { %v3619_v35 = vsel %vm3618_vm6, %v3602_v33, %v3538_v55  ;;  %v8389_v33 = vld [vmem:[#allocation26_spill] sm:$0xff] }
 0x3b6   : > { %v3635_v52 = vadd.f32 %v3619_v35, %v3377_v46  ;;  %v3387_v35 = vld [vmem:[#allocation2 + $0x50] sm:$0xff] }
 0x3b8   : > { %3652 = vst.msk [vmem:[#allocation2] sm:$0xff] %vm3651_vm7, %v3635_v52  ;;  %v2925_v10 = vpop.f32.mrf.mxu3 }
 0x3b9   : > { %3563 = vrot.lane.b32.xlu0 %v3369_v56, %s6121_s14  ;;  %3503 = vrot.lane.b32.xlu1 %v2925_v10, %s6122_s17 }
 0x3bb   : > { %v3482_v48 = vpop.permute.xlu2 %3481 }
 0x3bc   : > { %v3606_v60 = vsel %vm3601_vm5, %v3589_v3, %v3482_v48  ;;  %v8390_v3 = vld [vmem:[#allocation24_spill] sm:$0xff] }
 0x3bd   : > { %v3623_v29 = vsel %vm3618_vm6, %v3606_v60, %v3546_v0  ;;  %v3382_v0 = vld [vmem:[#allocation2 + $0x28] sm:$0xff] }
 0x3be   : > { %v3639_v55 = vadd.f32 %v3623_v29, %v3381_v61  ;;  %v3385_v61 = vld [vmem:[#allocation2 + $0x40] sm:$0xff] }
 0x3c0   : > { %3656 = vst.msk [vmem:[#allocation2 + $0x20] sm:$0xff] %vm3651_vm7, %v3639_v55  ;;  %v3372_v45 = vpop.f32.mrf.mxu3  ;;  %v8391_v55 = vld [vmem:[#allocation25_spill] sm:$0xff] }
 0x3c1   : > { %3565 = vrot.lane.b32.xlu1 %v3372_v45, %s6121_s14  ;;  %v3386_v45 = vld [vmem:[#allocation2 + $0x48] sm:$0xff] }
 0x3c3   : > { %v3478_v26 = vpop.permute.xlu0 %3477 }
 0x3c4   : > { %v3604_v28 = vsel %vm3601_vm5, %v3587_v34, %v3478_v26 }
 0x3c5   : > { %v3621_v4 = vsel %vm3618_vm6, %v3604_v28, %v3542_v20  ;;  %v3592_v20 = vsel %vm1779_vm1, %v7298_v31, %v7536_v21  ;;  %v8392_v28 = vld [vmem:[#allocation27_spill] sm:$0xff] }
 0x3c6   : > { %v3637_v16 = vadd.f32 %v3621_v4, %v3379_v59  ;;  %v3388_v4 = vld [vmem:[#allocation2 + $0x58] sm:$0xff] }
 0x3c8   : > { %3654 = vst.msk [vmem:[#allocation2 + $0x10] sm:$0xff] %vm3651_vm7, %v3637_v16  ;;  %v3374_v37 = vpop.f32.mrf.mxu3 }
 0x3c9   : > { %3567 = vrot.lane.b32.xlu2 %v3374_v37, %s6121_s14 }
 0x3cb   : > { %v3480_v25 = vpop.permute.xlu1 %3479 }
 0x3cc   : > { %v3605_v43 = vsel %vm3601_vm5, %v3588_v32, %v3480_v25 }
 0x3cd   : > { %v3622_v58 = vsel %vm3618_vm6, %v3605_v43, %v7541_v17  ;;  %v3590_v17 = vsel %vm1779_vm1, %v7277_v18, %v7519_v15 }
 0x3ce   : > { %v3638_v1 = vadd.f32 %v3622_v58, %v3380_v54  ;;  %v3389_v54 = vld [vmem:[#allocation2 + $0x60] sm:$0xff] }
 0x3d0   : > { %3655 = vst.msk [vmem:[#allocation2 + $0x18] sm:$0xff] %vm3651_vm7, %v3638_v1 }
 0x3d3   : > { %v3488_v36 = vpop.permute.xlu2 %3487 }
 0x3d4   : > { %v3609_v7 = vsel %vm3601_vm5, %v3592_v20, %v3488_v36 }
 0x3d5   : > { %v3626_v23 = vsel %vm3618_vm6, %v3609_v7, %v3552_v24  ;;  %v3591_v24 = vsel %vm1779_vm1, %v8388_v30, %v7543_v57  ;;  %v3392_v7 = vld [vmem:[#allocation2 + $0x78] sm:$0xff] }
 0x3d6   : > { %v3642_v47 = vadd.f32 %v3626_v23, %v3384_v62  ;;  %v3390_v62 = vld [vmem:[#allocation2 + $0x68] sm:$0xff] }
 0x3d8   : > { %3659 = vst.msk [vmem:[#allocation2 + $0x38] sm:$0xff] %vm3651_vm7, %v3642_v47 }
 0x3db   : > { %v3484_v53 = vpop.permute.xlu0 %3483 }
 0x3dc   : > { %v3607_v5 = vsel %vm3601_vm5, %v3590_v17, %v3484_v53 }
 0x3dd   : > { %v3624_v31 = vsel %vm3618_vm6, %v3607_v5, %v7560_v50  ;;  %v3595_v50 = vsel %vm1779_vm1, %v8389_v33, %v7539_v38 }
 0x3de   : > { %v3640_v21 = vadd.f32 %v3624_v31, %v3382_v0 }
 0x3e0   : > { %3657 = vst.msk [vmem:[#allocation2 + $0x28] sm:$0xff] %vm3651_vm7, %v3640_v21 }
 0x3e3   : > { %v3486_v46 = vpop.permute.xlu1 %3485 }
 0x3e4   : > { %v3608_v27 = vsel %vm3601_vm5, %v3591_v24, %v3486_v46 }
 0x3e5   : > { %v3625_v18 = vsel %vm3618_vm6, %v3608_v27, %v7550_v49  ;;  %v3593_v49 = vsel %vm1779_vm1, %v8390_v3, %v7522_v19 }
 0x3e6   : > { %v3641_v15 = vadd.f32 %v3625_v18, %v3383_v22 }
 0x3e8   : > { %3658 = vst.msk [vmem:[#allocation2 + $0x30] sm:$0xff] %vm3651_vm7, %v3641_v15 }
 0x3eb   : > { %v3494_v52 = vpop.permute.xlu2 %3493 }
 0x3ec   : > { %v3612_v56 = vsel %vm3601_vm5, %v3595_v50, %v3494_v52 }
 0x3ed   : > { %v3629_v57 = vsel %vm3618_vm6, %v3612_v56, %v3558_v12  ;;  %v3594_v12 = vsel %vm1779_vm1, %v8391_v55, %v7548_v42 }
 0x3ee   : > { %v3645_v10 = vadd.f32 %v3629_v57, %v3387_v35 }
 0x3f0   : > { %3662 = vst.msk [vmem:[#allocation2 + $0x50] sm:$0xff] %vm3651_vm7, %v3645_v10 }
 0x3f3   : > { %v3490_v48 = vpop.permute.xlu0 %3489 }
 0x3f4   : > { %v3610_v60 = vsel %vm3601_vm5, %v3593_v49, %v3490_v48 }
 0x3f5   : > { %v3627_v38 = vsel %vm3618_vm6, %v3610_v60, %v7565_v51  ;;  %v3596_v51 = vsel %vm1779_vm1, %v8392_v28, %v7527_v8 }
 0x3f6   : > { %v3643_v29 = vadd.f32 %v3627_v38, %v3385_v61 }
 0x3f8   : > { %3660 = vst.msk [vmem:[#allocation2 + $0x40] sm:$0xff] %vm3651_vm7, %v3643_v29 }
 0x3fb   : > { %v3492_v34 = vpop.permute.xlu1 %3491 }
 0x3fc   : > { %v3611_v59 = vsel %vm3601_vm5, %v3594_v12, %v3492_v34 }
 0x3fd   : > { %v3628_v19 = vsel %vm3618_vm6, %v3611_v59, %v7555_v39  ;;  %v3597_v39 = vsel %vm1779_vm1, %v7356_v9, %v7553_v14  ;;  %v3600_v9 = vsel %vm1779_vm1, %v7389_v13, %v7558_v11  ;;  %v3391_v13 = vld [vmem:[#allocation2 + $0x70] sm:$0xff] }
 0x3fe   : > { %v3644_v26 = vadd.f32 %v3628_v19, %v3386_v45 }
 0x400   : > { %3661 = vst.msk [vmem:[#allocation2 + $0x48] sm:$0xff] %vm3651_vm7, %v3644_v26 }
 0x403   : > { %v3500_v20 = vpop.permute.xlu2 %3499 }
 0x40b   : > { %v3496_v16 = vpop.permute.xlu0 %3495 }
 0x40c   : > { %v3613_v37 = vsel %vm3601_vm5, %v3596_v51, %v3496_v16 }
 0x40d   : > { %v3630_v42 = vsel %vm3618_vm6, %v3613_v37, %v7574_v41  ;;  %v3598_v41 = vsel %vm1779_vm1, %v7363_v44, %v7546_v6  ;;  %v3599_v44 = vsel %vm1779_vm1, %v7380_v40, %v7530_v2 }
 0x40e   : > { %v3646_v32 = vadd.f32 %v3630_v42, %v3388_v4  ;;  %v3615_v14 = vsel %vm3601_vm5, %v3598_v41, %v3500_v20 }
 0x410   : > { %3663 = vst.msk [vmem:[#allocation2 + $0x58] sm:$0xff] %vm3651_vm7, %v3646_v32 }
 0x413   : > { %v3498_v25 = vpop.permute.xlu1 %3497 }
 0x414   : > { %v3614_v43 = vsel %vm3601_vm5, %v3597_v39, %v3498_v25 }
 0x415   : > { %v3631_v8 = vsel %vm3618_vm6, %v3614_v43, %v7563_v63 }
 0x416   : > { %v3647_v58 = vadd.f32 %v3631_v8, %v3389_v54 }
 0x418   : > { %3664 = vst.msk [vmem:[#allocation2 + $0x60] sm:$0xff] %vm3651_vm7, %v3647_v58 }
 0x423   : > { %v3502_v1 = vpop.permute.xlu0 %3501  ;;  %v3568_v63 = vpop.permute.xlu2 %3567 }
 0x424   : > { %v3616_v6 = vsel %vm3601_vm5, %v3599_v44, %v3502_v1 }
 0x42b   : > { %v3564_v36 = vpop.permute.xlu0 %3563  ;;  %v3504_v23 = vpop.permute.xlu1 %3503 }
 0x42c   : > { %v3632_v47 = vsel %vm3618_vm6, %v3615_v14, %v3564_v36  ;;  %v3617_v17 = vsel %vm3601_vm5, %v3600_v9, %v3504_v23 }
 0x42d   : > { %v3648_v0 = vadd.f32 %v3632_v47, %v3390_v62  ;;  %v3634_v53 = vsel %vm3618_vm6, %v3617_v17, %v3568_v63 }
 0x42e   : > { %v3650_v5 = vadd.f32 %v3634_v53, %v3392_v7 }
 0x42f   : > { %3665 = vst.msk [vmem:[#allocation2 + $0x68] sm:$0xff] %vm3651_vm7, %v3648_v0 }
 0x430   : > { %3667 = vst.msk [vmem:[#allocation2 + $0x78] sm:$0xff] %vm3651_vm7, %v3650_v5 }
 0x433   : > { %v3566_v11 = vpop.permute.xlu1 %3565 }
 0x434   : > { %v3633_v31 = vsel %vm3618_vm6, %v3616_v6, %v3566_v11 }
 0x435   : > { %v3649_v21 = vadd.f32 %v3633_v31, %v3391_v13 }
 0x437   : > { %3666 = vst.msk [vmem:[#allocation2 + $0x70] sm:$0xff] %vm3651_vm7, %v3649_v21 }
 0x438 PF: > { %p5463_p12 = scmp.le.s32.totalorder %s6574_s2, %s1490_s1 }
 0x43a   : > { %3671 = sbr.rel (%p5463_p12) target bundleno = 1152 (0x480), region = 203 }
 0x43f   : > { %v6123_v30 = vmov 0.0  }
 0x440   : > { %3672 = vst [vmem:[%s6592_s6] sm:$0xff] %v6123_v30 }
 0x441   : > { %3673 = vst [vmem:[%s6592_s6 + $0x8] sm:$0xff] %v6123_v30 }
 0x442   : > { %3674 = vst [vmem:[%s6592_s6 + $0x10] sm:$0xff] %v6123_v30 }
 0x443   : > { %3675 = vst [vmem:[%s6592_s6 + $0x18] sm:$0xff] %v6123_v30 }
 0x444   : > { %3676 = vst [vmem:[%s6592_s6 + $0x20] sm:$0xff] %v6123_v30 }
 0x445   : > { %3677 = vst [vmem:[%s6592_s6 + $0x28] sm:$0xff] %v6123_v30 }
 0x446   : > { %3678 = vst [vmem:[%s6592_s6 + $0x30] sm:$0xff] %v6123_v30 }
 0x447   : > { %3679 = vst [vmem:[%s6592_s6 + $0x38] sm:$0xff] %v6123_v30 }
 0x448   : > { %3680 = vst [vmem:[%s6592_s6 + $0x40] sm:$0xff] %v6123_v30 }
 0x449   : > { %3681 = vst [vmem:[%s6592_s6 + $0x48] sm:$0xff] %v6123_v30 }
 0x44a   : > { %3682 = vst [vmem:[%s6592_s6 + $0x50] sm:$0xff] %v6123_v30 }
 0x44b   : > { %3683 = vst [vmem:[%s6592_s6 + $0x58] sm:$0xff] %v6123_v30 }
 0x44c   : > { %3684 = vst [vmem:[%s6592_s6 + $0x60] sm:$0xff] %v6123_v30 }
 0x44d   : > { %3685 = vst [vmem:[%s6592_s6 + $0x68] sm:$0xff] %v6123_v30 }
 0x44e   : > { %3686 = vst [vmem:[%s6592_s6 + $0x70] sm:$0xff] %v6123_v30 }
 0x44f   : > { %3687 = vst [vmem:[%s6592_s6 + $0x78] sm:$0xff] %v6123_v30 }
 0x450   : > { %3688 = vst [vmem:[%s6592_s6 + $0x80] sm:$0xff] %v6123_v30 }
 0x451   : > { %3689 = vst [vmem:[%s6592_s6 + $0x88] sm:$0xff] %v6123_v30 }
 0x452   : > { %3690 = vst [vmem:[%s6592_s6 + $0x90] sm:$0xff] %v6123_v30 }
 0x453   : > { %3691 = vst [vmem:[%s6592_s6 + $0x98] sm:$0xff] %v6123_v30 }
 0x454   : > { %3692 = vst [vmem:[%s6592_s6 + $0xa0] sm:$0xff] %v6123_v30 }
 0x455   : > { %3693 = vst [vmem:[%s6592_s6 + $0xa8] sm:$0xff] %v6123_v30 }
 0x456   : > { %3694 = vst [vmem:[%s6592_s6 + $0xb0] sm:$0xff] %v6123_v30 }
 0x457   : > { %3695 = vst [vmem:[%s6592_s6 + $0xb8] sm:$0xff] %v6123_v30 }
 0x458   : > { %3696 = vst [vmem:[%s6592_s6 + $0xc0] sm:$0xff] %v6123_v30 }
 0x459   : > { %3697 = vst [vmem:[%s6592_s6 + $0xc8] sm:$0xff] %v6123_v30 }
 0x45a   : > { %3698 = vst [vmem:[%s6592_s6 + $0xd0] sm:$0xff] %v6123_v30 }
 0x45b   : > { %3699 = vst [vmem:[%s6592_s6 + $0xd8] sm:$0xff] %v6123_v30 }
 0x45c   : > { %3700 = vst [vmem:[%s6592_s6 + $0xe0] sm:$0xff] %v6123_v30 }
 0x45d   : > { %3701 = vst [vmem:[%s6592_s6 + $0xe8] sm:$0xff] %v6123_v30 }
 0x45e   : > { %3702 = vst [vmem:[%s6592_s6 + $0xf0] sm:$0xff] %v6123_v30 }
 0x45f   : > { %3703 = vst [vmem:[%s6592_s6 + $0xf8] sm:$0xff] %v6123_v30 }
 0x460   : > { %3704 = vst [vmem:[%s6592_s6 + $0x100] sm:$0xff] %v6123_v30 }
 0x461   : > { %3705 = vst [vmem:[%s6592_s6 + $0x108] sm:$0xff] %v6123_v30 }
 0x462   : > { %3706 = vst [vmem:[%s6592_s6 + $0x110] sm:$0xff] %v6123_v30 }
 0x463   : > { %3707 = vst [vmem:[%s6592_s6 + $0x118] sm:$0xff] %v6123_v30 }
 0x464   : > { %3708 = vst [vmem:[%s6592_s6 + $0x120] sm:$0xff] %v6123_v30 }
 0x465   : > { %3709 = vst [vmem:[%s6592_s6 + $0x128] sm:$0xff] %v6123_v30 }
 0x466   : > { %3710 = vst [vmem:[%s6592_s6 + $0x130] sm:$0xff] %v6123_v30 }
 0x467   : > { %3711 = vst [vmem:[%s6592_s6 + $0x138] sm:$0xff] %v6123_v30 }
 0x468   : > { %3712 = vst [vmem:[%s6592_s6 + $0x140] sm:$0xff] %v6123_v30 }
 0x469   : > { %3713 = vst [vmem:[%s6592_s6 + $0x148] sm:$0xff] %v6123_v30 }
 0x46a   : > { %3714 = vst [vmem:[%s6592_s6 + $0x150] sm:$0xff] %v6123_v30 }
 0x46b   : > { %3715 = vst [vmem:[%s6592_s6 + $0x158] sm:$0xff] %v6123_v30 }
 0x46c   : > { %3716 = vst [vmem:[%s6592_s6 + $0x160] sm:$0xff] %v6123_v30 }
 0x46d   : > { %3717 = vst [vmem:[%s6592_s6 + $0x168] sm:$0xff] %v6123_v30 }
 0x46e   : > { %3718 = vst [vmem:[%s6592_s6 + $0x170] sm:$0xff] %v6123_v30 }
 0x46f   : > { %3719 = vst [vmem:[%s6592_s6 + $0x178] sm:$0xff] %v6123_v30 }
 0x470   : > { %3720 = vst [vmem:[%s6592_s6 + $0x180] sm:$0xff] %v6123_v30 }
 0x471   : > { %3721 = vst [vmem:[%s6592_s6 + $0x188] sm:$0xff] %v6123_v30 }
 0x472   : > { %3722 = vst [vmem:[%s6592_s6 + $0x190] sm:$0xff] %v6123_v30 }
 0x473   : > { %3723 = vst [vmem:[%s6592_s6 + $0x198] sm:$0xff] %v6123_v30 }
 0x474   : > { %3724 = vst [vmem:[%s6592_s6 + $0x1a0] sm:$0xff] %v6123_v30 }
 0x475   : > { %3725 = vst [vmem:[%s6592_s6 + $0x1a8] sm:$0xff] %v6123_v30 }
 0x476   : > { %3726 = vst [vmem:[%s6592_s6 + $0x1b0] sm:$0xff] %v6123_v30 }
 0x477   : > { %3727 = vst [vmem:[%s6592_s6 + $0x1b8] sm:$0xff] %v6123_v30 }
 0x478   : > { %3728 = vst [vmem:[%s6592_s6 + $0x1c0] sm:$0xff] %v6123_v30 }
 0x479   : > { %3729 = vst [vmem:[%s6592_s6 + $0x1c8] sm:$0xff] %v6123_v30 }
 0x47a   : > { %3730 = vst [vmem:[%s6592_s6 + $0x1d0] sm:$0xff] %v6123_v30 }
 0x47b   : > { %3731 = vst [vmem:[%s6592_s6 + $0x1d8] sm:$0xff] %v6123_v30 }
 0x47c   : > { %3732 = vst [vmem:[%s6592_s6 + $0x1e0] sm:$0xff] %v6123_v30 }
 0x47d   : > { %3733 = vst [vmem:[%s6592_s6 + $0x1e8] sm:$0xff] %v6123_v30 }
 0x47e   : > { %3734 = vst [vmem:[%s6592_s6 + $0x1f0] sm:$0xff] %v6123_v30 }
 0x47f   : > { %3735 = vst [vmem:[%s6592_s6 + $0x1f8] sm:$0xff] %v6123_v30 }
 0x480 PF: > { %s8393_s2 = sld [smem:[#allocation13_spill]] }
 0x486   : > { %p5464_p13 = scmp.ne.s32.totalorder %s8393_s2, 1 }
 0x487   : > { %s8394_s24 = sld [smem:[#allocation32_spill]] (!%p5464_p13) }
 0x488   : > { %3739 = sbr.rel (%p5464_p13) target bundleno = 2134 (0x856), region = 207  ;;  %s8395_s9 = sld [smem:[#allocation33_spill]] (!%p5464_p13) }
 0x489   : > { %s8396_s3 = sld [smem:[#allocation36_spill]] (!%p5464_p13) }
 0x48a   : > { %s8397_s13 = sld [smem:[#allocation34_spill]] (!%p5464_p13) }
 0x48b   : > { %s8398_s7 = sld [smem:[#allocation35_spill]] (!%p5464_p13) }
 0x48c   : > { %s8399_s22 = sld [smem:[#allocation38_spill]] (!%p5464_p13) }
 0x48d   : > { %v5651_v40 = vld [vmem:[%s8394_s24 + $0x18] sm:$0xff]  ;;  %v5650_v2 = vld [vmem:[%s8394_s24 + $0x10] sm:$0xff]  ;;  %v5649_v24 = vld [vmem:[%s8394_s24 + $0x8] sm:$0xff]  ;;  %vm3800_vm1 = vcmask 523264   ;;  %s8400_s30 = sld [smem:[#allocation37_spill]] }
 0x48e   : > { %3829 = vmatpush.bf16.msra.mxu0 %v5651_v40  ;;  %v5648_v22 = vld [vmem:[%s8394_s24] sm:$0xff]  ;;  %v3741_v27 = vld [vmem:[#allocation2 + $0x8] sm:$0xff]  ;;  %v3742_v15 = vld [vmem:[#allocation2 + $0x10] sm:$0xff]  ;;  %v6124_v40 = vmov 64.0   ;;  %s8401_s1 = sld [smem:[#allocation39_spill]] }
 0x48f   : > { %v3740_v46 = vld [vmem:[#allocation2] sm:$0xff]  ;;  %v3743_v33 = vld [vmem:[#allocation2 + $0x18] sm:$0xff]  ;;  %v3745_v52 = vld [vmem:[#allocation2 + $0x28] sm:$0xff]  ;;  %5969 = vrcp.f32 %v6124_v40 }
 0x490   : > { %v3756_v18 = vpack.c.bf16 %v3741_v27, %v3740_v46  ;;  %v3757_v50 = vpack.c.bf16 %v3743_v33, %v3742_v15  ;;  %v3744_v35 = vld [vmem:[#allocation2 + $0x20] sm:$0xff]  ;;  %v3746_v57 = vld [vmem:[#allocation2 + $0x30] sm:$0xff]  ;;  %v3747_v10 = vld [vmem:[#allocation2 + $0x38] sm:$0xff] }
 0x491   : > { %v3758_v56 = vpack.c.bf16 %v3745_v52, %v3744_v35  ;;  %v3759_v3 = vpack.c.bf16 %v3747_v10, %v3746_v57  ;;  %v3748_v49 = vld [vmem:[#allocation2 + $0x40] sm:$0xff]  ;;  %v3749_v61 = vld [vmem:[#allocation2 + $0x48] sm:$0xff]  ;;  %v3750_v60 = vld [vmem:[#allocation2 + $0x50] sm:$0xff] }
 0x492   : > { %3830 = vmatpush.bf16.msra.mxu0 %v5650_v2  ;;  %v3760_v48 = vpack.c.bf16 %v3749_v61, %v3748_v49  ;;  %v3751_v38 = vld [vmem:[#allocation2 + $0x58] sm:$0xff]  ;;  %v7830_v55 = vld [vmem:[%s8395_s9] ss:$0 sm:$0xff]  ;;  %v3875_v28 = vld [vmem:[%s6579_s4 + $0x8] sm:$0xff] }
 0x493   : > { %v3761_v29 = vpack.c.bf16 %v3751_v38, %v3750_v60  ;;  %v3874_v45 = vld [vmem:[%s6579_s4] sm:$0xff]  ;;  %v3753_v16 = vld [vmem:[#allocation2 + $0x68] sm:$0xff]  ;;  %v3876_v54 = vld [vmem:[%s6579_s4 + $0x10] sm:$0xff] }
 0x494   : > { %v3752_v4 = vld [vmem:[#allocation2 + $0x60] sm:$0xff]  ;;  %v3754_v58 = vld [vmem:[#allocation2 + $0x70] sm:$0xff]  ;;  %v3755_v1 = vld [vmem:[#allocation2 + $0x78] sm:$0xff] }
 0x495   : > { %v3762_v37 = vpack.c.bf16 %v3753_v16, %v3752_v4  ;;  %v3877_v41 = vld [vmem:[%s6579_s4 + $0x18] sm:$0xff]  ;;  %v3763_v62 = vpack.c.bf16 %v3755_v1, %v3754_v58  ;;  %v3878_v23 = vld [vmem:[%s6579_s4 + $0x20] sm:$0xff]  ;;  %v3879_v53 = vld [vmem:[%s6579_s4 + $0x28] sm:$0xff]  ;;  %v5970_v2 = vpop.eup %5969 }
 0x496   : > { %3831 = vmatpush.bf16.msra.mxu0 %v5649_v24  ;;  %v3880_v11 = vld [vmem:[%s6579_s4 + $0x30] sm:$0xff]  ;;  %v3957_v24 = vmul.f32 64.0, %v5970_v2  ;;  %vm3961_vm8 = vweird.f32 %v5970_v2  ;;  %v3881_v49 = vld [vmem:[%s6579_s4 + $0x38] sm:$0xff] }
 0x49a   : > { %3832 = vmatpush.bf16.msra.mxu0 %v5648_v22  ;;  %v3958_v22 = vsub.f32 1.0, %v3957_v24  ;;  %v3886_v24 = vld [vmem:[%s6579_s4 + $0x60] sm:$0xff] }
 0x49c   : > { %v3959_v46 = vmul.f32 %v5970_v2, %v3958_v22 }
 0x49d   : > { %5481 = vmatmul.msk.bf16.vlgmr.msra.gmra.mxu0 %vm3800_vm1, %v3756_v18 }
 0x49e   : > { %v3960_v18 = vadd.f32 %v5970_v2, %v3959_v46 }
 0x4a0   : > { %v7870_v15 = vsel %vm3961_vm8, %v5970_v2, %v3960_v18 }
 0x4ad   : > { %5482 = vmatmul.msk.bf16.gmra.mxu0 %vm3800_vm1, %v3757_v50 }
 0x4bd   : > { %5483 = vmatmul.msk.bf16.gmra.mxu0 %vm3800_vm1, %v3758_v56 }
 0x4cd   : > { %5484 = vmatmul.msk.bf16.gmra.mxu0 %vm3800_vm1, %v3759_v3 }
 0x4dd   : > { %5485 = vmatmul.msk.bf16.gmra.mxu0 %vm3800_vm1, %v3760_v48 }
 0x4ed   : > { %5486 = vmatmul.msk.bf16.gmra.mxu0 %vm3800_vm1, %v3761_v29 }
 0x4fd   : > { %5487 = vmatmul.msk.bf16.gmra.mxu0 %vm3800_vm1, %v3762_v37 }
 0x50d   : > { %5488 = vmatmul.msk.bf16.gmra.mxu0 %vm3800_vm1, %v3763_v62 }
 0x51a   : > { %v3834_v12 = vpop.f32.mrf.mxu0 }
 0x51b   : > { %v3835_v34 = vadd.f32 %v7830_v55, %v3834_v12 }
 0x51d   : > { %v3890_v59 = vadd.f32 %v3874_v45, %v3835_v34  ;;  %v3882_v45 = vld [vmem:[%s6579_s4 + $0x40] sm:$0xff] }
 0x51f   : > { %v3908_v19 = vsel %vm3800_vm1, %v3890_v59, 0.0 }
 0x520   : > { %3909 = vadd.xlane.f32.xlu0 %v3908_v19 }
 0x522   : > { %v3836_v26 = vpop.f32.mrf.mxu0 }
 0x523   : > { %v3837_v51 = vadd.f32 %v7830_v55, %v3836_v26 }
 0x525   : > { %v3891_v42 = vadd.f32 %v3875_v28, %v3837_v51 }
 0x527   : > { %v3911_v32 = vsel %vm3800_vm1, %v3891_v42, 0.0 }
 0x528   : > { %3912 = vadd.xlane.f32.xlu0 %v3911_v32 }
 0x52a   : > { %v3839_v39 = vpop.f32.mrf.mxu0 }
 0x52b   : > { %v3840_v25 = vadd.f32 %v7830_v55, %v3839_v39 }
 0x52d   : > { %v7841_v43 = vadd.f32 %v3876_v54, %v3840_v25  ;;  %v3883_v54 = vld [vmem:[%s6579_s4 + $0x48] sm:$0xff] }
 0x52f   : > { %v3914_v8 = vsel %vm3800_vm1, %v7841_v43, 0.0 }
 0x530   : > { %3915 = vadd.xlane.f32.xlu1 %v3914_v8 }
 0x532   : > { %v3841_v20 = vpop.f32.mrf.mxu0 }
 0x533   : > { %v3842_v9 = vadd.f32 %v7830_v55, %v3841_v20 }
 0x535   : > { %v7847_v14 = vadd.f32 %v3877_v41, %v3842_v9  ;;  %v3884_v41 = vld [vmem:[%s6579_s4 + $0x50] sm:$0xff] }
 0x537   : > { %v3917_v36 = vsel %vm3800_vm1, %v7847_v14, 0.0 }
 0x538   : > { %3918 = vadd.xlane.f32.xlu1 %v3917_v36 }
 0x53a   : > { %v3844_v7 = vpop.f32.mrf.mxu0 }
 0x53b   : > { %v3845_v63 = vadd.f32 %v7830_v55, %v3844_v7 }
 0x53d   : > { %v7854_v47 = vadd.f32 %v3878_v23, %v3845_v63 }
 0x53f   : > { %v3920_v17 = vsel %vm3800_vm1, %v7854_v47, 0.0 }
 0x540   : > { %3921 = vadd.xlane.f32.xlu2 %v3920_v17 }
 0x542   : > { %v3846_v0 = vpop.f32.mrf.mxu0 }
 0x543   : > { %v3847_v5 = vadd.f32 %v7830_v55, %v3846_v0 }
 0x545   : > { %v7860_v44 = vadd.f32 %v3879_v53, %v3847_v5  ;;  %v3885_v53 = vld [vmem:[%s6579_s4 + $0x58] sm:$0xff] }
 0x547   : > { %v3923_v13 = vsel %vm3800_vm1, %v7860_v44, 0.0 }
 0x548   : > { %3924 = vadd.xlane.f32.xlu2 %v3923_v13 }
 0x54a   : > { %v3849_v6 = vpop.f32.mrf.mxu0 }
 0x54b   : > { %v3850_v31 = vadd.f32 %v7830_v55, %v3849_v6 }
 0x54d   : > { %v7866_v21 = vadd.f32 %v3880_v11, %v3850_v31 }
 0x54f   : > { %v3926_v30 = vsel %vm3800_vm1, %v7866_v21, 0.0 }
 0x550   : > { %3927 = vadd.xlane.f32.xlu2 %v3926_v30 }
 0x552   : > { %v3851_v27 = vpop.f32.mrf.mxu0 }
 0x553   : > { %v3852_v57 = vadd.f32 %v7830_v55, %v3851_v27 }
 0x555   : > { %v7883_v38 = vadd.f32 %v3881_v49, %v3852_v57  ;;  %v3887_v57 = vld [vmem:[%s6579_s4 + $0x68] sm:$0xff] }
 0x557   : > { %v3929_v34 = vsel %vm3800_vm1, %v7883_v38, 0.0 }
 0x55a   : > { %v3854_v50 = vpop.f32.mrf.mxu0 }
 0x55b   : > { %v3855_v29 = vadd.f32 %v7830_v55, %v3854_v50 }
 0x55d   : > { %v7893_v28 = vadd.f32 %v3882_v45, %v3855_v29  ;;  %v5655_v45 = vld [vmem:[%s8396_s3 + $0x18] sm:$0xff] }
 0x55e   : > { %4377 = vmatpush.bf16.msra.mxu1 %v5655_v45 }
 0x55f   : > { %v3932_v16 = vsel %vm3800_vm1, %v7893_v28, 0.0 }
 0x562   : > { %v3856_v48 = vpop.f32.mrf.mxu0 }
 0x56a   : > { %v3859_v51 = vpop.f32.mrf.mxu0 }
 0x56b   : > { %v3860_v20 = vadd.f32 %v7830_v55, %v3859_v51  ;;  %v5652_v51 = vld [vmem:[%s8396_s3] sm:$0xff] }
 0x56d   : > { %v7919_v7 = vadd.f32 %v3884_v41, %v3860_v20 }
 0x56f   : > { %v3938_v17 = vsel %vm3800_vm1, %v7919_v7, 0.0 }
 0x572   : > { %v3861_v58 = vpop.f32.mrf.mxu0 }
 0x573   : > { %v3862_v0 = vadd.f32 %v7830_v55, %v3861_v58 }
 0x57a   : > { %v3864_v5 = vpop.f32.mrf.mxu0 }
 0x57b   : > { %v3865_v2 = vadd.f32 %v7830_v55, %v3864_v5 }
 0x57d   : > { %v7945_v18 = vadd.f32 %v3886_v24, %v3865_v2 }
 0x57f   : > { %v3944_v50 = vsel %vm3800_vm1, %v7945_v18, 0.0 }
 0x582   : > { %v3866_v27 = vpop.f32.mrf.mxu0 }
 0x58a   : > { %v3869_v49 = vpop.f32.mrf.mxu0 }
 0x593   : > { %v3910_v33 = vpop.xlane.xlu0 %3909 }
 0x594   : > { %v3963_v35 = vmul.f32 %v7870_v15, %v3910_v33 }
 0x596   : > { %v7873_v52 = vsub.f32 %v3890_v59, %v3963_v35 }
 0x598   : > { %v3995_v56 = vmul.f32 %v7873_v52, %v7873_v52 }
 0x59a   : > { %v4011_v10 = vsel %vm3800_vm1, %v3995_v56, 0.0  ;;  %v3867_v56 = vadd.f32 %v7830_v55, %v3866_v27 }
 0x59b   : > { %4012 = vadd.xlane.f32.xlu0 %v4011_v10  ;;  %v3913_v3 = vpop.xlane.xlu0 %3912 }
 0x59c   : > { %v3964_v61 = vmul.f32 %v7870_v15, %v3913_v3  ;;  %v7957_v3 = vadd.f32 %v3887_v57, %v3867_v56 }
 0x59e   : > { %v7881_v60 = vsub.f32 %v3891_v42, %v3964_v61  ;;  %v3857_v42 = vadd.f32 %v7830_v55, %v3856_v48  ;;  %v3870_v61 = vadd.f32 %v7830_v55, %v3869_v49  ;;  %v3888_v48 = vld [vmem:[%s6579_s4 + $0x70] sm:$0xff] }
 0x5a0   : > { %v3996_v12 = vmul.f32 %v7881_v60, %v7881_v60  ;;  %v7963_v29 = vadd.f32 %v3888_v48, %v3870_v61  ;;  %v8012_v61 = vld [vmem:[%s8397_s13] ss:$0 sm:$0xff] }
 0x5a2   : > { %v4014_v59 = vsel %vm3800_vm1, %v3996_v12, 0.0  ;;  %v3950_v12 = vsel %vm3800_vm1, %v7963_v29, 0.0 }
 0x5a3   : > { %v3916_v19 = vpop.xlane.xlu1 %3915  ;;  %3930 = vadd.xlane.f32.xlu0 %v3929_v34  ;;  %4015 = vadd.xlane.f32.xlu1 %v4014_v59  ;;  %v5654_v34 = vld [vmem:[%s8396_s3 + $0x10] sm:$0xff]  ;;  %v5653_v59 = vld [vmem:[%s8396_s3 + $0x8] sm:$0xff] }
 0x5a4   : > { %v3965_v26 = vmul.f32 %v7870_v15, %v3916_v19  ;;  %4378 = vmatpush.bf16.msra.mxu1 %v5654_v34 }
 0x5a6   : > { %v7896_v4 = vsub.f32 %v7841_v43, %v3965_v26  ;;  %v7909_v43 = vadd.f32 %v3883_v54, %v3857_v42 }
 0x5a8   : > { %v3997_v37 = vmul.f32 %v7896_v4, %v7896_v4  ;;  %v3935_v9 = vsel %vm3800_vm1, %v7909_v43, 0.0  ;;  %4379 = vmatpush.bf16.msra.mxu1 %v5653_v59 }
 0x5aa   : > { %v4017_v32 = vsel %vm3800_vm1, %v3997_v37, 0.0 }
 0x5ab   : > { %v3919_v39 = vpop.xlane.xlu1 %3918  ;;  %3933 = vadd.xlane.f32.xlu0 %v3932_v16  ;;  %4018 = vadd.xlane.f32.xlu1 %v4017_v32 }
 0x5ac   : > { %v3966_v25 = vmul.f32 %v7870_v15, %v3919_v39  ;;  %4380 = vmatpush.bf16.msra.mxu1 %v5652_v51  ;;  %v8025_v51 = vld [vmem:[%s8398_s7] ss:$0 sm:$0xff] }
 0x5ae   : > { %v7907_v8 = vsub.f32 %v7847_v14, %v3966_v25 }
 0x5b0   : > { %v3998_v1 = vmul.f32 %v7907_v8, %v7907_v8 }
 0x5b2   : > { %v4020_v62 = vsel %vm3800_vm1, %v3998_v1, 0.0 }
 0x5b3   : > { %v3922_v36 = vpop.xlane.xlu2 %3921  ;;  %4021 = vadd.xlane.f32.xlu2 %v4020_v62  ;;  %3936 = vadd.xlane.f32.xlu1 %v3935_v9 }
 0x5b4   : > { %v3967_v14 = vmul.f32 %v7870_v15, %v3922_v36 }
 0x5b6   : > { %v7922_v23 = vsub.f32 %v7854_v47, %v3967_v14  ;;  %v7932_v47 = vadd.f32 %v3885_v53, %v3862_v0 }
 0x5b8   : > { %v3999_v63 = vmul.f32 %v7922_v23, %v7922_v23  ;;  %v3941_v30 = vsel %vm3800_vm1, %v7932_v47, 0.0 }
 0x5ba   : > { %v4023_v13 = vsel %vm3800_vm1, %v3999_v63, 0.0 }
 0x5bb   : > { %v3925_v6 = vpop.xlane.xlu2 %3924  ;;  %4024 = vadd.xlane.f32.xlu2 %v4023_v13  ;;  %3939 = vadd.xlane.f32.xlu1 %v3938_v17 }
 0x5bc   : > { %v3968_v11 = vmul.f32 %v7870_v15, %v3925_v6 }
 0x5be   : > { %v7935_v31 = vsub.f32 %v7860_v44, %v3968_v11  ;;  %v3871_v11 = vpop.f32.mrf.mxu0 }
 0x5bf   : > { %v3872_v2 = vadd.f32 %v7830_v55, %v3871_v11 }
 0x5c0   : > { %v4000_v40 = vmul.f32 %v7935_v31, %v7935_v31 }
 0x5c2   : > { %v4026_v22 = vsel %vm3800_vm1, %v4000_v40, 0.0 }
 0x5c3   : > { %v3928_v46 = vpop.xlane.xlu2 %3927  ;;  %3942 = vadd.xlane.f32.xlu2 %v3941_v30  ;;  %4027 = vadd.xlane.f32.xlu0 %v4026_v22 }
 0x5c4   : > { %v3969_v44 = vmul.f32 %v7870_v15, %v3928_v46 }
 0x5c6   : > { %v7948_v33 = vsub.f32 %v7866_v21, %v3969_v44  ;;  %v3947_v21 = vsel %vm3800_vm1, %v7957_v3, 0.0  ;;  %v3889_v44 = vld [vmem:[%s6579_s4 + $0x78] sm:$0xff] }
 0x5c8   : > { %v4001_v35 = vmul.f32 %v7948_v33, %v7948_v33 }
 0x5ca   : > { %v4029_v10 = vsel %vm3800_vm1, %v4001_v35, 0.0 }
 0x5cb   : > { %3945 = vadd.xlane.f32.xlu2 %v3944_v50  ;;  %4030 = vadd.xlane.f32.xlu0 %v4029_v10 }
 0x5d3   : > { %3948 = vadd.xlane.f32.xlu0 %v3947_v21  ;;  %v8007_v21 = vadd.f32 %v3889_v44, %v3872_v2 }
 0x5db   : > { %3951 = vadd.xlane.f32.xlu0 %v3950_v12 }
 0x60e   : > { %v4013_v19 = vpop.xlane.xlu0 %4012 }
 0x60f   : > { %v4059_v26 = vmul.f32 %v4013_v19, %v7870_v15  ;;  %v3953_v19 = vsel %vm3800_vm1, %v8007_v21, 0.0 }
 0x611   : > { %v4075_v16 = vadd.f32 1e-05, %v4059_v26 }
 0x613   : > { %5971 = vrsqrt.f32 %v4075_v16  ;;  %vm4097_vm10 = vweird.f32 %v4075_v16 }
 0x616   : > { %v4016_v37 = vpop.xlane.xlu1 %4015  ;;  %v3931_v42 = vpop.xlane.xlu0 %3930 }
 0x617   : > { %v4060_v32 = vmul.f32 %v4016_v37, %v7870_v15  ;;  %v3970_v39 = vmul.f32 %v7870_v15, %v3931_v42 }
 0x619   : > { %v5972_v54 = vpop.eup %5971  ;;  %v4076_v25 = vadd.f32 1e-05, %v4060_v32  ;;  %v7983_v58 = vsub.f32 %v7883_v38, %v3970_v39 }
 0x61a   : > { %v4092_v1 = vmul.f32 %v5972_v54, %v4075_v16  ;;  %vm4098_vm9 = vweird.f32 %v5972_v54 }
 0x61b   : > { %5973 = vrsqrt.f32 %v4076_v25  ;;  %v4002_v20 = vmul.f32 %v7983_v58, %v7983_v58  ;;  %vm4099_vm11 = vmor %vm4097_vm10, %vm4098_vm9  ;;  %vm4107_vm13 = vweird.f32 %v4076_v25 }
 0x61c   : > { %v4093_v41 = vmul.f32 %v5972_v54, %v4092_v1 }
 0x61d   : > { %v4032_v62 = vsel %vm3800_vm1, %v4002_v20, 0.0 }
 0x61e   : > { %v4094_v9 = vmul.f32 0.5, %v4093_v41  ;;  %v4019_v36 = vpop.xlane.xlu1 %4018  ;;  %4033 = vadd.xlane.f32.xlu1 %v4032_v62  ;;  %v3934_v14 = vpop.xlane.xlu0 %3933 }
 0x61f   : > { %v4061_v63 = vmul.f32 %v4019_v36, %v7870_v15  ;;  %v3971_v17 = vmul.f32 %v7870_v15, %v3934_v14 }
 0x620   : > { %v4095_v0 = vsub.f32 1.5, %v4094_v9 }
 0x621   : > { %v5974_v53 = vpop.eup %5973  ;;  %v7990_v38 = vadd.f32 1e-05, %v4061_v63  ;;  %v7993_v5 = vsub.f32 %v7893_v28, %v3971_v17 }
 0x622   : > { %v4096_v13 = vmul.f32 %v5972_v54, %v4095_v0  ;;  %v4102_v6 = vmul.f32 %v5974_v53, %v4076_v25  ;;  %vm4108_vm12 = vweird.f32 %v5974_v53 }
 0x623   : > { %5975 = vrsqrt.f32 %v7990_v38  ;;  %v4003_v30 = vmul.f32 %v7993_v5, %v7993_v5  ;;  %vm4109_vm14 = vmor %vm4107_vm13, %vm4108_vm12  ;;  %vm4117_vm0 = vweird.f32 %v7990_v38 }
 0x624   : > { %v4103_v40 = vmul.f32 %v5974_v53, %v4102_v6  ;;  %v4100_v22 = vsel %vm4099_vm11, %v5972_v54, %v4096_v13 }
 0x625   : > { %v4035_v24 = vsel %vm3800_vm1, %v4003_v30, 0.0  ;;  %v4251_v10 = vmul.f32 %v4100_v22, %v7873_v52 }
 0x626   : > { %v4104_v28 = vmul.f32 0.5, %v4103_v40  ;;  %v4022_v46 = vpop.xlane.xlu2 %4021  ;;  %v3937_v27 = vpop.xlane.xlu1 %3936  ;;  %4036 = vadd.xlane.f32.xlu1 %v4035_v24 }
 0x627   : > { %v4062_v50 = vmul.f32 %v4022_v46, %v7870_v15  ;;  %v3972_v35 = vmul.f32 %v7870_v15, %v3937_v27  ;;  %v4270_v26 = vmul.f32 %v8012_v61, %v4251_v10 }
 0x628   : > { %v4105_v56 = vsub.f32 1.5, %v4104_v28 }
 0x629   : > { %v5976_v57 = vpop.eup %5975  ;;  %v4078_v49 = vadd.f32 1e-05, %v4062_v50  ;;  %v8005_v55 = vsub.f32 %v7909_v43, %v3972_v35  ;;  %v4289_v41 = vadd.f32 %v8025_v51, %v4270_v26 }
 0x62a   : > { %v4106_v48 = vmul.f32 %v5974_v53, %v4105_v56  ;;  %v4112_v12 = vmul.f32 %v5976_v57, %v7990_v38  ;;  %vm4118_vm15 = vweird.f32 %v5976_v57 }
 0x62b   : > { %5977 = vrsqrt.f32 %v4078_v49  ;;  %v4004_v52 = vmul.f32 %v8005_v55, %v8005_v55  ;;  %vm4119_vm2 = vmor %vm4117_vm0, %vm4118_vm15  ;;  %vm4127_vm4 = vweird.f32 %v4078_v49 }
 0x62c   : > { %v4110_v45 = vsel %vm4109_vm14, %v5974_v53, %v4106_v48  ;;  %v4113_v34 = vmul.f32 %v5976_v57, %v4112_v12 }
 0x62d   : > { %v4252_v43 = vmul.f32 %v4110_v45, %v7881_v60  ;;  %v4038_v59 = vsel %vm3800_vm1, %v4004_v52, 0.0 }
 0x62e   : > { %v4114_v16 = vmul.f32 0.5, %v4113_v34  ;;  %v4025_v37 = vpop.xlane.xlu2 %4024  ;;  %4039 = vadd.xlane.f32.xlu2 %v4038_v59  ;;  %v3940_v42 = vpop.xlane.xlu1 %3939  ;;  %3954 = vadd.xlane.f32.xlu1 %v3953_v19 }
 0x62f   : > { %v4063_v32 = vmul.f32 %v4025_v37, %v7870_v15  ;;  %v3973_v60 = vmul.f32 %v7870_v15, %v3940_v42  ;;  %v4271_v39 = vmul.f32 %v8012_v61, %v4252_v43 }
 0x630   : > { %v4115_v54 = vsub.f32 1.5, %v4114_v16 }
 0x631   : > { %v5978_v25 = vpop.eup %5977  ;;  %v4079_v1 = vadd.f32 1e-05, %v4063_v32  ;;  %v8031_v20 = vsub.f32 %v7919_v7, %v3973_v60  ;;  %v4290_v62 = vadd.f32 %v8025_v51, %v4271_v39 }
 0x632   : > { %v4116_v9 = vmul.f32 %v5976_v57, %v4115_v54  ;;  %v4122_v36 = vmul.f32 %v5978_v25, %v4078_v49  ;;  %vm4128_vm3 = vweird.f32 %v5978_v25 }
 0x633   : > { %5979 = vrsqrt.f32 %v4079_v1  ;;  %v4305_v14 = vpack.c.bf16 %v4290_v62, %v4289_v41  ;;  %v4005_v63 = vmul.f32 %v8031_v20, %v8031_v20  ;;  %vm4129_vm5 = vmor %vm4127_vm4, %vm4128_vm3  ;;  %vm4137_vm7 = vweird.f32 %v4079_v1 }
 0x634   : > { %v4123_v17 = vmul.f32 %v5978_v25, %v4122_v36  ;;  %v4120_v0 = vsel %vm4119_vm2, %v5976_v57, %v4116_v9 }
 0x635   : > { %5505 = vmatmul.msk.bf16.vlgmr.msra.gmra.mxu1 %vm3800_vm1, %v4305_v14  ;;  %v4041_v7 = vsel %vm3800_vm1, %v4005_v63, 0.0  ;;  %v4253_v38 = vmul.f32 %v4120_v0, %v7896_v4 }
 0x636   : > { %v4124_v53 = vmul.f32 0.5, %v4123_v17  ;;  %v3943_v13 = vpop.xlane.xlu2 %3942  ;;  %4042 = vadd.xlane.f32.xlu2 %v4041_v7  ;;  %v4028_v6 = vpop.xlane.xlu0 %4027 }
 0x637   : > { %v3974_v11 = vmul.f32 %v7870_v15, %v3943_v13  ;;  %v4064_v30 = vmul.f32 %v4028_v6, %v7870_v15  ;;  %v4272_v4 = vmul.f32 %v8012_v61, %v4253_v38  ;;  %v5660_v38 = vld [vmem:[%s8399_s22 + $0x20] sm:$0xff] }
 0x638   : > { %v4125_v40 = vsub.f32 1.5, %v4124_v53 }
 0x639   : > { %v5980_v2 = vpop.eup %5979  ;;  %v8044_v24 = vsub.f32 %v7932_v47, %v3974_v11  ;;  %v4080_v22 = vadd.f32 1e-05, %v4064_v30  ;;  %v4291_v34 = vadd.f32 %v8025_v51, %v4272_v4  ;;  %v5662_v30 = vld [vmem:[%s8399_s22 + $0x30] sm:$0xff]  ;;  %v5657_v4 = vld [vmem:[%s8399_s22 + $0x8] sm:$0xff] }
 0x63a   : > { %v4126_v28 = vmul.f32 %v5978_v25, %v4125_v40  ;;  %v4132_v46 = vmul.f32 %v5980_v2, %v4079_v1  ;;  %vm4138_vm6 = vweird.f32 %v5980_v2  ;;  %v5661_v40 = vld [vmem:[%s8399_s22 + $0x28] sm:$0xff] }
 0x63b   : > { %5981 = vrsqrt.f32 %v4080_v22  ;;  %v4006_v27 = vmul.f32 %v8044_v24, %v8044_v24  ;;  %vm4139_vm8 = vmor %vm4137_vm7, %vm4138_vm6  ;;  %vm4147_vm10 = vweird.f32 %v4080_v22 }
 0x63c   : > { %v4130_v44 = vsel %vm4129_vm5, %v5978_v25, %v4126_v28  ;;  %v4133_v50 = vmul.f32 %v5980_v2, %v4132_v46  ;;  %v5659_v28 = vld [vmem:[%s8399_s22 + $0x18] sm:$0xff] }
 0x63d   : > { %v4254_v35 = vmul.f32 %v4130_v44, %v7907_v8  ;;  %v4044_v56 = vsel %vm3800_vm1, %v4006_v27, 0.0 }
 0x63e   : > { %v4134_v57 = vmul.f32 0.5, %v4133_v50  ;;  %v3946_v47 = vpop.xlane.xlu2 %3945  ;;  %4045 = vadd.xlane.f32.xlu0 %v4044_v56  ;;  %v4031_v10 = vpop.xlane.xlu0 %4030 }
 0x63f   : > { %v3975_v49 = vmul.f32 %v7870_v15, %v3946_v47  ;;  %v4273_v48 = vmul.f32 %v8012_v61, %v4254_v35  ;;  %v4065_v6 = vmul.f32 %v4031_v10, %v7870_v15  ;;  %v5658_v35 = vld [vmem:[%s8399_s22 + $0x10] sm:$0xff] }
 0x640   : > { %v4135_v12 = vsub.f32 1.5, %v4134_v57 }
 0x641   : > { %v5982_v52 = vpop.eup %5981  ;;  %v8054_v45 = vsub.f32 %v7945_v18, %v3975_v49  ;;  %v4292_v8 = vadd.f32 %v8025_v51, %v4273_v48  ;;  %v4081_v11 = vadd.f32 1e-05, %v4065_v6 }
 0x642   : > { %v4136_v43 = vmul.f32 %v5980_v2, %v4135_v12  ;;  %v4142_v59 = vmul.f32 %v5982_v52, %v4080_v22  ;;  %vm4148_vm9 = vweird.f32 %v5982_v52  ;;  %v5656_v12 = vld [vmem:[%s8399_s22] sm:$0xff] }
 0x643   : > { %v4306_v19 = vpack.c.bf16 %v4292_v8, %v4291_v34  ;;  %v4007_v26 = vmul.f32 %v8054_v45, %v8054_v45  ;;  %vm4149_vm11 = vmor %vm4147_vm10, %vm4148_vm9  ;;  %5983 = vrsqrt.f32 %v4081_v11  ;;  %vm4157_vm13 = vweird.f32 %v4081_v11 }
 0x644   : > { %v4143_v16 = vmul.f32 %v5982_v52, %v4142_v59  ;;  %v4140_v18 = vsel %vm4139_vm8, %v5980_v2, %v4136_v43 }
 0x645   : > { %5506 = vmatmul.msk.bf16.gmra.mxu1 %vm3800_vm1, %v4306_v19  ;;  %v4047_v37 = vsel %vm3800_vm1, %v4007_v26, 0.0  ;;  %v4255_v54 = vmul.f32 %v4140_v18, %v7922_v23 }
 0x646   : > { %v4144_v42 = vmul.f32 0.5, %v4143_v16  ;;  %4048 = vadd.xlane.f32.xlu1 %v4047_v37  ;;  %v3949_v32 = vpop.xlane.xlu0 %3948 }
 0x647   : > { %v3976_v60 = vmul.f32 %v7870_v15, %v3949_v32  ;;  %v4274_v14 = vmul.f32 %v8012_v61, %v4255_v54 }
 0x648   : > { %v4145_v39 = vsub.f32 1.5, %v4144_v42 }
 0x649   : > { %v8065_v25 = vsub.f32 %v7957_v3, %v3976_v60  ;;  %v4293_v7 = vadd.f32 %v8025_v51, %v4274_v14  ;;  %v5984_v2 = vpop.eup %5983 }
 0x64a   : > { %v4146_v1 = vmul.f32 %v5982_v52, %v4145_v39  ;;  %v4152_v22 = vmul.f32 %v5984_v2, %v4081_v11  ;;  %vm4158_vm12 = vweird.f32 %v5984_v2 }
 0x64b   : > { %v4008_v41 = vmul.f32 %v8065_v25, %v8065_v25  ;;  %vm4159_vm14 = vmor %vm4157_vm13, %vm4158_vm12 }
 0x64c   : > { %v4150_v62 = vsel %vm4149_vm11, %v5982_v52, %v4146_v1  ;;  %v4153_v46 = vmul.f32 %v5984_v2, %v4152_v22 }
 0x64d   : > { %v4256_v9 = vmul.f32 %v4150_v62, %v7935_v31  ;;  %v4050_v36 = vsel %vm3800_vm1, %v4008_v41, 0.0 }
 0x64e   : > { %4051 = vadd.xlane.f32.xlu2 %v4050_v36  ;;  %v3952_v63 = vpop.xlane.xlu0 %3951  ;;  %v4154_v56 = vmul.f32 0.5, %v4153_v46 }
 0x64f   : > { %v3977_v23 = vmul.f32 %v7870_v15, %v3952_v63  ;;  %v4275_v3 = vmul.f32 %v8012_v61, %v4256_v9 }
 0x650   : > { %v4155_v57 = vsub.f32 1.5, %v4154_v56  ;;  %v8131_v56 = vld [vmem:[%s8400_s30] ss:$0 sm:$0xff] }
 0x651   : > { %v8075_v17 = vsub.f32 %v7963_v29, %v3977_v23  ;;  %v4294_v0 = vadd.f32 %v8025_v51, %v4275_v3  ;;  %v5663_v29 = vld [vmem:[%s8399_s22 + $0x38] sm:$0xff] }
 0x652   : > { %4514 = vmatpush.bf16.msra.mxu2 %v5663_v29  ;;  %5681 = vmatpush.bf16.msra.mxu3 %v5663_v29  ;;  %v4156_v52 = vmul.f32 %v5984_v2, %v4155_v57 }
 0x653   : > { %v4307_v53 = vpack.c.bf16 %v4294_v0, %v4293_v7  ;;  %v4009_v31 = vmul.f32 %v8075_v17, %v8075_v17 }
 0x654   : > { %v4160_v43 = vsel %vm4159_vm14, %v5984_v2, %v4156_v52 }
 0x655   : > { %5507 = vmatmul.msk.bf16.gmra.mxu1 %vm3800_vm1, %v4307_v53  ;;  %v4053_v13 = vsel %vm3800_vm1, %v4009_v31, 0.0  ;;  %v4257_v32 = vmul.f32 %v4160_v43, %v7948_v33 }
 0x656   : > { %4054 = vadd.xlane.f32.xlu0 %v4053_v13  ;;  %4515 = vmatpush.bf16.msra.mxu2 %v5662_v30 }
 0x657   : > { %5682 = vmatpush.bf16.msra.mxu3 %v5662_v30  ;;  %v4276_v33 = vmul.f32 %v8012_v61, %v4257_v32 }
 0x659   : > { %v4295_v31 = vadd.f32 %v8025_v51, %v4276_v33 }
 0x65a   : > { %4516 = vmatpush.bf16.msra.mxu2 %v5661_v40 }
 0x65b   : > { %5683 = vmatpush.bf16.msra.mxu3 %v5661_v40 }
 0x65e   : > { %4517 = vmatpush.bf16.msra.mxu2 %v5660_v38 }
 0x65f   : > { %5684 = vmatpush.bf16.msra.mxu3 %v5660_v38 }
 0x662   : > { %4518 = vmatpush.bf16.msra.mxu2 %v5659_v28 }
 0x663   : > { %5685 = vmatpush.bf16.msra.mxu3 %v5659_v28 }
 0x666   : > { %4519 = vmatpush.bf16.msra.mxu2 %v5658_v35 }
 0x667   : > { %5686 = vmatpush.bf16.msra.mxu3 %v5658_v35 }
 0x66a   : > { %4520 = vmatpush.bf16.msra.mxu2 %v5657_v4 }
 0x66b   : > { %5687 = vmatpush.bf16.msra.mxu3 %v5657_v4 }
 0x66e   : > { %4521 = vmatpush.bf16.msra.mxu2 %v5656_v12 }
 0x66f   : > { %5688 = vmatpush.bf16.msra.mxu3 %v5656_v12 }
 0x691   : > { %v4034_v27 = vpop.xlane.xlu1 %4033 }
 0x692   : > { %v4066_v44 = vmul.f32 %v4034_v27, %v7870_v15 }
 0x694   : > { %v4082_v50 = vadd.f32 1e-05, %v4066_v44 }
 0x696   : > { %5985 = vrsqrt.f32 %v4082_v50  ;;  %vm4167_vm0 = vweird.f32 %v4082_v50 }
 0x699   : > { %v4037_v47 = vpop.xlane.xlu1 %4036 }
 0x69a   : > { %v4067_v10 = vmul.f32 %v4037_v47, %v7870_v15 }
 0x69c   : > { %v5986_v49 = vpop.eup %5985  ;;  %v4083_v48 = vadd.f32 1e-05, %v4067_v10 }
 0x69d   : > { %v4162_v34 = vmul.f32 %v5986_v49, %v4082_v50  ;;  %vm4168_vm15 = vweird.f32 %v5986_v49 }
 0x69e   : > { %5987 = vrsqrt.f32 %v4083_v48  ;;  %vm4169_vm2 = vmor %vm4167_vm0, %vm4168_vm15  ;;  %vm4177_vm4 = vweird.f32 %v4083_v48 }
 0x69f   : > { %v4163_v8 = vmul.f32 %v5986_v49, %v4162_v34 }
 0x6a1   : > { %v4164_v59 = vmul.f32 0.5, %v4163_v8  ;;  %v4040_v19 = vpop.xlane.xlu2 %4039  ;;  %v3955_v26 = vpop.xlane.xlu1 %3954 }
 0x6a2   : > { %v4068_v16 = vmul.f32 %v4040_v19, %v7870_v15  ;;  %v3978_v37 = vmul.f32 %v7870_v15, %v3955_v26 }
 0x6a3   : > { %v4165_v18 = vsub.f32 1.5, %v4164_v59 }
 0x6a4   : > { %v5988_v42 = vpop.eup %5987  ;;  %v4084_v60 = vadd.f32 1e-05, %v4068_v16  ;;  %v8114_v39 = vsub.f32 %v8007_v21, %v3978_v37 }
 0x6a5   : > { %v4166_v54 = vmul.f32 %v5986_v49, %v4165_v18  ;;  %v4172_v1 = vmul.f32 %v5988_v42, %v4083_v48  ;;  %vm4178_vm3 = vweird.f32 %v5988_v42 }
 0x6a6   : > { %5989 = vrsqrt.f32 %v4084_v60  ;;  %v4010_v41 = vmul.f32 %v8114_v39, %v8114_v39  ;;  %vm4179_vm5 = vmor %vm4177_vm4, %vm4178_vm3  ;;  %vm4187_vm7 = vweird.f32 %v4084_v60 }
 0x6a7   : > { %v4170_v62 = vsel %vm4169_vm2, %v5986_v49, %v4166_v54  ;;  %v4173_v9 = vmul.f32 %v5988_v42, %v4172_v1 }
 0x6a8   : > { %v4258_v36 = vmul.f32 %v4170_v62, %v7983_v58  ;;  %v4056_v14 = vsel %vm3800_vm1, %v4010_v41, 0.0 }
 0x6a9   : > { %v4174_v63 = vmul.f32 0.5, %v4173_v9  ;;  %v4043_v23 = vpop.xlane.xlu2 %4042  ;;  %4057 = vadd.xlane.f32.xlu1 %v4056_v14 }
 0x6aa   : > { %v4069_v21 = vmul.f32 %v4043_v23, %v7870_v15  ;;  %v4277_v3 = vmul.f32 %v8012_v61, %v4258_v36 }
 0x6ab   : > { %v4175_v7 = vsub.f32 1.5, %v4174_v63 }
 0x6ac   : > { %v5990_v0 = vpop.eup %5989  ;;  %v4085_v53 = vadd.f32 1e-05, %v4069_v21  ;;  %v4296_v13 = vadd.f32 %v8025_v51, %v4277_v3 }
 0x6ad   : > { %v4176_v6 = vmul.f32 %v5988_v42, %v4175_v7  ;;  %v4182_v58 = vmul.f32 %v5990_v0, %v4084_v60  ;;  %vm4188_vm6 = vweird.f32 %v5990_v0 }
 0x6ae   : > { %5991 = vrsqrt.f32 %v4085_v53  ;;  %v4308_v11 = vpack.c.bf16 %v4296_v13, %v4295_v31  ;;  %vm4189_vm8 = vmor %vm4187_vm7, %vm4188_vm6  ;;  %vm4197_vm10 = vweird.f32 %v4085_v53 }
 0x6af   : > { %v4183_v29 = vmul.f32 %v5990_v0, %v4182_v58  ;;  %v4180_v30 = vsel %vm4179_vm5, %v5988_v42, %v4176_v6 }
 0x6b0   : > { %5508 = vmatmul.msk.bf16.gmra.mxu1 %vm3800_vm1, %v4308_v11  ;;  %v4259_v27 = vmul.f32 %v4180_v30, %v7993_v5 }
 0x6b1   : > { %v4184_v40 = vmul.f32 0.5, %v4183_v29  ;;  %v4046_v2 = vpop.xlane.xlu0 %4045 }
 0x6b2   : > { %v4070_v38 = vmul.f32 %v4046_v2, %v7870_v15  ;;  %v4382_v22 = vpop.f32.mrf.mxu1  ;;  %v4278_v10 = vmul.f32 %v8012_v61, %v4259_v27 }
 0x6b3   : > { %v4185_v28 = vsub.f32 1.5, %v4184_v40  ;;  %v4383_v5 = vadd.f32 %v8131_v56, %v4382_v22 }
 0x6b4   : > { %v5992_v46 = vpop.eup %5991  ;;  %v4086_v44 = vadd.f32 1e-05, %v4070_v38  ;;  %v4297_v26 = vadd.f32 %v8025_v51, %v4278_v10 }
 0x6b5   : > { %v4186_v50 = vmul.f32 %v5990_v0, %v4185_v28  ;;  %v4192_v35 = vmul.f32 %v5992_v46, %v4085_v53  ;;  %vm4198_vm9 = vweird.f32 %v5992_v46  ;;  %v4422_v18 = vmax.f32 %v4383_v5, 0.0 }
 0x6b6   : > { %5993 = vrsqrt.f32 %v4086_v44  ;;  %vm4199_vm11 = vmor %vm4197_vm10, %vm4198_vm9  ;;  %vm4207_vm13 = vweird.f32 %v4086_v44 }
 0x6b7   : > { %v4190_v4 = vsel %vm4189_vm8, %v5990_v0, %v4186_v50  ;;  %v4193_v57 = vmul.f32 %v5992_v46, %v4192_v35 }
 0x6b8   : > { %v4260_v47 = vmul.f32 %v4190_v4, %v8005_v55 }
 0x6b9   : > { %v4194_v49 = vmul.f32 0.5, %v4193_v57  ;;  %v4049_v48 = vpop.xlane.xlu1 %4048 }
 0x6ba   : > { %v4071_v12 = vmul.f32 %v4049_v48, %v7870_v15  ;;  %v4384_v52 = vpop.f32.mrf.mxu1  ;;  %v4279_v34 = vmul.f32 %v8012_v61, %v4260_v47 }
 0x6bb   : > { %v4195_v8 = vsub.f32 1.5, %v4194_v49  ;;  %v4385_v43 = vadd.f32 %v8131_v56, %v4384_v52 }
 0x6bc   : > { %v5994_v59 = vpop.eup %5993  ;;  %v4087_v19 = vadd.f32 1e-05, %v4071_v12  ;;  %v4298_v55 = vadd.f32 %v8025_v51, %v4279_v34 }
 0x6bd   : > { %v4196_v16 = vmul.f32 %v5992_v46, %v4195_v8  ;;  %v4202_v37 = vmul.f32 %v5994_v59, %v4086_v44  ;;  %v4423_v42 = vmax.f32 %v4385_v43, 0.0  ;;  %vm4208_vm12 = vweird.f32 %v5994_v59 }
 0x6be   : > { %5995 = vrsqrt.f32 %v4087_v19  ;;  %v4309_v32 = vpack.c.bf16 %v4298_v55, %v4297_v26  ;;  %vm4209_vm14 = vmor %vm4207_vm13, %vm4208_vm12  ;;  %vm4217_vm0 = vweird.f32 %v4087_v19 }
 0x6bf   : > { %v4203_v60 = vmul.f32 %v5994_v59, %v4202_v37  ;;  %v4438_v54 = vpack.c.bf16 %v4423_v42, %v4422_v18  ;;  %v4200_v1 = vsel %vm4199_vm11, %v5992_v46, %v4196_v16 }
 0x6c0   : > { %5509 = vmatmul.msk.bf16.gmra.mxu1 %vm3800_vm1, %v4309_v32  ;;  %v4261_v63 = vmul.f32 %v4200_v1, %v8031_v20 }
 0x6c1   : > { %v4204_v41 = vmul.f32 0.5, %v4203_v60  ;;  %4522 = vmatmul.bf16.vlgmr.msra.gmra.mxu2 %v4438_v54  ;;  %v4052_v62 = vpop.xlane.xlu2 %4051 }
 0x6c2   : > { %v4072_v9 = vmul.f32 %v4052_v62, %v7870_v15  ;;  %v4387_v36 = vpop.f32.mrf.mxu1  ;;  %v4280_v31 = vmul.f32 %v8012_v61, %v4261_v63 }
 0x6c3   : > { %v4205_v14 = vsub.f32 1.5, %v4204_v41  ;;  %v4388_v6 = vadd.f32 %v8131_v56, %v4387_v36 }
 0x6c4   : > { %v5996_v33 = vpop.eup %5995  ;;  %v4088_v23 = vadd.f32 1e-05, %v4072_v9  ;;  %v4299_v40 = vadd.f32 %v8025_v51, %v4280_v31 }
 0x6c5   : > { %v4206_v21 = vmul.f32 %v5994_v59, %v4205_v14  ;;  %v4212_v3 = vmul.f32 %v5996_v33, %v4087_v19  ;;  %vm4218_vm15 = vweird.f32 %v5996_v33 }
 0x6c6   : > { %5997 = vrsqrt.f32 %v4088_v23  ;;  %vm4219_vm2 = vmor %vm4217_vm0, %vm4218_vm15  ;;  %vm4227_vm4 = vweird.f32 %v4088_v23 }
 0x6c7   : > { %v4210_v7 = vsel %vm4209_vm14, %v5994_v59, %v4206_v21  ;;  %v4213_v0 = vmul.f32 %v5996_v33, %v4212_v3 }
 0x6c8   : > { %v4262_v53 = vmul.f32 %v4210_v7, %v8044_v24  ;;  %v4424_v24 = vmax.f32 %v4388_v6, 0.0 }
 0x6c9   : > { %v4214_v13 = vmul.f32 0.5, %v4213_v0 }
 0x6ca   : > { %v4389_v58 = vpop.f32.mrf.mxu1  ;;  %v4281_v11 = vmul.f32 %v8012_v61, %v4262_v53 }
 0x6cb   : > { %v4215_v29 = vsub.f32 1.5, %v4214_v13  ;;  %v4390_v20 = vadd.f32 %v8131_v56, %v4389_v58 }
 0x6cc   : > { %v5998_v30 = vpop.eup %5997  ;;  %v4300_v2 = vadd.f32 %v8025_v51, %v4281_v11 }
 0x6cd   : > { %v4216_v38 = vmul.f32 %v5996_v33, %v4215_v29  ;;  %v4222_v22 = vmul.f32 %v5998_v30, %v4088_v23  ;;  %v4425_v28 = vmax.f32 %v4390_v20, 0.0  ;;  %vm4228_vm3 = vweird.f32 %v5998_v30 }
 0x6ce   : > { %v4310_v46 = vpack.c.bf16 %v4300_v2, %v4299_v40  ;;  %vm4229_vm5 = vmor %vm4227_vm4, %vm4228_vm3 }
 0x6cf   : > { %v4223_v27 = vmul.f32 %v5998_v30, %v4222_v22  ;;  %v4439_v44 = vpack.c.bf16 %v4425_v28, %v4424_v24  ;;  %v4220_v50 = vsel %vm4219_vm2, %v5996_v33, %v4216_v38 }
 0x6d0   : > { %5510 = vmatmul.msk.bf16.gmra.mxu1 %vm3800_vm1, %v4310_v46  ;;  %v4263_v47 = vmul.f32 %v4220_v50, %v8054_v45 }
 0x6d1   : > { %v4224_v35 = vmul.f32 0.5, %v4223_v27  ;;  %4527 = vmatmul.bf16.gmra.mxu2 %v4439_v44 }
 0x6d2   : > { %v4392_v4 = vpop.f32.mrf.mxu1  ;;  %v4282_v48 = vmul.f32 %v8012_v61, %v4263_v47 }
 0x6d3   : > { %v4225_v57 = vsub.f32 1.5, %v4224_v35  ;;  %v4393_v12 = vadd.f32 %v8131_v56, %v4392_v4 }
 0x6d4   : > { %v4301_v43 = vadd.f32 %v8025_v51, %v4282_v48 }
 0x6d5   : > { %v4226_v10 = vmul.f32 %v5998_v30, %v4225_v57  ;;  %v4426_v45 = vmax.f32 %v4393_v12, 0.0 }
 0x6d7   : > { %v4230_v49 = vsel %vm4229_vm5, %v5998_v30, %v4226_v10 }
 0x6d8   : > { %v4264_v5 = vmul.f32 %v4230_v49, %v8065_v25  ;;  %v4055_v25 = vpop.xlane.xlu0 %4054 }
 0x6d9   : > { %v4073_v16 = vmul.f32 %v4055_v25, %v7870_v15 }
 0x6da   : > { %v4394_v52 = vpop.f32.mrf.mxu1  ;;  %v4283_v34 = vmul.f32 %v8012_v61, %v4264_v5 }
 0x6db   : > { %v4395_v8 = vadd.f32 %v8131_v56, %v4394_v52  ;;  %v4089_v37 = vadd.f32 1e-05, %v4073_v16 }
 0x6dc   : > { %v4302_v59 = vadd.f32 %v8025_v51, %v4283_v34 }
 0x6dd   : > { %v4427_v19 = vmax.f32 %v4395_v8, 0.0  ;;  %5999 = vrsqrt.f32 %v4089_v37  ;;  %vm4237_vm7 = vweird.f32 %v4089_v37 }
 0x6de   : > { %v4311_v26 = vpack.c.bf16 %v4302_v59, %v4301_v43 }
 0x6df   : > { %v4440_v55 = vpack.c.bf16 %v4427_v19, %v4426_v45 }
 0x6e0   : > { %5511 = vmatmul.msk.bf16.gmra.mxu1 %vm3800_vm1, %v4311_v26 }
 0x6e1   : > { %4532 = vmatmul.bf16.gmra.mxu2 %v4440_v55 }
 0x6e3   : > { %v6000_v18 = vpop.eup %5999 }
 0x6e4   : > { %v4232_v42 = vmul.f32 %v6000_v18, %v4089_v37  ;;  %vm4238_vm6 = vweird.f32 %v6000_v18 }
 0x6e5   : > { %vm4239_vm8 = vmor %vm4237_vm7, %vm4238_vm6 }
 0x6e6   : > { %v4233_v32 = vmul.f32 %v6000_v18, %v4232_v42 }
 0x6e8   : > { %v4234_v41 = vmul.f32 0.5, %v4233_v32 }
 0x6ea   : > { %v4235_v62 = vsub.f32 1.5, %v4234_v41 }
 0x6ec   : > { %v4236_v36 = vmul.f32 %v6000_v18, %v4235_v62 }
 0x6ee   : > { %v4240_v63 = vsel %vm4239_vm8, %v6000_v18, %v4236_v36 }
 0x6ef   : > { %v4265_v7 = vmul.f32 %v4240_v63, %v8075_v17 }
 0x6f1   : > { %v4284_v31 = vmul.f32 %v8012_v61, %v4265_v7 }
 0x6f3   : > { %v4303_v29 = vadd.f32 %v8025_v51, %v4284_v31 }
 0x71c   : > { %v4058_v60 = vpop.xlane.xlu1 %4057 }
 0x71d   : > { %v4074_v54 = vmul.f32 %v4058_v60, %v7870_v15 }
 0x71f   : > { %v4090_v1 = vadd.f32 1e-05, %v4074_v54 }
 0x721   : > { %6001 = vrsqrt.f32 %v4090_v1  ;;  %vm4247_vm10 = vweird.f32 %v4090_v1 }
 0x727   : > { %v6002_v9 = vpop.eup %6001 }
 0x728   : > { %v4242_v14 = vmul.f32 %v6002_v9, %v4090_v1  ;;  %vm4248_vm9 = vweird.f32 %v6002_v9 }
 0x729   : > { %vm4249_vm11 = vmor %vm4247_vm10, %vm4248_vm9 }
 0x72a   : > { %v4243_v33 = vmul.f32 %v6002_v9, %v4242_v14 }
 0x72c   : > { %v4244_v23 = vmul.f32 0.5, %v4243_v33 }
 0x72d   : > { %v4397_v21 = vpop.f32.mrf.mxu1 }
 0x72e   : > { %v4245_v3 = vsub.f32 1.5, %v4244_v23  ;;  %v4398_v13 = vadd.f32 %v8131_v56, %v4397_v21 }
 0x730   : > { %v4246_v0 = vmul.f32 %v6002_v9, %v4245_v3  ;;  %v4428_v20 = vmax.f32 %v4398_v13, 0.0 }
 0x732   : > { %v4250_v15 = vsel %vm4249_vm11, %v6002_v9, %v4246_v0 }
 0x733   : > { %v4266_v53 = vmul.f32 %v4250_v15, %v8114_v39 }
 0x735   : > { %v4399_v6 = vpop.f32.mrf.mxu1  ;;  %v4285_v58 = vmul.f32 %v8012_v61, %v4266_v53  ;;  %v8175_v61 = vld [vmem:[%s8401_s1] ss:$0 sm:$0xff] }
 0x736   : > { %v4400_v11 = vadd.f32 %v8131_v56, %v4399_v6 }
 0x737   : > { %v4304_v17 = vadd.f32 %v8025_v51, %v4285_v58 }
 0x738   : > { %v4429_v30 = vmax.f32 %v4400_v11, 0.0 }
 0x739   : > { %v4312_v40 = vpack.c.bf16 %v4304_v17, %v4303_v29 }
 0x73a   : > { %v4441_v2 = vpack.c.bf16 %v4429_v30, %v4428_v20 }
 0x73b   : > { %5512 = vmatmul.msk.bf16.gmra.mxu1 %vm3800_vm1, %v4312_v40 }
 0x73c   : > { %4537 = vmatmul.bf16.gmra.mxu2 %v4441_v2 }
 0x73d   : > { %v4402_v39 = vpop.f32.mrf.mxu1 }
 0x73e   : > { %v4403_v38 = vadd.f32 %v8131_v56, %v4402_v39 }
 0x740   : > { %v4430_v46 = vmax.f32 %v4403_v38, 0.0 }
 0x744   : > { %v4523_v22 = vpop.f32.mrf.mxu2 }
 0x745   : > { %v4524_v24 = vadd.f32 %v8175_v61, %v4523_v22  ;;  %v4404_v51 = vpop.f32.mrf.mxu1 }
 0x746   : > { %v4405_v28 = vadd.f32 %v8131_v56, %v4404_v51 }
 0x747   : > { %4563 = vst.msk [vmem:[%s6584_s18] sm:$0xff] %vm3800_vm1, %v4524_v24 }
 0x748   : > { %v4431_v27 = vmax.f32 %v4405_v28, 0.0 }
 0x74a   : > { %v4442_v44 = vpack.c.bf16 %v4431_v27, %v4430_v46 }
 0x74c   : > { %v4525_v50 = vpop.f32.mrf.mxu2  ;;  %4542 = vmatmul.bf16.gmra.mxu2 %v4442_v44 }
 0x74d   : > { %v4526_v35 = vadd.f32 %v8175_v61, %v4525_v50  ;;  %v4407_v4 = vpop.f32.mrf.mxu1 }
 0x74e   : > { %v4408_v57 = vadd.f32 %v8131_v56, %v4407_v4 }
 0x74f   : > { %4564 = vst.msk [vmem:[%s6584_s18 + $0x8] sm:$0xff] %vm3800_vm1, %v4526_v35 }
 0x750   : > { %v4432_v48 = vmax.f32 %v4408_v57, 0.0 }
 0x754   : > { %v4528_v47 = vpop.f32.mrf.mxu2 }
 0x755   : > { %v4529_v10 = vadd.f32 %v8175_v61, %v4528_v47  ;;  %v4409_v49 = vpop.f32.mrf.mxu1 }
 0x756   : > { %v4410_v5 = vadd.f32 %v8131_v56, %v4409_v49 }
 0x757   : > { %4565 = vst.msk [vmem:[%s6584_s18 + $0x10] sm:$0xff] %vm3800_vm1, %v4529_v10 }
 0x758   : > { %v4433_v12 = vmax.f32 %v4410_v5, 0.0 }
 0x75a   : > { %v4443_v52 = vpack.c.bf16 %v4433_v12, %v4432_v48 }
 0x75c   : > { %v4530_v34 = vpop.f32.mrf.mxu2  ;;  %4547 = vmatmul.bf16.gmra.mxu2 %v4443_v52 }
 0x75d   : > { %v4531_v8 = vadd.f32 %v8175_v61, %v4530_v34  ;;  %v4412_v43 = vpop.f32.mrf.mxu1 }
 0x75e   : > { %v4413_v59 = vadd.f32 %v8131_v56, %v4412_v43 }
 0x75f   : > { %4566 = vst.msk [vmem:[%s6584_s18 + $0x18] sm:$0xff] %vm3800_vm1, %v4531_v8 }
 0x760   : > { %v4434_v25 = vmax.f32 %v4413_v59, 0.0 }
 0x764   : > { %v4533_v45 = vpop.f32.mrf.mxu2 }
 0x765   : > { %v4534_v19 = vadd.f32 %v8175_v61, %v4533_v45  ;;  %v4414_v26 = vpop.f32.mrf.mxu1 }
 0x766   : > { %v4415_v55 = vadd.f32 %v8131_v56, %v4414_v26 }
 0x767   : > { %4567 = vst.msk [vmem:[%s6584_s18 + $0x20] sm:$0xff] %vm3800_vm1, %v4534_v19 }
 0x768   : > { %v4435_v16 = vmax.f32 %v4415_v55, 0.0 }
 0x76a   : > { %v4444_v37 = vpack.c.bf16 %v4435_v16, %v4434_v25 }
 0x76c   : > { %v4535_v18 = vpop.f32.mrf.mxu2  ;;  %4552 = vmatmul.bf16.vlgmr.msra.gmra.mxu3 %v4444_v37 }
 0x76d   : > { %v4536_v42 = vadd.f32 %v8175_v61, %v4535_v18 }
 0x76f   : > { %4568 = vst.msk [vmem:[%s6584_s18 + $0x28] sm:$0xff] %vm3800_vm1, %v4536_v42 }
 0x7b8   : > { %v4417_v32 = vpop.f32.mrf.mxu1 }
 0x7b9   : > { %v4418_v60 = vadd.f32 %v8131_v56, %v4417_v32 }
 0x7bb   : > { %v4436_v9 = vmax.f32 %v4418_v60, 0.0 }
 0x7bf   : > { %v4538_v54 = vpop.f32.mrf.mxu2 }
 0x7c0   : > { %v4539_v1 = vadd.f32 %v8175_v61, %v4538_v54  ;;  %v4419_v41 = vpop.f32.mrf.mxu1 }
 0x7c1   : > { %v4420_v62 = vadd.f32 %v8131_v56, %v4419_v41 }
 0x7c2   : > { %4569 = vst.msk [vmem:[%s6584_s18 + $0x30] sm:$0xff] %vm3800_vm1, %v4539_v1 }
 0x7c3   : > { %v4437_v36 = vmax.f32 %v4420_v62, 0.0 }
 0x7c5   : > { %v4445_v14 = vpack.c.bf16 %v4437_v36, %v4436_v9 }
 0x7c7   : > { %v4540_v33 = vpop.f32.mrf.mxu2  ;;  %4557 = vmatmul.bf16.gmra.mxu3 %v4445_v14 }
 0x7c8   : > { %v4541_v63 = vadd.f32 %v8175_v61, %v4540_v33 }
 0x7ca   : > { %4570 = vst.msk [vmem:[%s6584_s18 + $0x38] sm:$0xff] %vm3800_vm1, %v4541_v63 }
 0x7cf   : > { %v4543_v23 = vpop.f32.mrf.mxu2 }
 0x7d0   : > { %v4544_v21 = vadd.f32 %v8175_v61, %v4543_v23 }
 0x7d2   : > { %4571 = vst.msk [vmem:[%s6584_s18 + $0x40] sm:$0xff] %vm3800_vm1, %v4544_v21 }
 0x7d7   : > { %v4545_v56 = vpop.f32.mrf.mxu2 }
 0x7d8   : > { %v4546_v3 = vadd.f32 %v8175_v61, %v4545_v56 }
 0x7da   : > { %4572 = vst.msk [vmem:[%s6584_s18 + $0x48] sm:$0xff] %vm3800_vm1, %v4546_v3 }
 0x7df   : > { %v4548_v7 = vpop.f32.mrf.mxu2 }
 0x7e0   : > { %v4549_v0 = vadd.f32 %v8175_v61, %v4548_v7 }
 0x7e2   : > { %4573 = vst.msk [vmem:[%s6584_s18 + $0x50] sm:$0xff] %vm3800_vm1, %v4549_v0 }
 0x7e7   : > { %v4550_v15 = vpop.f32.mrf.mxu2 }
 0x7e8   : > { %v4551_v53 = vadd.f32 %v8175_v61, %v4550_v15 }
 0x7ea   : > { %4574 = vst.msk [vmem:[%s6584_s18 + $0x58] sm:$0xff] %vm3800_vm1, %v4551_v53 }
 0x7ef   : > { %v4553_v31 = vpop.f32.mrf.mxu3 }
 0x7f0   : > { %v4554_v13 = vadd.f32 %v8175_v61, %v4553_v31 }
 0x7f2   : > { %4575 = vst.msk [vmem:[%s6584_s18 + $0x60] sm:$0xff] %vm3800_vm1, %v4554_v13 }
 0x7f7   : > { %v4555_v6 = vpop.f32.mrf.mxu3 }
 0x7f8   : > { %v4556_v58 = vadd.f32 %v8175_v61, %v4555_v6 }
 0x7fa   : > { %4576 = vst.msk [vmem:[%s6584_s18 + $0x68] sm:$0xff] %vm3800_vm1, %v4556_v58 }
 0x84a   : > { %v4558_v11 = vpop.f32.mrf.mxu3 }
 0x84b   : > { %v4559_v29 = vadd.f32 %v8175_v61, %v4558_v11 }
 0x84d   : > { %4577 = vst.msk [vmem:[%s6584_s18 + $0x70] sm:$0xff] %vm3800_vm1, %v4559_v29 }
 0x852   : > { %v4560_v17 = vpop.f32.mrf.mxu3 }
 0x853   : > { %v4561_v20 = vadd.f32 %v8175_v61, %v4560_v17 }
 0x855   : > { %4578 = vst.msk [vmem:[%s6584_s18 + $0x78] sm:$0xff] %vm3800_vm1, %v4561_v20 }
 0x856 PF: > { %s8402_s11 = sand.u32 1, %s6069_s26  }
 0x857   : > { %s4589_s14 = scalar_lea.sflag [#allocation7], %s8402_s11 }
 0x858   : > { %s8403_s17 = sld [smem:[#allocation14_spill]]  ;;  %s4619_s13 = sshll.u32 %s6592_s6, 4  ;;  %s4620_s13 = int_to_ptr.vmem [resolvable:$true] %s4619_s13 }
 0x859   : > { %s8404_s2 = sld [smem:[#allocation15_spill]]  ;;  %s6125_s9 = smov 2048  }
 0x85a   : > { %s8405_s19 = sld [smem:[#allocation13_spill]]  ;;  %s6126_s1 = smov 8192  }
 0x85b   : > { %s8406_s8 = sld [smem:[#allocation41_spill]]  ;;  %s6127_s11 = smov 16  }
 0x85c   : > { %5689 = sst [smem:[#allocation9]] (%p6308_p10), %s6125_s9  ;;  %s6128_s6 = smov 128  }
 0x85d   : > { %5690 = sst [smem:[#allocation9 + $0x1]] (%p6308_p10), %s6126_s1 }
 0x85e   : > { %s5664_s20 = sshll.u32 %s8403_s17, 5  ;;  %5691 = sst [smem:[#allocation9 + $0x2]] (%p6308_p10), %s6127_s11 }
 0x85f   : > { %s5548_s10 = sshll.u32 %s8404_s2, 8  ;;  %5692 = sst [smem:[#allocation9 + $0x3]] (%p6308_p10), %s6128_s6 }
 0x860   : > { %s4604_s12 = sadd.s32 %s8405_s19, %s5664_s20  ;;  %s6129_s17 = smov 256  }
 0x861   : > { %s4606_s4 = sadd.s32 %s5548_s10, %s4604_s12  ;;  %5693 = sst [smem:[#allocation9 + $0x4]] (%p6308_p10), %s6129_s17 }
 0x862   : > { %s5549_s18 = sshll.u32 %s4606_s4, 3  ;;  %s6130_s2 = smov 8  }
 0x863   : > { %s4608_s30 = scalar_lea.hbm %s8406_s8, %s5549_s18  ;;  %5694 = sst [smem:[#allocation9 + $0x5]] (%p6308_p10), %s6130_s2 }
 0x864   : > { %s4621_s0 = sshll.u32 %s4608_s30, 4  ;;  %s6131_s19 = smov [#allocation8]   ;;  %s4622_s0 = int_to_ptr.hbm [resolvable:$true] %s4621_s0 }
 0x865   : > { %s6132_s20 = smov 0  }
 0x866   : > { %5695 = dma.general (%p6308_p10), %s4620_s13, 8192, %s4622_s0, %s4589_s14, %s6131_s19, [#allocation9], %s6132_s20, 0  }
 0x867 PF: > { %p5701_p0 = scmp.ge.s32.totalorder %s6117_s21, 2  ;;  %s4661_s10 = sand.u32 1, %s6065_s25  }
 0x868   : > { %s4662_s12 = scalar_lea.sflag [#allocation7], %s4661_s10 }
 0x869   : > { %p5698_p2 = pnand %p5701_p0, %p6316_p1 }
 0x86b   : > { %p5699_p3 = pneg %p5698_p2 }
 0x86d   : > { %6060 = dma.done.wait (%p5699_p3), %s4662_s12, 8192  }
 0x86e   : > { %6062 = vsyncadd (%p5699_p3), %s4662_s12, 4294959104  ;;  %s27_s21 = sadd.s32 1, %s6117_s21   ;;  %s8408_s30 = sld [smem:[#allocation12_spill]] }
 0x86f   : > { %p8261_p4 = scmp.ge.s32.totalorder %s27_s21, 10   ;;  %s8409_s14 = sld [smem:[#allocation22_spill]] }
 0x870   : > { %s8410_s15 = sld [smem:[#allocation16_spill]]  ;;  %s8416_s25 = smov %s6069_s26 }
 0x871   : > { %s8411_s5 = sld [smem:[#allocation17_spill]]  ;;  %s8417_s26 = smov %s6073_s27 }
 0x872   : > { %s8412_s17 = sld [smem:[#allocation18_spill]]  ;;  %s8418_s27 = smov %s6329_s28 }
 0x873   : > { %s8413_s18 = sld [smem:[#allocation19_spill]]  ;;  %s8419_s28 = smov %s6081_s29 }
 0x874   : > { %s8414_s19 = sld [smem:[#allocation20_spill]]  ;;  %s8420_s29 = smov %s6326_s16 }
 0x875   : > { %s8415_s20 = sld [smem:[#allocation21_spill]]  ;;  %26 = sbr.rel (!%p8261_p4) target bundleno = 23 (0x17), region = 295 }
 0x877   : > { %s8421_s16 = smov %s8411_s5 }
 0x87a   :  { %4668 = vsyncpa [#allocation7], 1 }
 0x87b   :  { %4670 = vsyncpa [#allocation7 + $0x1], 1 }

</bundles_post_ra>
